<compile_context>
chip_gen: v7x
topology: tpu7x:2x2x1
jax: 0.10.0
libtpu: 0.0.40
codegen_flags: <defaults>
</compile_context>

<pallas_src>
import jax
import jax.numpy as jnp
from jax.experimental import pallas as pl
from jax.experimental.pallas import tpu as pltpu

# ---------------- small, shape-consistent config ----------------
B = 2            # batch
IC = 3           # input channels (module profile uses 3)
IMG = 32         # image side (small stand-in for 224)
P = 8            # patch size
G = IMG // P     # patch grid side  = 4
NP = G * G       # num patches      = 16
S = NP + 1       # seq len (CLS + patches) = 17
D = 64           # hidden size (small stand-in for 768/1024)
H = 4            # attention heads
HD = D // H      # head dim = 16
MLP = 128        # mlp hidden
L = 2            # encoder layers
PROJ = 32        # visual projection dim ("image_embeds" width)
PD = IC * P * P  # flattened patch dim = 192
OUT_PAD = 128    # lane-dense output width (sliced back to PROJ in the wrapper)
NB = 3 * D + D + MLP + D   # packed per-layer bias row width = 448
EPS = 1e-5


def _layernorm(x, g, b):
    mu = jnp.mean(x, axis=-1, keepdims=True)
    var = jnp.mean((x - mu) ** 2, axis=-1, keepdims=True)
    return (x - mu) * jax.lax.rsqrt(var + EPS) * g + b


def clip_vision_kernel(patches_ref, patch_w_ref, pos_ref, ln_ref,
                       wqkv_ref, wo_ref, w1_ref, w2_ref, bias_ref,
                       proj_ref, out_ref):
    # one batch element per grid step
    patches = patches_ref[0]                                   # (S, PD) bf16, row 0 == 0 (CLS slot)

    # patch embedding == Conv2d(IC, D, kernel=P, stride=P, bias=False);
    # CLS embedding is folded into row 0 of the pos table (wrapper-side).
    x = jnp.dot(patches, patch_w_ref[...],
                preferred_element_type=jnp.float32) + pos_ref[...]        # (S, D) f32
    x = _layernorm(x, ln_ref[0:1, :], ln_ref[1:2, :])                      # pre_layrnorm

    scale = 1.0 / (HD ** 0.5)
    for l in range(L):
        lb = 4 + 4 * l
        # ---------- self-attention block ----------
        resid = x
        h = _layernorm(x, ln_ref[lb:lb + 1, :], ln_ref[lb + 1:lb + 2, :])
        qkv = jnp.dot(h.astype(jnp.bfloat16), wqkv_ref[l],
                      preferred_element_type=jnp.float32) + bias_ref[l:l + 1, 0:3 * D]
        q = (qkv[:, 0:D] * scale).astype(jnp.bfloat16)
        k = qkv[:, D:2 * D].astype(jnp.bfloat16)
        v = qkv[:, 2 * D:3 * D].astype(jnp.bfloat16)
        wo_l = wo_ref[l]                                                   # (D, D) bf16

        acc = None
        for hh in range(H):
            lo = hh * HD
            qs = q[:, lo:lo + HD]
            ks = k[:, lo:lo + HD]
            vs = v[:, lo:lo + HD]
            sc = jax.lax.dot_general(qs, ks, (((1,), (1,)), ((), ())),
                                     preferred_element_type=jnp.float32)  # (S, S)
            sc = sc - jnp.max(sc, axis=-1, keepdims=True)
            e = jnp.exp(sc)
            p = e * pl.reciprocal(jnp.sum(e, axis=-1, keepdims=True), approx=True)
            ctx = jnp.dot(p.astype(jnp.bfloat16), vs,
                          preferred_element_type=jnp.float32)              # (S, HD)
            part = jnp.dot(ctx.astype(jnp.bfloat16), wo_l[lo:lo + HD, :],
                           preferred_element_type=jnp.float32)             # (S, D)
            acc = part if acc is None else acc + part
        x = resid + acc + bias_ref[l:l + 1, 3 * D:4 * D]

        # ---------- MLP block (QuickGELU) ----------
        resid = x
        h = _layernorm(x, ln_ref[lb + 2:lb + 3, :], ln_ref[lb + 3:lb + 4, :])
        h = jnp.dot(h.astype(jnp.bfloat16), w1_ref[l],
                    preferred_element_type=jnp.float32) + bias_ref[l:l + 1, 4 * D:4 * D + MLP]
        h = h * jax.nn.sigmoid(1.702 * h)
        h = jnp.dot(h.astype(jnp.bfloat16), w2_ref[l],
                    preferred_element_type=jnp.float32) + bias_ref[l:l + 1, 4 * D + MLP:NB]
        x = resid + h

    pooled = _layernorm(x[0:1, :], ln_ref[2:3, :], ln_ref[3:4, :])         # post LN, CLS token
    out_ref[0] = jnp.dot(pooled.astype(jnp.bfloat16), proj_ref[...],
                         preferred_element_type=jnp.float32)               # (1, OUT_PAD)


# ---------------- parameter construction / packing ----------------
def make_params(key):
    def nrm(k, shape, scale=0.02):
        return (scale * jax.random.normal(k, shape)).astype(jnp.float32)

    ks = iter(jax.random.split(key, 40))
    params = dict(
        patch_w=nrm(next(ks), (PD, D)),
        cls=nrm(next(ks), (1, D)),
        pos=nrm(next(ks), (S, D)),
        pre_g=(1.0 + nrm(next(ks), (1, D), 0.05)),
        pre_b=nrm(next(ks), (1, D), 0.05),
        ln1_g=(1.0 + nrm(next(ks), (L, D), 0.05)),
        ln1_b=nrm(next(ks), (L, D), 0.05),
        wq=nrm(next(ks), (L, D, D)), bq=nrm(next(ks), (L, D), 0.02),
        wk=nrm(next(ks), (L, D, D)), bk=nrm(next(ks), (L, D), 0.02),
        wv=nrm(next(ks), (L, D, D)), bv=nrm(next(ks), (L, D), 0.02),
        wo=nrm(next(ks), (L, D, D)), bo=nrm(next(ks), (L, D), 0.02),
        ln2_g=(1.0 + nrm(next(ks), (L, D), 0.05)),
        ln2_b=nrm(next(ks), (L, D), 0.05),
        w1=nrm(next(ks), (L, D, MLP)), b1=nrm(next(ks), (L, MLP), 0.02),
        w2=nrm(next(ks), (L, MLP, D)), b2=nrm(next(ks), (L, D), 0.02),
        post_g=(1.0 + nrm(next(ks), (1, D), 0.05)),
        post_b=nrm(next(ks), (1, D), 0.05),
        proj=nrm(next(ks), (D, PROJ)),
    )
    return params


PACKED_ORDER = ["patch_w", "pos_cls", "ln_pack", "wqkv", "wo", "w1", "w2",
                "bias_pack", "proj_pad"]


def pack_params(p):
    # fused QKV weight (L, D, 3D) and packed per-layer biases (L, NB)
    wqkv = jnp.concatenate([p["wq"], p["wk"], p["wv"]], axis=-1)
    bias_pack = jnp.concatenate([p["bq"], p["bk"], p["bv"], p["bo"],
                                 p["b1"], p["b2"]], axis=-1)               # (L, NB)
    # all LayerNorm params in one (4 + 4L, D) table:
    #   rows 0..3: pre_g, pre_b, post_g, post_b; then per layer: ln1_g, ln1_b, ln2_g, ln2_b
    ln_rows = [p["pre_g"], p["pre_b"], p["post_g"], p["post_b"]]
    for l in range(L):
        ln_rows += [p["ln1_g"][l:l + 1], p["ln1_b"][l:l + 1],
                    p["ln2_g"][l:l + 1], p["ln2_b"][l:l + 1]]
    ln_pack = jnp.concatenate(ln_rows, axis=0)
    # fold the CLS embedding into row 0 of the position table
    pos_cls = p["pos"].at[0:1, :].add(p["cls"])
    # lane-dense (zero-padded) visual projection
    proj_pad = jnp.zeros((D, OUT_PAD), jnp.float32).at[:, :PROJ].set(p["proj"])
    return dict(
        patch_w=p["patch_w"].astype(jnp.bfloat16),
        pos_cls=pos_cls.astype(jnp.float32),
        ln_pack=ln_pack.astype(jnp.float32),
        wqkv=wqkv.astype(jnp.bfloat16),
        wo=p["wo"].astype(jnp.bfloat16),
        w1=p["w1"].astype(jnp.bfloat16),
        w2=p["w2"].astype(jnp.bfloat16),
        bias_pack=bias_pack.astype(jnp.float32),
        proj_pad=proj_pad.astype(jnp.bfloat16),
    )


# ---------------- wrapper ----------------
def clip_image_embeds(images, packed):
    """images: NCHW [B, IC, IMG, IMG] float32 -> image_embeds [B, PROJ]."""
    # glue: unfold stride-P patches (the conv's im2col) + zero row for the CLS slot
    x = images.reshape(B, IC, G, P, G, P)
    x = x.transpose(0, 2, 4, 1, 3, 5)                         # (B, GH, GW, IC, P, P)
    x = x.reshape(B, NP, PD)
    patches = jnp.concatenate(
        [jnp.zeros((B, 1, PD), x.dtype), x], axis=1).astype(jnp.bfloat16)  # (B, S, PD)

    def rep(arr):
        shp = tuple(arr.shape)
        n = len(shp)
        return pl.BlockSpec(shp, lambda b, _n=n: (0,) * _n)

    in_specs = [pl.BlockSpec((1, S, PD), lambda b: (b, 0, 0))]
    in_specs += [rep(packed[name]) for name in PACKED_ORDER]

    out = pl.pallas_call(
        clip_vision_kernel,
        out_shape=jax.ShapeDtypeStruct((B, 1, OUT_PAD), jnp.float32),
        grid=(B,),
        in_specs=in_specs,
        out_specs=pl.BlockSpec((1, 1, OUT_PAD), lambda b: (b, 0, 0)),
        compiler_params=pltpu.CompilerParams(dimension_semantics=("parallel",)),
    )(patches, *[packed[name] for name in PACKED_ORDER])
    return out.reshape(B, OUT_PAD)[:, :PROJ]


# -------- pure-JAX f32 reference (same math, batched) for a sanity check --------
def clip_image_embeds_ref(images, p):
    x = images.reshape(B, IC, G, P, G, P).transpose(0, 2, 4, 1, 3, 5).reshape(B, NP, PD)
    emb = jnp.einsum("bnp,pd->bnd", x, p["patch_w"])
    cls = jnp.broadcast_to(p["cls"][None], (B, 1, D))
    h = jnp.concatenate([cls, emb], axis=1) + p["pos"][None]
    h = _layernorm(h, p["pre_g"][0], p["pre_b"][0])
    scale = 1.0 / (HD ** 0.5)
    for l in range(L):
        r = h
        t = _layernorm(h, p["ln1_g"][l], p["ln1_b"][l])
        q = t @ p["wq"][l] + p["bq"][l]
        k = t @ p["wk"][l] + p["bk"][l]
        v = t @ p["wv"][l] + p["bv"][l]
        q = q.reshape(B, S, H, HD).transpose(0, 2, 1, 3) * scale
        k = k.reshape(B, S, H, HD).transpose(0, 2, 1, 3)
        v = v.reshape(B, S, H, HD).transpose(0, 2, 1, 3)
        sc = jnp.einsum("bhqd,bhkd->bhqk", q, k)
        a = jax.nn.softmax(sc, axis=-1)
        o = jnp.einsum("bhqk,bhkd->bhqd", a, v).transpose(0, 2, 1, 3).reshape(B, S, D)
        h = r + (o @ p["wo"][l] + p["bo"][l])
        r = h
        t = _layernorm(h, p["ln2_g"][l], p["ln2_b"][l])
        t = t @ p["w1"][l] + p["b1"][l]
        t = t * jax.nn.sigmoid(1.702 * t)
        h = r + (t @ p["w2"][l] + p["b2"][l])
    pooled = _layernorm(h[:, 0, :], p["post_g"][0], p["post_b"][0])
    return pooled @ p["proj"]


if __name__ == "__main__":
    key = jax.random.PRNGKey(0)
    k_img, k_par = jax.random.split(key)
    images = jax.random.normal(k_img, (B, IC, IMG, IMG), dtype=jnp.float32)
    params = make_params(k_par)
    packed = pack_params(params)

    out = clip_image_embeds(images, packed)
    out = jax.block_until_ready(out)
    assert out.shape == (B, PROJ)

    ref = jax.block_until_ready(clip_image_embeds_ref(images, params))
    # kernel uses bf16 matmul operands + approx reciprocal; reference is pure f32
    assert jnp.allclose(out, ref, rtol=5e-2, atol=2e-2), (out, ref)

    print("KERNEL_OK")
</pallas_src>

<mosaic_0001>
module attributes {stable_mosaic.version = 11 : i64} {
  func.func @clip_vision_kernel(%arg0: i32, %arg1: memref<1x17x192xbf16, #tpu.memory_space<vmem>>, %arg2: memref<192x64xbf16, #tpu.memory_space<vmem>>, %arg3: memref<17x64xf32, #tpu.memory_space<vmem>>, %arg4: memref<12x64xf32, #tpu.memory_space<vmem>>, %arg5: memref<2x64x192xbf16, #tpu.memory_space<vmem>>, %arg6: memref<2x64x64xbf16, #tpu.memory_space<vmem>>, %arg7: memref<2x64x128xbf16, #tpu.memory_space<vmem>>, %arg8: memref<2x128x64xbf16, #tpu.memory_space<vmem>>, %arg9: memref<2x448xf32, #tpu.memory_space<vmem>>, %arg10: memref<64x128xbf16, #tpu.memory_space<vmem>>, %arg11: memref<1x1x128xf32, #tpu.memory_space<vmem>>) attributes {dimension_semantics = [#tpu.dimension_semantics<parallel>], iteration_bounds = array<i64: 2>, scalar_prefetch = 0 : i64, scratch_operands = 0 : i64, tpu.core_type = #tpu.core_type<tc>, window_params = [{transform_indices = @transform_0, window_bounds = array<i64: 1, 17, 192>}, {pipeline_mode = #tpu.pipeline_mode<synchronous>, transform_indices = @transform_1, window_bounds = array<i64: 192, 64>}, {pipeline_mode = #tpu.pipeline_mode<synchronous>, transform_indices = @transform_2, window_bounds = array<i64: 17, 64>}, {pipeline_mode = #tpu.pipeline_mode<synchronous>, transform_indices = @transform_3, window_bounds = array<i64: 12, 64>}, {pipeline_mode = #tpu.pipeline_mode<synchronous>, transform_indices = @transform_4, window_bounds = array<i64: 2, 64, 192>}, {pipeline_mode = #tpu.pipeline_mode<synchronous>, transform_indices = @transform_5, window_bounds = array<i64: 2, 64, 64>}, {pipeline_mode = #tpu.pipeline_mode<synchronous>, transform_indices = @transform_6, window_bounds = array<i64: 2, 64, 128>}, {pipeline_mode = #tpu.pipeline_mode<synchronous>, transform_indices = @transform_7, window_bounds = array<i64: 2, 128, 64>}, {pipeline_mode = #tpu.pipeline_mode<synchronous>, transform_indices = @transform_8, window_bounds = array<i64: 2, 448>}, {pipeline_mode = #tpu.pipeline_mode<synchronous>, transform_indices = @transform_9, window_bounds = array<i64: 64, 128>}, {transform_indices = @transform_10, window_bounds = array<i64: 1, 1, 128>}]} {
    %c0 = arith.constant 0 : index
    %c0_0 = arith.constant 0 : index
    %c0_1 = arith.constant 0 : index
    %0 = vector.load %arg1[%c0, %c0_0, %c0_1] : memref<1x17x192xbf16, #tpu.memory_space<vmem>>, vector<1x17x192xbf16>
    %1 = vector.shape_cast %0 : vector<1x17x192xbf16> to vector<17x192xbf16>
    %c0_2 = arith.constant 0 : index
    %c0_3 = arith.constant 0 : index
    %2 = vector.load %arg2[%c0_2, %c0_3] : memref<192x64xbf16, #tpu.memory_space<vmem>>, vector<192x64xbf16>
    %cst = arith.constant dense<0.000000e+00> : vector<17x64xf32>
    %3 = tpu.matmul %1, %2, %cst {dimension_numbers = #tpu.dot_dimension_numbers<[1], [0], [0], [1], [0, 0, 1, 1], [], []>} : vector<17x192xbf16>, vector<192x64xbf16>, vector<17x64xf32> -> vector<17x64xf32>
    %c0_4 = arith.constant 0 : index
    %c0_5 = arith.constant 0 : index
    %4 = vector.load %arg3[%c0_4, %c0_5] : memref<17x64xf32, #tpu.memory_space<vmem>>, vector<17x64xf32>
    %5 = arith.addf %3, %4 : vector<17x64xf32>
    %c0_6 = arith.constant 0 : index
    %c0_7 = arith.constant 0 : index
    %6 = vector.load %arg4[%c0_6, %c0_7] : memref<12x64xf32, #tpu.memory_space<vmem>>, vector<1x64xf32>
    %c1 = arith.constant 1 : index
    %c0_8 = arith.constant 0 : index
    %7 = vector.load %arg4[%c1, %c0_8] : memref<12x64xf32, #tpu.memory_space<vmem>>, vector<1x64xf32>
    %cst_9 = arith.constant dense<0.000000e+00> : vector<17xf32>
    %8 = vector.multi_reduction <add>, %5, %cst_9 [1] : vector<17x64xf32> to vector<17xf32>
    %9 = vector.shape_cast %8 : vector<17xf32> to vector<17x1xf32>
    %cst_10 = arith.constant 6.400000e+01 : f32
    %10 = vector.broadcast %cst_10 : f32 to vector<17x1xf32>
    %11 = arith.divf %9, %10 : vector<17x1xf32>
    %12 = vector.broadcast %11 : vector<17x1xf32> to vector<17x64xf32>
    %13 = arith.subf %5, %12 : vector<17x64xf32>
    %14 = arith.mulf %13, %13 : vector<17x64xf32>
    %cst_11 = arith.constant dense<0.000000e+00> : vector<17xf32>
    %15 = vector.multi_reduction <add>, %14, %cst_11 [1] : vector<17x64xf32> to vector<17xf32>
    %16 = vector.shape_cast %15 : vector<17xf32> to vector<17x1xf32>
    %cst_12 = arith.constant 6.400000e+01 : f32
    %17 = vector.broadcast %cst_12 : f32 to vector<17x1xf32>
    %18 = arith.divf %16, %17 : vector<17x1xf32>
    %19 = vector.broadcast %11 : vector<17x1xf32> to vector<17x64xf32>
    %20 = arith.subf %5, %19 : vector<17x64xf32>
    %cst_13 = arith.constant 9.99999974E-6 : f32
    %21 = vector.broadcast %cst_13 : f32 to vector<17x1xf32>
    %22 = arith.addf %18, %21 : vector<17x1xf32>
    %23 = math.rsqrt %22 : vector<17x1xf32>
    %24 = vector.broadcast %23 : vector<17x1xf32> to vector<17x64xf32>
    %25 = arith.mulf %20, %24 : vector<17x64xf32>
    %26 = vector.broadcast %6 : vector<1x64xf32> to vector<17x64xf32>
    %27 = arith.mulf %25, %26 : vector<17x64xf32>
    %28 = vector.broadcast %7 : vector<1x64xf32> to vector<17x64xf32>
    %29 = arith.addf %27, %28 : vector<17x64xf32>
    %c4 = arith.constant 4 : index
    %c0_14 = arith.constant 0 : index
    %30 = vector.load %arg4[%c4, %c0_14] : memref<12x64xf32, #tpu.memory_space<vmem>>, vector<1x64xf32>
    %c5 = arith.constant 5 : index
    %c0_15 = arith.constant 0 : index
    %31 = vector.load %arg4[%c5, %c0_15] : memref<12x64xf32, #tpu.memory_space<vmem>>, vector<1x64xf32>
    %cst_16 = arith.constant dense<0.000000e+00> : vector<17xf32>
    %32 = vector.multi_reduction <add>, %29, %cst_16 [1] : vector<17x64xf32> to vector<17xf32>
    %33 = vector.shape_cast %32 : vector<17xf32> to vector<17x1xf32>
    %cst_17 = arith.constant 6.400000e+01 : f32
    %34 = vector.broadcast %cst_17 : f32 to vector<17x1xf32>
    %35 = arith.divf %33, %34 : vector<17x1xf32>
    %36 = vector.broadcast %35 : vector<17x1xf32> to vector<17x64xf32>
    %37 = arith.subf %29, %36 : vector<17x64xf32>
    %38 = arith.mulf %37, %37 : vector<17x64xf32>
    %cst_18 = arith.constant dense<0.000000e+00> : vector<17xf32>
    %39 = vector.multi_reduction <add>, %38, %cst_18 [1] : vector<17x64xf32> to vector<17xf32>
    %40 = vector.shape_cast %39 : vector<17xf32> to vector<17x1xf32>
    %cst_19 = arith.constant 6.400000e+01 : f32
    %41 = vector.broadcast %cst_19 : f32 to vector<17x1xf32>
    %42 = arith.divf %40, %41 : vector<17x1xf32>
    %43 = vector.broadcast %35 : vector<17x1xf32> to vector<17x64xf32>
    %44 = arith.subf %29, %43 : vector<17x64xf32>
    %cst_20 = arith.constant 9.99999974E-6 : f32
    %45 = vector.broadcast %cst_20 : f32 to vector<17x1xf32>
    %46 = arith.addf %42, %45 : vector<17x1xf32>
    %47 = math.rsqrt %46 : vector<17x1xf32>
    %48 = vector.broadcast %47 : vector<17x1xf32> to vector<17x64xf32>
    %49 = arith.mulf %44, %48 : vector<17x64xf32>
    %50 = vector.broadcast %30 : vector<1x64xf32> to vector<17x64xf32>
    %51 = arith.mulf %49, %50 : vector<17x64xf32>
    %52 = vector.broadcast %31 : vector<1x64xf32> to vector<17x64xf32>
    %53 = arith.addf %51, %52 : vector<17x64xf32>
    %54 = arith.truncf %53 : vector<17x64xf32> to vector<17x64xbf16>
    %c0_21 = arith.constant 0 : index
    %c0_22 = arith.constant 0 : index
    %c0_23 = arith.constant 0 : index
    %55 = vector.load %arg5[%c0_21, %c0_22, %c0_23] : memref<2x64x192xbf16, #tpu.memory_space<vmem>>, vector<1x64x192xbf16>
    %56 = vector.shape_cast %55 : vector<1x64x192xbf16> to vector<64x192xbf16>
    %cst_24 = arith.constant dense<0.000000e+00> : vector<17x192xf32>
    %57 = tpu.matmul %54, %56, %cst_24 {dimension_numbers = #tpu.dot_dimension_numbers<[1], [0], [0], [1], [0, 0, 1, 1], [], []>} : vector<17x64xbf16>, vector<64x192xbf16>, vector<17x192xf32> -> vector<17x192xf32>
    %c0_25 = arith.constant 0 : index
    %c0_26 = arith.constant 0 : index
    %58 = vector.load %arg9[%c0_25, %c0_26] : memref<2x448xf32, #tpu.memory_space<vmem>>, vector<1x192xf32>
    %59 = vector.broadcast %58 : vector<1x192xf32> to vector<17x192xf32>
    %60 = arith.addf %57, %59 : vector<17x192xf32>
    %61 = vector.extract_strided_slice %60 {offsets = [0, 0], sizes = [17, 64], strides = [1, 1]} : vector<17x192xf32> to vector<17x64xf32>
    %cst_27 = arith.constant 2.500000e-01 : f32
    %62 = vector.broadcast %cst_27 : f32 to vector<17x64xf32>
    %63 = arith.mulf %61, %62 : vector<17x64xf32>
    %64 = arith.truncf %63 : vector<17x64xf32> to vector<17x64xbf16>
    %65 = vector.extract_strided_slice %60 {offsets = [0, 64], sizes = [17, 64], strides = [1, 1]} : vector<17x192xf32> to vector<17x64xf32>
    %66 = arith.truncf %65 : vector<17x64xf32> to vector<17x64xbf16>
    %67 = vector.extract_strided_slice %60 {offsets = [0, 128], sizes = [17, 64], strides = [1, 1]} : vector<17x192xf32> to vector<17x64xf32>
    %68 = arith.truncf %67 : vector<17x64xf32> to vector<17x64xbf16>
    %c0_28 = arith.constant 0 : index
    %c0_29 = arith.constant 0 : index
    %c0_30 = arith.constant 0 : index
    %69 = vector.load %arg6[%c0_28, %c0_29, %c0_30] : memref<2x64x64xbf16, #tpu.memory_space<vmem>>, vector<1x64x64xbf16>
    %70 = vector.shape_cast %69 : vector<1x64x64xbf16> to vector<64x64xbf16>
    %71 = vector.extract_strided_slice %64 {offsets = [0, 0], sizes = [17, 16], strides = [1, 1]} : vector<17x64xbf16> to vector<17x16xbf16>
    %72 = vector.extract_strided_slice %66 {offsets = [0, 0], sizes = [17, 16], strides = [1, 1]} : vector<17x64xbf16> to vector<17x16xbf16>
    %73 = vector.extract_strided_slice %68 {offsets = [0, 0], sizes = [17, 16], strides = [1, 1]} : vector<17x64xbf16> to vector<17x16xbf16>
    %cst_31 = arith.constant dense<0.000000e+00> : vector<17x17xf32>
    %74 = tpu.matmul %71, %72, %cst_31 {dimension_numbers = #tpu.dot_dimension_numbers<[1], [1], [0], [0], [0, 0, 1, 0], [], []>} : vector<17x16xbf16>, vector<17x16xbf16>, vector<17x17xf32> -> vector<17x17xf32>
    %cst_32 = arith.constant dense<0xFF800000> : vector<17xf32>
    %75 = vector.multi_reduction <maximumf>, %74, %cst_32 [1] : vector<17x17xf32> to vector<17xf32>
    %76 = vector.shape_cast %75 : vector<17xf32> to vector<17x1xf32>
    %77 = vector.broadcast %76 : vector<17x1xf32> to vector<17x17xf32>
    %78 = arith.subf %74, %77 : vector<17x17xf32>
    %79 = math.exp %78 : vector<17x17xf32>
    %cst_33 = arith.constant dense<0.000000e+00> : vector<17xf32>
    %80 = vector.multi_reduction <add>, %79, %cst_33 [1] : vector<17x17xf32> to vector<17xf32>
    %81 = vector.shape_cast %80 : vector<17xf32> to vector<17x1xf32>
    %82 = tpu.reciprocal %81 {approx = true} : vector<17x1xf32> -> vector<17x1xf32>
    %83 = vector.broadcast %82 : vector<17x1xf32> to vector<17x17xf32>
    %84 = arith.mulf %79, %83 : vector<17x17xf32>
    %85 = arith.truncf %84 : vector<17x17xf32> to vector<17x17xbf16>
    %cst_34 = arith.constant dense<0.000000e+00> : vector<17x16xf32>
    %86 = tpu.matmul %85, %73, %cst_34 {dimension_numbers = #tpu.dot_dimension_numbers<[1], [0], [0], [1], [0, 0, 1, 1], [], []>} : vector<17x17xbf16>, vector<17x16xbf16>, vector<17x16xf32> -> vector<17x16xf32>
    %87 = arith.truncf %86 : vector<17x16xf32> to vector<17x16xbf16>
    %88 = vector.extract_strided_slice %70 {offsets = [0, 0], sizes = [16, 64], strides = [1, 1]} : vector<64x64xbf16> to vector<16x64xbf16>
    %cst_35 = arith.constant dense<0.000000e+00> : vector<17x64xf32>
    %89 = tpu.matmul %87, %88, %cst_35 {dimension_numbers = #tpu.dot_dimension_numbers<[1], [0], [0], [1], [0, 0, 1, 1], [], []>} : vector<17x16xbf16>, vector<16x64xbf16>, vector<17x64xf32> -> vector<17x64xf32>
    %90 = vector.extract_strided_slice %64 {offsets = [0, 16], sizes = [17, 16], strides = [1, 1]} : vector<17x64xbf16> to vector<17x16xbf16>
    %91 = vector.extract_strided_slice %66 {offsets = [0, 16], sizes = [17, 16], strides = [1, 1]} : vector<17x64xbf16> to vector<17x16xbf16>
    %92 = vector.extract_strided_slice %68 {offsets = [0, 16], sizes = [17, 16], strides = [1, 1]} : vector<17x64xbf16> to vector<17x16xbf16>
    %cst_36 = arith.constant dense<0.000000e+00> : vector<17x17xf32>
    %93 = tpu.matmul %90, %91, %cst_36 {dimension_numbers = #tpu.dot_dimension_numbers<[1], [1], [0], [0], [0, 0, 1, 0], [], []>} : vector<17x16xbf16>, vector<17x16xbf16>, vector<17x17xf32> -> vector<17x17xf32>
    %cst_37 = arith.constant dense<0xFF800000> : vector<17xf32>
    %94 = vector.multi_reduction <maximumf>, %93, %cst_37 [1] : vector<17x17xf32> to vector<17xf32>
    %95 = vector.shape_cast %94 : vector<17xf32> to vector<17x1xf32>
    %96 = vector.broadcast %95 : vector<17x1xf32> to vector<17x17xf32>
    %97 = arith.subf %93, %96 : vector<17x17xf32>
    %98 = math.exp %97 : vector<17x17xf32>
    %cst_38 = arith.constant dense<0.000000e+00> : vector<17xf32>
    %99 = vector.multi_reduction <add>, %98, %cst_38 [1] : vector<17x17xf32> to vector<17xf32>
    %100 = vector.shape_cast %99 : vector<17xf32> to vector<17x1xf32>
    %101 = tpu.reciprocal %100 {approx = true} : vector<17x1xf32> -> vector<17x1xf32>
    %102 = vector.broadcast %101 : vector<17x1xf32> to vector<17x17xf32>
    %103 = arith.mulf %98, %102 : vector<17x17xf32>
    %104 = arith.truncf %103 : vector<17x17xf32> to vector<17x17xbf16>
    %cst_39 = arith.constant dense<0.000000e+00> : vector<17x16xf32>
    %105 = tpu.matmul %104, %92, %cst_39 {dimension_numbers = #tpu.dot_dimension_numbers<[1], [0], [0], [1], [0, 0, 1, 1], [], []>} : vector<17x17xbf16>, vector<17x16xbf16>, vector<17x16xf32> -> vector<17x16xf32>
    %106 = arith.truncf %105 : vector<17x16xf32> to vector<17x16xbf16>
    %107 = vector.extract_strided_slice %70 {offsets = [16, 0], sizes = [16, 64], strides = [1, 1]} : vector<64x64xbf16> to vector<16x64xbf16>
    %cst_40 = arith.constant dense<0.000000e+00> : vector<17x64xf32>
    %108 = tpu.matmul %106, %107, %cst_40 {dimension_numbers = #tpu.dot_dimension_numbers<[1], [0], [0], [1], [0, 0, 1, 1], [], []>} : vector<17x16xbf16>, vector<16x64xbf16>, vector<17x64xf32> -> vector<17x64xf32>
    %109 = arith.addf %89, %108 : vector<17x64xf32>
    %110 = vector.extract_strided_slice %64 {offsets = [0, 32], sizes = [17, 16], strides = [1, 1]} : vector<17x64xbf16> to vector<17x16xbf16>
    %111 = vector.extract_strided_slice %66 {offsets = [0, 32], sizes = [17, 16], strides = [1, 1]} : vector<17x64xbf16> to vector<17x16xbf16>
    %112 = vector.extract_strided_slice %68 {offsets = [0, 32], sizes = [17, 16], strides = [1, 1]} : vector<17x64xbf16> to vector<17x16xbf16>
    %cst_41 = arith.constant dense<0.000000e+00> : vector<17x17xf32>
    %113 = tpu.matmul %110, %111, %cst_41 {dimension_numbers = #tpu.dot_dimension_numbers<[1], [1], [0], [0], [0, 0, 1, 0], [], []>} : vector<17x16xbf16>, vector<17x16xbf16>, vector<17x17xf32> -> vector<17x17xf32>
    %cst_42 = arith.constant dense<0xFF800000> : vector<17xf32>
    %114 = vector.multi_reduction <maximumf>, %113, %cst_42 [1] : vector<17x17xf32> to vector<17xf32>
    %115 = vector.shape_cast %114 : vector<17xf32> to vector<17x1xf32>
    %116 = vector.broadcast %115 : vector<17x1xf32> to vector<17x17xf32>
    %117 = arith.subf %113, %116 : vector<17x17xf32>
    %118 = math.exp %117 : vector<17x17xf32>
    %cst_43 = arith.constant dense<0.000000e+00> : vector<17xf32>
    %119 = vector.multi_reduction <add>, %118, %cst_43 [1] : vector<17x17xf32> to vector<17xf32>
    %120 = vector.shape_cast %119 : vector<17xf32> to vector<17x1xf32>
    %121 = tpu.reciprocal %120 {approx = true} : vector<17x1xf32> -> vector<17x1xf32>
    %122 = vector.broadcast %121 : vector<17x1xf32> to vector<17x17xf32>
    %123 = arith.mulf %118, %122 : vector<17x17xf32>
    %124 = arith.truncf %123 : vector<17x17xf32> to vector<17x17xbf16>
    %cst_44 = arith.constant dense<0.000000e+00> : vector<17x16xf32>
    %125 = tpu.matmul %124, %112, %cst_44 {dimension_numbers = #tpu.dot_dimension_numbers<[1], [0], [0], [1], [0, 0, 1, 1], [], []>} : vector<17x17xbf16>, vector<17x16xbf16>, vector<17x16xf32> -> vector<17x16xf32>
    %126 = arith.truncf %125 : vector<17x16xf32> to vector<17x16xbf16>
    %127 = vector.extract_strided_slice %70 {offsets = [32, 0], sizes = [16, 64], strides = [1, 1]} : vector<64x64xbf16> to vector<16x64xbf16>
    %cst_45 = arith.constant dense<0.000000e+00> : vector<17x64xf32>
    %128 = tpu.matmul %126, %127, %cst_45 {dimension_numbers = #tpu.dot_dimension_numbers<[1], [0], [0], [1], [0, 0, 1, 1], [], []>} : vector<17x16xbf16>, vector<16x64xbf16>, vector<17x64xf32> -> vector<17x64xf32>
    %129 = arith.addf %109, %128 : vector<17x64xf32>
    %130 = vector.extract_strided_slice %64 {offsets = [0, 48], sizes = [17, 16], strides = [1, 1]} : vector<17x64xbf16> to vector<17x16xbf16>
    %131 = vector.extract_strided_slice %66 {offsets = [0, 48], sizes = [17, 16], strides = [1, 1]} : vector<17x64xbf16> to vector<17x16xbf16>
    %132 = vector.extract_strided_slice %68 {offsets = [0, 48], sizes = [17, 16], strides = [1, 1]} : vector<17x64xbf16> to vector<17x16xbf16>
    %cst_46 = arith.constant dense<0.000000e+00> : vector<17x17xf32>
    %133 = tpu.matmul %130, %131, %cst_46 {dimension_numbers = #tpu.dot_dimension_numbers<[1], [1], [0], [0], [0, 0, 1, 0], [], []>} : vector<17x16xbf16>, vector<17x16xbf16>, vector<17x17xf32> -> vector<17x17xf32>
    %cst_47 = arith.constant dense<0xFF800000> : vector<17xf32>
    %134 = vector.multi_reduction <maximumf>, %133, %cst_47 [1] : vector<17x17xf32> to vector<17xf32>
    %135 = vector.shape_cast %134 : vector<17xf32> to vector<17x1xf32>
    %136 = vector.broadcast %135 : vector<17x1xf32> to vector<17x17xf32>
    %137 = arith.subf %133, %136 : vector<17x17xf32>
    %138 = math.exp %137 : vector<17x17xf32>
    %cst_48 = arith.constant dense<0.000000e+00> : vector<17xf32>
    %139 = vector.multi_reduction <add>, %138, %cst_48 [1] : vector<17x17xf32> to vector<17xf32>
    %140 = vector.shape_cast %139 : vector<17xf32> to vector<17x1xf32>
    %141 = tpu.reciprocal %140 {approx = true} : vector<17x1xf32> -> vector<17x1xf32>
    %142 = vector.broadcast %141 : vector<17x1xf32> to vector<17x17xf32>
    %143 = arith.mulf %138, %142 : vector<17x17xf32>
    %144 = arith.truncf %143 : vector<17x17xf32> to vector<17x17xbf16>
    %cst_49 = arith.constant dense<0.000000e+00> : vector<17x16xf32>
    %145 = tpu.matmul %144, %132, %cst_49 {dimension_numbers = #tpu.dot_dimension_numbers<[1], [0], [0], [1], [0, 0, 1, 1], [], []>} : vector<17x17xbf16>, vector<17x16xbf16>, vector<17x16xf32> -> vector<17x16xf32>
    %146 = arith.truncf %145 : vector<17x16xf32> to vector<17x16xbf16>
    %147 = vector.extract_strided_slice %70 {offsets = [48, 0], sizes = [16, 64], strides = [1, 1]} : vector<64x64xbf16> to vector<16x64xbf16>
    %cst_50 = arith.constant dense<0.000000e+00> : vector<17x64xf32>
    %148 = tpu.matmul %146, %147, %cst_50 {dimension_numbers = #tpu.dot_dimension_numbers<[1], [0], [0], [1], [0, 0, 1, 1], [], []>} : vector<17x16xbf16>, vector<16x64xbf16>, vector<17x64xf32> -> vector<17x64xf32>
    %149 = arith.addf %129, %148 : vector<17x64xf32>
    %150 = arith.addf %29, %149 : vector<17x64xf32>
    %c0_51 = arith.constant 0 : index
    %c192 = arith.constant 192 : index
    %151 = vector.load %arg9[%c0_51, %c192] : memref<2x448xf32, #tpu.memory_space<vmem>>, vector<1x64xf32>
    %152 = vector.broadcast %151 : vector<1x64xf32> to vector<17x64xf32>
    %153 = arith.addf %150, %152 : vector<17x64xf32>
    %c6 = arith.constant 6 : index
    %c0_52 = arith.constant 0 : index
    %154 = vector.load %arg4[%c6, %c0_52] : memref<12x64xf32, #tpu.memory_space<vmem>>, vector<1x64xf32>
    %c7 = arith.constant 7 : index
    %c0_53 = arith.constant 0 : index
    %155 = vector.load %arg4[%c7, %c0_53] : memref<12x64xf32, #tpu.memory_space<vmem>>, vector<1x64xf32>
    %cst_54 = arith.constant dense<0.000000e+00> : vector<17xf32>
    %156 = vector.multi_reduction <add>, %153, %cst_54 [1] : vector<17x64xf32> to vector<17xf32>
    %157 = vector.shape_cast %156 : vector<17xf32> to vector<17x1xf32>
    %cst_55 = arith.constant 6.400000e+01 : f32
    %158 = vector.broadcast %cst_55 : f32 to vector<17x1xf32>
    %159 = arith.divf %157, %158 : vector<17x1xf32>
    %160 = vector.broadcast %159 : vector<17x1xf32> to vector<17x64xf32>
    %161 = arith.subf %153, %160 : vector<17x64xf32>
    %162 = arith.mulf %161, %161 : vector<17x64xf32>
    %cst_56 = arith.constant dense<0.000000e+00> : vector<17xf32>
    %163 = vector.multi_reduction <add>, %162, %cst_56 [1] : vector<17x64xf32> to vector<17xf32>
    %164 = vector.shape_cast %163 : vector<17xf32> to vector<17x1xf32>
    %cst_57 = arith.constant 6.400000e+01 : f32
    %165 = vector.broadcast %cst_57 : f32 to vector<17x1xf32>
    %166 = arith.divf %164, %165 : vector<17x1xf32>
    %167 = vector.broadcast %159 : vector<17x1xf32> to vector<17x64xf32>
    %168 = arith.subf %153, %167 : vector<17x64xf32>
    %cst_58 = arith.constant 9.99999974E-6 : f32
    %169 = vector.broadcast %cst_58 : f32 to vector<17x1xf32>
    %170 = arith.addf %166, %169 : vector<17x1xf32>
    %171 = math.rsqrt %170 : vector<17x1xf32>
    %172 = vector.broadcast %171 : vector<17x1xf32> to vector<17x64xf32>
    %173 = arith.mulf %168, %172 : vector<17x64xf32>
    %174 = vector.broadcast %154 : vector<1x64xf32> to vector<17x64xf32>
    %175 = arith.mulf %173, %174 : vector<17x64xf32>
    %176 = vector.broadcast %155 : vector<1x64xf32> to vector<17x64xf32>
    %177 = arith.addf %175, %176 : vector<17x64xf32>
    %178 = arith.truncf %177 : vector<17x64xf32> to vector<17x64xbf16>
    %c0_59 = arith.constant 0 : index
    %c0_60 = arith.constant 0 : index
    %c0_61 = arith.constant 0 : index
    %179 = vector.load %arg7[%c0_59, %c0_60, %c0_61] : memref<2x64x128xbf16, #tpu.memory_space<vmem>>, vector<1x64x128xbf16>
    %180 = vector.shape_cast %179 : vector<1x64x128xbf16> to vector<64x128xbf16>
    %cst_62 = arith.constant dense<0.000000e+00> : vector<17x128xf32>
    %181 = tpu.matmul %178, %180, %cst_62 {dimension_numbers = #tpu.dot_dimension_numbers<[1], [0], [0], [1], [0, 0, 1, 1], [], []>} : vector<17x64xbf16>, vector<64x128xbf16>, vector<17x128xf32> -> vector<17x128xf32>
    %c0_63 = arith.constant 0 : index
    %c256 = arith.constant 256 : index
    %182 = vector.load %arg9[%c0_63, %c256] : memref<2x448xf32, #tpu.memory_space<vmem>>, vector<1x128xf32>
    %183 = vector.broadcast %182 : vector<1x128xf32> to vector<17x128xf32>
    %184 = arith.addf %181, %183 : vector<17x128xf32>
    %cst_64 = arith.constant 1.702000e+00 : f32
    %185 = vector.broadcast %cst_64 : f32 to vector<17x128xf32>
    %186 = arith.mulf %185, %184 : vector<17x128xf32>
    %187 = arith.negf %186 : vector<17x128xf32>
    %188 = math.exp %187 : vector<17x128xf32>
    %cst_65 = arith.constant 1.000000e+00 : f32
    %189 = vector.broadcast %cst_65 : f32 to vector<17x128xf32>
    %190 = arith.addf %189, %188 : vector<17x128xf32>
    %191 = arith.divf %189, %190 : vector<17x128xf32>
    %192 = arith.mulf %184, %191 : vector<17x128xf32>
    %193 = arith.truncf %192 : vector<17x128xf32> to vector<17x128xbf16>
    %c0_66 = arith.constant 0 : index
    %c0_67 = arith.constant 0 : index
    %c0_68 = arith.constant 0 : index
    %194 = vector.load %arg8[%c0_66, %c0_67, %c0_68] : memref<2x128x64xbf16, #tpu.memory_space<vmem>>, vector<1x128x64xbf16>
    %195 = vector.shape_cast %194 : vector<1x128x64xbf16> to vector<128x64xbf16>
    %cst_69 = arith.constant dense<0.000000e+00> : vector<17x64xf32>
    %196 = tpu.matmul %193, %195, %cst_69 {dimension_numbers = #tpu.dot_dimension_numbers<[1], [0], [0], [1], [0, 0, 1, 1], [], []>} : vector<17x128xbf16>, vector<128x64xbf16>, vector<17x64xf32> -> vector<17x64xf32>
    %c0_70 = arith.constant 0 : index
    %c384 = arith.constant 384 : index
    %197 = vector.load %arg9[%c0_70, %c384] : memref<2x448xf32, #tpu.memory_space<vmem>>, vector<1x64xf32>
    %198 = vector.broadcast %197 : vector<1x64xf32> to vector<17x64xf32>
    %199 = arith.addf %196, %198 : vector<17x64xf32>
    %200 = arith.addf %153, %199 : vector<17x64xf32>
    %c8 = arith.constant 8 : index
    %c0_71 = arith.constant 0 : index
    %201 = vector.load %arg4[%c8, %c0_71] : memref<12x64xf32, #tpu.memory_space<vmem>>, vector<1x64xf32>
    %c9 = arith.constant 9 : index
    %c0_72 = arith.constant 0 : index
    %202 = vector.load %arg4[%c9, %c0_72] : memref<12x64xf32, #tpu.memory_space<vmem>>, vector<1x64xf32>
    %cst_73 = arith.constant dense<0.000000e+00> : vector<17xf32>
    %203 = vector.multi_reduction <add>, %200, %cst_73 [1] : vector<17x64xf32> to vector<17xf32>
    %204 = vector.shape_cast %203 : vector<17xf32> to vector<17x1xf32>
    %cst_74 = arith.constant 6.400000e+01 : f32
    %205 = vector.broadcast %cst_74 : f32 to vector<17x1xf32>
    %206 = arith.divf %204, %205 : vector<17x1xf32>
    %207 = vector.broadcast %206 : vector<17x1xf32> to vector<17x64xf32>
    %208 = arith.subf %200, %207 : vector<17x64xf32>
    %209 = arith.mulf %208, %208 : vector<17x64xf32>
    %cst_75 = arith.constant dense<0.000000e+00> : vector<17xf32>
    %210 = vector.multi_reduction <add>, %209, %cst_75 [1] : vector<17x64xf32> to vector<17xf32>
    %211 = vector.shape_cast %210 : vector<17xf32> to vector<17x1xf32>
    %cst_76 = arith.constant 6.400000e+01 : f32
    %212 = vector.broadcast %cst_76 : f32 to vector<17x1xf32>
    %213 = arith.divf %211, %212 : vector<17x1xf32>
    %214 = vector.broadcast %206 : vector<17x1xf32> to vector<17x64xf32>
    %215 = arith.subf %200, %214 : vector<17x64xf32>
    %cst_77 = arith.constant 9.99999974E-6 : f32
    %216 = vector.broadcast %cst_77 : f32 to vector<17x1xf32>
    %217 = arith.addf %213, %216 : vector<17x1xf32>
    %218 = math.rsqrt %217 : vector<17x1xf32>
    %219 = vector.broadcast %218 : vector<17x1xf32> to vector<17x64xf32>
    %220 = arith.mulf %215, %219 : vector<17x64xf32>
    %221 = vector.broadcast %201 : vector<1x64xf32> to vector<17x64xf32>
    %222 = arith.mulf %220, %221 : vector<17x64xf32>
    %223 = vector.broadcast %202 : vector<1x64xf32> to vector<17x64xf32>
    %224 = arith.addf %222, %223 : vector<17x64xf32>
    %225 = arith.truncf %224 : vector<17x64xf32> to vector<17x64xbf16>
    %c1_78 = arith.constant 1 : index
    %c0_79 = arith.constant 0 : index
    %c0_80 = arith.constant 0 : index
    %226 = vector.load %arg5[%c1_78, %c0_79, %c0_80] : memref<2x64x192xbf16, #tpu.memory_space<vmem>>, vector<1x64x192xbf16>
    %227 = vector.shape_cast %226 : vector<1x64x192xbf16> to vector<64x192xbf16>
    %cst_81 = arith.constant dense<0.000000e+00> : vector<17x192xf32>
    %228 = tpu.matmul %225, %227, %cst_81 {dimension_numbers = #tpu.dot_dimension_numbers<[1], [0], [0], [1], [0, 0, 1, 1], [], []>} : vector<17x64xbf16>, vector<64x192xbf16>, vector<17x192xf32> -> vector<17x192xf32>
    %c1_82 = arith.constant 1 : index
    %c0_83 = arith.constant 0 : index
    %229 = vector.load %arg9[%c1_82, %c0_83] : memref<2x448xf32, #tpu.memory_space<vmem>>, vector<1x192xf32>
    %230 = vector.broadcast %229 : vector<1x192xf32> to vector<17x192xf32>
    %231 = arith.addf %228, %230 : vector<17x192xf32>
    %232 = vector.extract_strided_slice %231 {offsets = [0, 0], sizes = [17, 64], strides = [1, 1]} : vector<17x192xf32> to vector<17x64xf32>
    %cst_84 = arith.constant 2.500000e-01 : f32
    %233 = vector.broadcast %cst_84 : f32 to vector<17x64xf32>
    %234 = arith.mulf %232, %233 : vector<17x64xf32>
    %235 = arith.truncf %234 : vector<17x64xf32> to vector<17x64xbf16>
    %236 = vector.extract_strided_slice %231 {offsets = [0, 64], sizes = [17, 64], strides = [1, 1]} : vector<17x192xf32> to vector<17x64xf32>
    %237 = arith.truncf %236 : vector<17x64xf32> to vector<17x64xbf16>
    %238 = vector.extract_strided_slice %231 {offsets = [0, 128], sizes = [17, 64], strides = [1, 1]} : vector<17x192xf32> to vector<17x64xf32>
    %239 = arith.truncf %238 : vector<17x64xf32> to vector<17x64xbf16>
    %c1_85 = arith.constant 1 : index
    %c0_86 = arith.constant 0 : index
    %c0_87 = arith.constant 0 : index
    %240 = vector.load %arg6[%c1_85, %c0_86, %c0_87] : memref<2x64x64xbf16, #tpu.memory_space<vmem>>, vector<1x64x64xbf16>
    %241 = vector.shape_cast %240 : vector<1x64x64xbf16> to vector<64x64xbf16>
    %242 = vector.extract_strided_slice %235 {offsets = [0, 0], sizes = [17, 16], strides = [1, 1]} : vector<17x64xbf16> to vector<17x16xbf16>
    %243 = vector.extract_strided_slice %237 {offsets = [0, 0], sizes = [17, 16], strides = [1, 1]} : vector<17x64xbf16> to vector<17x16xbf16>
    %244 = vector.extract_strided_slice %239 {offsets = [0, 0], sizes = [17, 16], strides = [1, 1]} : vector<17x64xbf16> to vector<17x16xbf16>
    %cst_88 = arith.constant dense<0.000000e+00> : vector<17x17xf32>
    %245 = tpu.matmul %242, %243, %cst_88 {dimension_numbers = #tpu.dot_dimension_numbers<[1], [1], [0], [0], [0, 0, 1, 0], [], []>} : vector<17x16xbf16>, vector<17x16xbf16>, vector<17x17xf32> -> vector<17x17xf32>
    %cst_89 = arith.constant dense<0xFF800000> : vector<17xf32>
    %246 = vector.multi_reduction <maximumf>, %245, %cst_89 [1] : vector<17x17xf32> to vector<17xf32>
    %247 = vector.shape_cast %246 : vector<17xf32> to vector<17x1xf32>
    %248 = vector.broadcast %247 : vector<17x1xf32> to vector<17x17xf32>
    %249 = arith.subf %245, %248 : vector<17x17xf32>
    %250 = math.exp %249 : vector<17x17xf32>
    %cst_90 = arith.constant dense<0.000000e+00> : vector<17xf32>
    %251 = vector.multi_reduction <add>, %250, %cst_90 [1] : vector<17x17xf32> to vector<17xf32>
    %252 = vector.shape_cast %251 : vector<17xf32> to vector<17x1xf32>
    %253 = tpu.reciprocal %252 {approx = true} : vector<17x1xf32> -> vector<17x1xf32>
    %254 = vector.broadcast %253 : vector<17x1xf32> to vector<17x17xf32>
    %255 = arith.mulf %250, %254 : vector<17x17xf32>
    %256 = arith.truncf %255 : vector<17x17xf32> to vector<17x17xbf16>
    %cst_91 = arith.constant dense<0.000000e+00> : vector<17x16xf32>
    %257 = tpu.matmul %256, %244, %cst_91 {dimension_numbers = #tpu.dot_dimension_numbers<[1], [0], [0], [1], [0, 0, 1, 1], [], []>} : vector<17x17xbf16>, vector<17x16xbf16>, vector<17x16xf32> -> vector<17x16xf32>
    %258 = arith.truncf %257 : vector<17x16xf32> to vector<17x16xbf16>
    %259 = vector.extract_strided_slice %241 {offsets = [0, 0], sizes = [16, 64], strides = [1, 1]} : vector<64x64xbf16> to vector<16x64xbf16>
    %cst_92 = arith.constant dense<0.000000e+00> : vector<17x64xf32>
    %260 = tpu.matmul %258, %259, %cst_92 {dimension_numbers = #tpu.dot_dimension_numbers<[1], [0], [0], [1], [0, 0, 1, 1], [], []>} : vector<17x16xbf16>, vector<16x64xbf16>, vector<17x64xf32> -> vector<17x64xf32>
    %261 = vector.extract_strided_slice %235 {offsets = [0, 16], sizes = [17, 16], strides = [1, 1]} : vector<17x64xbf16> to vector<17x16xbf16>
    %262 = vector.extract_strided_slice %237 {offsets = [0, 16], sizes = [17, 16], strides = [1, 1]} : vector<17x64xbf16> to vector<17x16xbf16>
    %263 = vector.extract_strided_slice %239 {offsets = [0, 16], sizes = [17, 16], strides = [1, 1]} : vector<17x64xbf16> to vector<17x16xbf16>
    %cst_93 = arith.constant dense<0.000000e+00> : vector<17x17xf32>
    %264 = tpu.matmul %261, %262, %cst_93 {dimension_numbers = #tpu.dot_dimension_numbers<[1], [1], [0], [0], [0, 0, 1, 0], [], []>} : vector<17x16xbf16>, vector<17x16xbf16>, vector<17x17xf32> -> vector<17x17xf32>
    %cst_94 = arith.constant dense<0xFF800000> : vector<17xf32>
    %265 = vector.multi_reduction <maximumf>, %264, %cst_94 [1] : vector<17x17xf32> to vector<17xf32>
    %266 = vector.shape_cast %265 : vector<17xf32> to vector<17x1xf32>
    %267 = vector.broadcast %266 : vector<17x1xf32> to vector<17x17xf32>
    %268 = arith.subf %264, %267 : vector<17x17xf32>
    %269 = math.exp %268 : vector<17x17xf32>
    %cst_95 = arith.constant dense<0.000000e+00> : vector<17xf32>
    %270 = vector.multi_reduction <add>, %269, %cst_95 [1] : vector<17x17xf32> to vector<17xf32>
    %271 = vector.shape_cast %270 : vector<17xf32> to vector<17x1xf32>
    %272 = tpu.reciprocal %271 {approx = true} : vector<17x1xf32> -> vector<17x1xf32>
    %273 = vector.broadcast %272 : vector<17x1xf32> to vector<17x17xf32>
    %274 = arith.mulf %269, %273 : vector<17x17xf32>
    %275 = arith.truncf %274 : vector<17x17xf32> to vector<17x17xbf16>
    %cst_96 = arith.constant dense<0.000000e+00> : vector<17x16xf32>
    %276 = tpu.matmul %275, %263, %cst_96 {dimension_numbers = #tpu.dot_dimension_numbers<[1], [0], [0], [1], [0, 0, 1, 1], [], []>} : vector<17x17xbf16>, vector<17x16xbf16>, vector<17x16xf32> -> vector<17x16xf32>
    %277 = arith.truncf %276 : vector<17x16xf32> to vector<17x16xbf16>
    %278 = vector.extract_strided_slice %241 {offsets = [16, 0], sizes = [16, 64], strides = [1, 1]} : vector<64x64xbf16> to vector<16x64xbf16>
    %cst_97 = arith.constant dense<0.000000e+00> : vector<17x64xf32>
    %279 = tpu.matmul %277, %278, %cst_97 {dimension_numbers = #tpu.dot_dimension_numbers<[1], [0], [0], [1], [0, 0, 1, 1], [], []>} : vector<17x16xbf16>, vector<16x64xbf16>, vector<17x64xf32> -> vector<17x64xf32>
    %280 = arith.addf %260, %279 : vector<17x64xf32>
    %281 = vector.extract_strided_slice %235 {offsets = [0, 32], sizes = [17, 16], strides = [1, 1]} : vector<17x64xbf16> to vector<17x16xbf16>
    %282 = vector.extract_strided_slice %237 {offsets = [0, 32], sizes = [17, 16], strides = [1, 1]} : vector<17x64xbf16> to vector<17x16xbf16>
    %283 = vector.extract_strided_slice %239 {offsets = [0, 32], sizes = [17, 16], strides = [1, 1]} : vector<17x64xbf16> to vector<17x16xbf16>
    %cst_98 = arith.constant dense<0.000000e+00> : vector<17x17xf32>
    %284 = tpu.matmul %281, %282, %cst_98 {dimension_numbers = #tpu.dot_dimension_numbers<[1], [1], [0], [0], [0, 0, 1, 0], [], []>} : vector<17x16xbf16>, vector<17x16xbf16>, vector<17x17xf32> -> vector<17x17xf32>
    %cst_99 = arith.constant dense<0xFF800000> : vector<17xf32>
    %285 = vector.multi_reduction <maximumf>, %284, %cst_99 [1] : vector<17x17xf32> to vector<17xf32>
    %286 = vector.shape_cast %285 : vector<17xf32> to vector<17x1xf32>
    %287 = vector.broadcast %286 : vector<17x1xf32> to vector<17x17xf32>
    %288 = arith.subf %284, %287 : vector<17x17xf32>
    %289 = math.exp %288 : vector<17x17xf32>
    %cst_100 = arith.constant dense<0.000000e+00> : vector<17xf32>
    %290 = vector.multi_reduction <add>, %289, %cst_100 [1] : vector<17x17xf32> to vector<17xf32>
    %291 = vector.shape_cast %290 : vector<17xf32> to vector<17x1xf32>
    %292 = tpu.reciprocal %291 {approx = true} : vector<17x1xf32> -> vector<17x1xf32>
    %293 = vector.broadcast %292 : vector<17x1xf32> to vector<17x17xf32>
    %294 = arith.mulf %289, %293 : vector<17x17xf32>
    %295 = arith.truncf %294 : vector<17x17xf32> to vector<17x17xbf16>
    %cst_101 = arith.constant dense<0.000000e+00> : vector<17x16xf32>
    %296 = tpu.matmul %295, %283, %cst_101 {dimension_numbers = #tpu.dot_dimension_numbers<[1], [0], [0], [1], [0, 0, 1, 1], [], []>} : vector<17x17xbf16>, vector<17x16xbf16>, vector<17x16xf32> -> vector<17x16xf32>
    %297 = arith.truncf %296 : vector<17x16xf32> to vector<17x16xbf16>
    %298 = vector.extract_strided_slice %241 {offsets = [32, 0], sizes = [16, 64], strides = [1, 1]} : vector<64x64xbf16> to vector<16x64xbf16>
    %cst_102 = arith.constant dense<0.000000e+00> : vector<17x64xf32>
    %299 = tpu.matmul %297, %298, %cst_102 {dimension_numbers = #tpu.dot_dimension_numbers<[1], [0], [0], [1], [0, 0, 1, 1], [], []>} : vector<17x16xbf16>, vector<16x64xbf16>, vector<17x64xf32> -> vector<17x64xf32>
    %300 = arith.addf %280, %299 : vector<17x64xf32>
    %301 = vector.extract_strided_slice %235 {offsets = [0, 48], sizes = [17, 16], strides = [1, 1]} : vector<17x64xbf16> to vector<17x16xbf16>
    %302 = vector.extract_strided_slice %237 {offsets = [0, 48], sizes = [17, 16], strides = [1, 1]} : vector<17x64xbf16> to vector<17x16xbf16>
    %303 = vector.extract_strided_slice %239 {offsets = [0, 48], sizes = [17, 16], strides = [1, 1]} : vector<17x64xbf16> to vector<17x16xbf16>
    %cst_103 = arith.constant dense<0.000000e+00> : vector<17x17xf32>
    %304 = tpu.matmul %301, %302, %cst_103 {dimension_numbers = #tpu.dot_dimension_numbers<[1], [1], [0], [0], [0, 0, 1, 0], [], []>} : vector<17x16xbf16>, vector<17x16xbf16>, vector<17x17xf32> -> vector<17x17xf32>
    %cst_104 = arith.constant dense<0xFF800000> : vector<17xf32>
    %305 = vector.multi_reduction <maximumf>, %304, %cst_104 [1] : vector<17x17xf32> to vector<17xf32>
    %306 = vector.shape_cast %305 : vector<17xf32> to vector<17x1xf32>
    %307 = vector.broadcast %306 : vector<17x1xf32> to vector<17x17xf32>
    %308 = arith.subf %304, %307 : vector<17x17xf32>
    %309 = math.exp %308 : vector<17x17xf32>
    %cst_105 = arith.constant dense<0.000000e+00> : vector<17xf32>
    %310 = vector.multi_reduction <add>, %309, %cst_105 [1] : vector<17x17xf32> to vector<17xf32>
    %311 = vector.shape_cast %310 : vector<17xf32> to vector<17x1xf32>
    %312 = tpu.reciprocal %311 {approx = true} : vector<17x1xf32> -> vector<17x1xf32>
    %313 = vector.broadcast %312 : vector<17x1xf32> to vector<17x17xf32>
    %314 = arith.mulf %309, %313 : vector<17x17xf32>
    %315 = arith.truncf %314 : vector<17x17xf32> to vector<17x17xbf16>
    %cst_106 = arith.constant dense<0.000000e+00> : vector<17x16xf32>
    %316 = tpu.matmul %315, %303, %cst_106 {dimension_numbers = #tpu.dot_dimension_numbers<[1], [0], [0], [1], [0, 0, 1, 1], [], []>} : vector<17x17xbf16>, vector<17x16xbf16>, vector<17x16xf32> -> vector<17x16xf32>
    %317 = arith.truncf %316 : vector<17x16xf32> to vector<17x16xbf16>
    %318 = vector.extract_strided_slice %241 {offsets = [48, 0], sizes = [16, 64], strides = [1, 1]} : vector<64x64xbf16> to vector<16x64xbf16>
    %cst_107 = arith.constant dense<0.000000e+00> : vector<17x64xf32>
    %319 = tpu.matmul %317, %318, %cst_107 {dimension_numbers = #tpu.dot_dimension_numbers<[1], [0], [0], [1], [0, 0, 1, 1], [], []>} : vector<17x16xbf16>, vector<16x64xbf16>, vector<17x64xf32> -> vector<17x64xf32>
    %320 = arith.addf %300, %319 : vector<17x64xf32>
    %321 = arith.addf %200, %320 : vector<17x64xf32>
    %c1_108 = arith.constant 1 : index
    %c192_109 = arith.constant 192 : index
    %322 = vector.load %arg9[%c1_108, %c192_109] : memref<2x448xf32, #tpu.memory_space<vmem>>, vector<1x64xf32>
    %323 = vector.broadcast %322 : vector<1x64xf32> to vector<17x64xf32>
    %324 = arith.addf %321, %323 : vector<17x64xf32>
    %c10 = arith.constant 10 : index
    %c0_110 = arith.constant 0 : index
    %325 = vector.load %arg4[%c10, %c0_110] : memref<12x64xf32, #tpu.memory_space<vmem>>, vector<1x64xf32>
    %c11 = arith.constant 11 : index
    %c0_111 = arith.constant 0 : index
    %326 = vector.load %arg4[%c11, %c0_111] : memref<12x64xf32, #tpu.memory_space<vmem>>, vector<1x64xf32>
    %cst_112 = arith.constant dense<0.000000e+00> : vector<17xf32>
    %327 = vector.multi_reduction <add>, %324, %cst_112 [1] : vector<17x64xf32> to vector<17xf32>
    %328 = vector.shape_cast %327 : vector<17xf32> to vector<17x1xf32>
    %cst_113 = arith.constant 6.400000e+01 : f32
    %329 = vector.broadcast %cst_113 : f32 to vector<17x1xf32>
    %330 = arith.divf %328, %329 : vector<17x1xf32>
    %331 = vector.broadcast %330 : vector<17x1xf32> to vector<17x64xf32>
    %332 = arith.subf %324, %331 : vector<17x64xf32>
    %333 = arith.mulf %332, %332 : vector<17x64xf32>
    %cst_114 = arith.constant dense<0.000000e+00> : vector<17xf32>
    %334 = vector.multi_reduction <add>, %333, %cst_114 [1] : vector<17x64xf32> to vector<17xf32>
    %335 = vector.shape_cast %334 : vector<17xf32> to vector<17x1xf32>
    %cst_115 = arith.constant 6.400000e+01 : f32
    %336 = vector.broadcast %cst_115 : f32 to vector<17x1xf32>
    %337 = arith.divf %335, %336 : vector<17x1xf32>
    %338 = vector.broadcast %330 : vector<17x1xf32> to vector<17x64xf32>
    %339 = arith.subf %324, %338 : vector<17x64xf32>
    %cst_116 = arith.constant 9.99999974E-6 : f32
    %340 = vector.broadcast %cst_116 : f32 to vector<17x1xf32>
    %341 = arith.addf %337, %340 : vector<17x1xf32>
    %342 = math.rsqrt %341 : vector<17x1xf32>
    %343 = vector.broadcast %342 : vector<17x1xf32> to vector<17x64xf32>
    %344 = arith.mulf %339, %343 : vector<17x64xf32>
    %345 = vector.broadcast %325 : vector<1x64xf32> to vector<17x64xf32>
    %346 = arith.mulf %344, %345 : vector<17x64xf32>
    %347 = vector.broadcast %326 : vector<1x64xf32> to vector<17x64xf32>
    %348 = arith.addf %346, %347 : vector<17x64xf32>
    %349 = arith.truncf %348 : vector<17x64xf32> to vector<17x64xbf16>
    %c1_117 = arith.constant 1 : index
    %c0_118 = arith.constant 0 : index
    %c0_119 = arith.constant 0 : index
    %350 = vector.load %arg7[%c1_117, %c0_118, %c0_119] : memref<2x64x128xbf16, #tpu.memory_space<vmem>>, vector<1x64x128xbf16>
    %351 = vector.shape_cast %350 : vector<1x64x128xbf16> to vector<64x128xbf16>
    %cst_120 = arith.constant dense<0.000000e+00> : vector<17x128xf32>
    %352 = tpu.matmul %349, %351, %cst_120 {dimension_numbers = #tpu.dot_dimension_numbers<[1], [0], [0], [1], [0, 0, 1, 1], [], []>} : vector<17x64xbf16>, vector<64x128xbf16>, vector<17x128xf32> -> vector<17x128xf32>
    %c1_121 = arith.constant 1 : index
    %c256_122 = arith.constant 256 : index
    %353 = vector.load %arg9[%c1_121, %c256_122] : memref<2x448xf32, #tpu.memory_space<vmem>>, vector<1x128xf32>
    %354 = vector.broadcast %353 : vector<1x128xf32> to vector<17x128xf32>
    %355 = arith.addf %352, %354 : vector<17x128xf32>
    %cst_123 = arith.constant 1.702000e+00 : f32
    %356 = vector.broadcast %cst_123 : f32 to vector<17x128xf32>
    %357 = arith.mulf %356, %355 : vector<17x128xf32>
    %358 = arith.negf %357 : vector<17x128xf32>
    %359 = math.exp %358 : vector<17x128xf32>
    %cst_124 = arith.constant 1.000000e+00 : f32
    %360 = vector.broadcast %cst_124 : f32 to vector<17x128xf32>
    %361 = arith.addf %360, %359 : vector<17x128xf32>
    %362 = arith.divf %360, %361 : vector<17x128xf32>
    %363 = arith.mulf %355, %362 : vector<17x128xf32>
    %364 = arith.truncf %363 : vector<17x128xf32> to vector<17x128xbf16>
    %c1_125 = arith.constant 1 : index
    %c0_126 = arith.constant 0 : index
    %c0_127 = arith.constant 0 : index
    %365 = vector.load %arg8[%c1_125, %c0_126, %c0_127] : memref<2x128x64xbf16, #tpu.memory_space<vmem>>, vector<1x128x64xbf16>
    %366 = vector.shape_cast %365 : vector<1x128x64xbf16> to vector<128x64xbf16>
    %cst_128 = arith.constant dense<0.000000e+00> : vector<17x64xf32>
    %367 = tpu.matmul %364, %366, %cst_128 {dimension_numbers = #tpu.dot_dimension_numbers<[1], [0], [0], [1], [0, 0, 1, 1], [], []>} : vector<17x128xbf16>, vector<128x64xbf16>, vector<17x64xf32> -> vector<17x64xf32>
    %c1_129 = arith.constant 1 : index
    %c384_130 = arith.constant 384 : index
    %368 = vector.load %arg9[%c1_129, %c384_130] : memref<2x448xf32, #tpu.memory_space<vmem>>, vector<1x64xf32>
    %369 = vector.broadcast %368 : vector<1x64xf32> to vector<17x64xf32>
    %370 = arith.addf %367, %369 : vector<17x64xf32>
    %371 = arith.addf %324, %370 : vector<17x64xf32>
    %372 = vector.extract_strided_slice %371 {offsets = [0, 0], sizes = [1, 64], strides = [1, 1]} : vector<17x64xf32> to vector<1x64xf32>
    %c2 = arith.constant 2 : index
    %c0_131 = arith.constant 0 : index
    %373 = vector.load %arg4[%c2, %c0_131] : memref<12x64xf32, #tpu.memory_space<vmem>>, vector<1x64xf32>
    %c3 = arith.constant 3 : index
    %c0_132 = arith.constant 0 : index
    %374 = vector.load %arg4[%c3, %c0_132] : memref<12x64xf32, #tpu.memory_space<vmem>>, vector<1x64xf32>
    %cst_133 = arith.constant dense<0.000000e+00> : vector<1xf32>
    %375 = vector.multi_reduction <add>, %372, %cst_133 [1] : vector<1x64xf32> to vector<1xf32>
    %376 = vector.shape_cast %375 : vector<1xf32> to vector<1x1xf32>
    %cst_134 = arith.constant 6.400000e+01 : f32
    %377 = vector.broadcast %cst_134 : f32 to vector<1x1xf32>
    %378 = arith.divf %376, %377 : vector<1x1xf32>
    %379 = vector.broadcast %378 : vector<1x1xf32> to vector<1x64xf32>
    %380 = arith.subf %372, %379 : vector<1x64xf32>
    %381 = arith.mulf %380, %380 : vector<1x64xf32>
    %cst_135 = arith.constant dense<0.000000e+00> : vector<1xf32>
    %382 = vector.multi_reduction <add>, %381, %cst_135 [1] : vector<1x64xf32> to vector<1xf32>
    %383 = vector.shape_cast %382 : vector<1xf32> to vector<1x1xf32>
    %cst_136 = arith.constant 6.400000e+01 : f32
    %384 = vector.broadcast %cst_136 : f32 to vector<1x1xf32>
    %385 = arith.divf %383, %384 : vector<1x1xf32>
    %386 = vector.broadcast %378 : vector<1x1xf32> to vector<1x64xf32>
    %387 = arith.subf %372, %386 : vector<1x64xf32>
    %cst_137 = arith.constant 9.99999974E-6 : f32
    %388 = vector.broadcast %cst_137 : f32 to vector<1x1xf32>
    %389 = arith.addf %385, %388 : vector<1x1xf32>
    %390 = math.rsqrt %389 : vector<1x1xf32>
    %391 = vector.broadcast %390 : vector<1x1xf32> to vector<1x64xf32>
    %392 = arith.mulf %387, %391 : vector<1x64xf32>
    %393 = arith.mulf %392, %373 : vector<1x64xf32>
    %394 = arith.addf %393, %374 : vector<1x64xf32>
    %395 = arith.truncf %394 : vector<1x64xf32> to vector<1x64xbf16>
    %c0_138 = arith.constant 0 : index
    %c0_139 = arith.constant 0 : index
    %396 = vector.load %arg10[%c0_138, %c0_139] : memref<64x128xbf16, #tpu.memory_space<vmem>>, vector<64x128xbf16>
    %cst_140 = arith.constant dense<0.000000e+00> : vector<1x128xf32>
    %397 = tpu.matmul %395, %396, %cst_140 {dimension_numbers = #tpu.dot_dimension_numbers<[1], [0], [0], [1], [0, 0, 1, 1], [], []>} : vector<1x64xbf16>, vector<64x128xbf16>, vector<1x128xf32> -> vector<1x128xf32>
    %c0_141 = arith.constant 0 : index
    %c0_142 = arith.constant 0 : index
    %c0_143 = arith.constant 0 : index
    %398 = vector.load %arg11[%c0_141, %c0_142, %c0_143] : memref<1x1x128xf32, #tpu.memory_space<vmem>>, vector<1x1x128xf32>
    %399 = vector.shape_cast %398 : vector<1x1x128xf32> to vector<1x128xf32>
    %400 = vector.shape_cast %397 : vector<1x128xf32> to vector<1x1x128xf32>
    tpu.vector_store %arg11[%c0_141, %c0_142, %c0_143], %400 {strides = array<i32>} : memref<1x1x128xf32, #tpu.memory_space<vmem>>, vector<1x1x128xf32>,
    return
  }
  func.func @transform_0(%arg0: i32) -> (i32, i32, i32) {
    %c0_i32 = arith.constant 0 : i32
    %c0_i32_0 = arith.constant 0 : i32
    %c0_i32_1 = arith.constant 0 : i32
    return %arg0, %c0_i32, %c0_i32_0 : i32, i32, i32
  }
  func.func @transform_1(%arg0: i32) -> (i32, i32) {
    %c0_i32 = arith.constant 0 : i32
    %c0_i32_0 = arith.constant 0 : i32
    %c0_i32_1 = arith.constant 0 : i32
    return %c0_i32, %c0_i32_0 : i32, i32
  }
  func.func @transform_2(%arg0: i32) -> (i32, i32) {
    %c0_i32 = arith.constant 0 : i32
    %c0_i32_0 = arith.constant 0 : i32
    %c0_i32_1 = arith.constant 0 : i32
    return %c0_i32, %c0_i32_0 : i32, i32
  }
  func.func @transform_3(%arg0: i32) -> (i32, i32) {
    %c0_i32 = arith.constant 0 : i32
    %c0_i32_0 = arith.constant 0 : i32
    %c0_i32_1 = arith.constant 0 : i32
    return %c0_i32, %c0_i32_0 : i32, i32
  }
  func.func @transform_4(%arg0: i32) -> (i32, i32, i32) {
    %c0_i32 = arith.constant 0 : i32
    %c0_i32_0 = arith.constant 0 : i32
    %c0_i32_1 = arith.constant 0 : i32
    %c0_i32_2 = arith.constant 0 : i32
    return %c0_i32, %c0_i32_0, %c0_i32_1 : i32, i32, i32
  }
  func.func @transform_5(%arg0: i32) -> (i32, i32, i32) {
    %c0_i32 = arith.constant 0 : i32
    %c0_i32_0 = arith.constant 0 : i32
    %c0_i32_1 = arith.constant 0 : i32
    %c0_i32_2 = arith.constant 0 : i32
    return %c0_i32, %c0_i32_0, %c0_i32_1 : i32, i32, i32
  }
  func.func @transform_6(%arg0: i32) -> (i32, i32, i32) {
    %c0_i32 = arith.constant 0 : i32
    %c0_i32_0 = arith.constant 0 : i32
    %c0_i32_1 = arith.constant 0 : i32
    %c0_i32_2 = arith.constant 0 : i32
    return %c0_i32, %c0_i32_0, %c0_i32_1 : i32, i32, i32
  }
  func.func @transform_7(%arg0: i32) -> (i32, i32, i32) {
    %c0_i32 = arith.constant 0 : i32
    %c0_i32_0 = arith.constant 0 : i32
    %c0_i32_1 = arith.constant 0 : i32
    %c0_i32_2 = arith.constant 0 : i32
    return %c0_i32, %c0_i32_0, %c0_i32_1 : i32, i32, i32
  }
  func.func @transform_8(%arg0: i32) -> (i32, i32) {
    %c0_i32 = arith.constant 0 : i32
    %c0_i32_0 = arith.constant 0 : i32
    %c0_i32_1 = arith.constant 0 : i32
    return %c0_i32, %c0_i32_0 : i32, i32
  }
  func.func @transform_9(%arg0: i32) -> (i32, i32) {
    %c0_i32 = arith.constant 0 : i32
    %c0_i32_0 = arith.constant 0 : i32
    %c0_i32_1 = arith.constant 0 : i32
    return %c0_i32, %c0_i32_0 : i32, i32
  }
  func.func @transform_10(%arg0: i32) -> (i32, i32, i32) {
    %c0_i32 = arith.constant 0 : i32
    %c0_i32_0 = arith.constant 0 : i32
    %c0_i32_1 = arith.constant 0 : i32
    return %arg0, %c0_i32, %c0_i32_0 : i32, i32, i32
  }
}

</mosaic_0001>

<bundles_post_ra>
// kernel: tpu_custom_call.1
= control target key start
LH: loop header
LB: loop body
LE: loop exit
PB: predicated region body
PF: predicated region fallthrough
CT: control target
= control target key end

     0   :  { %15 = vsyncpa [#allocation3], 0  ;;  %s5443_s0 = inlined_call_operand.vmem [shape: bf16[2,17,192], index: 0, kind: input, shape index: {}]   ;;  %s5444_s1 = inlined_call_operand.vmem [shape: bf16[192,64], index: 1, kind: input, shape index: {}]   ;;  %s5445_s2 = inlined_call_operand.vmem [shape: f32[17,64], index: 2, kind: input, shape index: {}]   ;;  %s5446_s3 = inlined_call_operand.hbm [shape: f32[12,64], index: 3, kind: input, shape index: {}]   ;;  %s5447_s4 = inlined_call_operand.vmem [shape: bf16[2,64,192], index: 4, kind: input, shape index: {}]   ;;  %s5448_s5 = inlined_call_operand.vmem [shape: bf16[2,64,64], index: 5, kind: input, shape index: {}]   ;;  %s5449_s6 = inlined_call_operand.vmem [shape: bf16[2,64,128], index: 6, kind: input, shape index: {}]   ;;  %s5450_s7 = inlined_call_operand.vmem [shape: bf16[2,128,64], index: 7, kind: input, shape index: {}]   ;;  %s5451_s8 = inlined_call_operand.vmem [shape: f32[2,448], index: 8, kind: input, shape index: {}]   ;;  %s5452_s9 = inlined_call_operand.vmem [shape: bf16[64,128], index: 9, kind: input, shape index: {}]   ;;  %s5453_s10 = inlined_call_operand.hbm [shape: f32[2,1,128], index: 10, kind: output, shape index: {}]  }
   0x1   :  { %16 = vsyncpa [#allocation4], 0 }
   0x2   :  { %18 = vsyncpa [#allocation4 + $0x1], 0  ;;  %s4655_s13 = smov 0   ;;  %s4657_s14 = smov 0  }
   0x3   :  { %s4659_s15 = smov 0   ;;  %s4661_s16 = smov 0  }
   0x4 LB: > { %s4676_s17 = sadd.s32 4294967295, %s4584_s16   ;;  %s3605_s18 = sadd.s32 4294967294, %s4584_s16   ;;  %s4584_s16 = sphi %s4661_s16, %s5487_s16   ;;  %s4580_s15 = sphi %s4659_s15, %s5486_s15   ;;  %s4576_s14 = sphi %s4657_s14, %s5485_s14   ;;  %s4572_s13 = sphi %s4655_s13, %s5484_s13  }
   0x5   : > { %s4680_s19 = sadd.s32 1, %s4584_s16   ;;  %s246_s20 = sadd.s32 1, %s4580_s15 }
   0x6   : > { %s243_s21 = ssub.s32 %s4584_s16, %s4680_s19  ;;  %p256_p0 = scmp.ne.s32.totalorder %s4580_s15, %s4576_s14 }
   0x7   : > { %p244_p1 = scmp.eq.s32.totalorder %s243_s21, 0  ;;  %p257_p2 = scmp.eq.s32.totalorder %s4676_s17, 1 }
   0x8   : > { %p262_p3 = scmp.ne.s32.totalorder %s4576_s14, %s4572_s13  ;;  %p263_p4 = scmp.eq.s32.totalorder %s3605_s18, 1 }
   0x9   : > { %s4691_s22 = scalar_select %p244_p1, %s4580_s15, %s246_s20  }
   0xa   : > { %p4693_p5 = por %p257_p2, %p256_p0  ;;  %p4697_p6 = por %p263_p4, %p262_p3 }
   0xb   : > { %p3606_p7 = scmp.ge.s32.totalorder %s4584_s16, 1  ;;  %p270_p8 = scmp.lt.s32.totalorder %s4584_s16, 3 }
   0xc   : > { %s5469_s23 = scalar_select %p4693_p5, 1, 0 }
   0xd   : > { %s5470_s24 = scalar_select %p4697_p6, 1, 0 }
   0xe   : > { %p5454_p9 = scmp.eq.s32.totalorder %s4676_s17, 0  ;;  %p4704_p10 = pnand %p3606_p7, %p270_p8 }
   0xf   : > { %s4586_s26 = smov [#allocation2]   ;;  %s4490_s11 = scalar_lea.hbm %s5446_s3, 256 }
  0x10   : > { %s5471_s25 = scalar_select %p4704_p10, 1, 0 }
  0x11   : > { %s288_s27 = sshll.u32 %s4586_s26, 4  ;;  %p4205_p11 = pneg %p4704_p10  ;;  %s289_s27 = int_to_ptr.vmem [resolvable:$true] %s288_s27 }
  0x12   : > { %p4491_p13 = scmp.ne.s32.totalorder %s5446_s3, %s4490_s11  ;;  %p4497_p3 = scmp.lt.u32.totalorder %s4490_s11, %s5446_s3 }
  0x13   : > { %p4712_p12 = pnand %p5454_p9, %p4205_p11 }
  0x15   : > { %p4492_p0 = pneg %p4712_p12 }
  0x17   : > { %p4493_p1 = pnand %p4492_p0, %p4491_p13 }
  0x19   : > { %p4494_p2 = pneg %p4493_p1 }
  0x1b   : > { %p4499_p4 = pnand %p4497_p3, %p4494_p2 }
  0x1d   : > { %4502 = shalt.err (!%p4499_p4)
}
  0x1e   : > { %s4503_s26 = scalar_lea.vmem %s289_s27, 256  ;;  %p4511_p9 = scmp.lt.s32.totalorder %s289_s27, %s289_s27 }
  0x1f   : > { %p4504_p7 = scmp.ne.s32.totalorder %s289_s27, %s4503_s26  ;;  %p4512_p6 = scmp.lt.s32.totalorder %s4503_s26, %s4503_s26 }
  0x21   : > { %p4506_p8 = pnand %p4504_p7, %p4492_p0  ;;  %p4513_p5 = por %p4512_p6, %p4511_p9 }
  0x23   : > { %p4507_p11 = pneg %p4506_p8 }
  0x25   : > { %p4514_p10 = pnand %p4513_p5, %p4507_p11 }
  0x27   : > { %4517 = shalt.err (!%p4514_p10)
}
  0x28   : > { %s4587_s29 = smov 128   ;;  %s4588_s30 = smov 8  }
  0x29   : > { %4208 = dma.hbm_to_vmem [thread:$0]  (!%p4712_p12), %s5446_s3, 256, %s289_s27, [#allocation3], %s4587_s29, %s4587_s29, %s4588_s30  }
  0x2a   : > { %p5473_p13 = scmp.ne.s32.totalorder %s5471_s25, 0 }
  0x2b   : > { %p5474_p1 = scmp.eq.s32.totalorder (!%p5473_p13), %s4676_s17, 0 }
  0x2c   : > { %330 = sbr.rel (%p5473_p13) target bundleno = 9122 (0x23a2), region = 60 }
  0x33   : > { %4563 = dma.done.wait (%p5474_p1), [#allocation3], 256   ;;  %p5475_p0 = pmov %p5474_p1 }
  0x34   : > { %v4589_v0 = vmov 0   ;;  %p367_p5 = scmp.lt.s32.totalorder %s4676_s17, 1  ;;  %v4261_v1 = vld [vmem:[%s5444_s1] sm:$0xff]   ;;  %v4262_v2 = vld [vmem:[%s5444_s1 + $0x8] sm:$0xff]   ;;  %v4263_v3 = vld [vmem:[%s5444_s1 + $0x10] sm:$0xff]   ;;  %vm490_vm0 = vcmask 523264  }
  0x35   : > { %4565 = vsyncadd (%p5475_p0), [#allocation3], 4294967040  ;;  %497 = vmatprep.subr.bf16.mxu0 %v4589_v0  ;;  %757 = vmatprep.mubr.bf16.mxu1 %v4589_v0  ;;  %v4264_v4 = vld [vmem:[%s5444_s1 + $0x18] sm:$0xff]   ;;  %v4265_v5 = vld [vmem:[%s5444_s1 + $0x20] sm:$0xff]   ;;  %vm553_vm1 = vcmask 516096   ;;  %vm799_vm2 = vcmask 130048  }
  0x36   : > { %498 = vmatpush1.bf16.msra.mxu0 %v4261_v1  ;;  %s368_s20 = scalar_select %p367_p5, %s4676_s17, 1  ;;  %v4266_v7 = vld [vmem:[%s5444_s1 + $0x28] sm:$0xff]   ;;  %v4267_v8 = vld [vmem:[%s5444_s1 + $0x30] sm:$0xff]   ;;  %v4268_v9 = vld [vmem:[%s5444_s1 + $0x38] sm:$0xff]   ;;  %vm903_vm3 = vcmask 1040384   ;;  %vm860_vm4 = vcmask 138240  }
  0x37   : > { %499 = vmatprep.subr.bf16.mxu0 %v4589_v0  ;;  %v4269_v10 = vld [vmem:[%s5444_s1 + $0x40] sm:$0xff]   ;;  %v4270_v11 = vld [vmem:[%s5444_s1 + $0x48] sm:$0xff]   ;;  %v4271_v12 = vld [vmem:[%s5444_s1 + $0x50] sm:$0xff]   ;;  %s4590_s18 = smov 64   ;;  %vm867_vm5 = vcmask 131072   ;;  %s5467_s28 = smov 48  }
  0x38   : > { %s4198_s29 = smul.u32 24, %s368_s20  ;;  %v4272_v13 = vld [vmem:[%s5444_s1 + $0x58] sm:$0xff]   ;;  %v400_v18 = vld [vmem:[%s5445_s2] sm:$0xff]  ;;  %v401_v20 = vld [vmem:[%s5445_s2 + $0x8] sm:$0xff]  ;;  %s5463_s20 = smov 32   ;;  %vm4598_vm6 = vmmov 0  }
  0x39   : > { %v402_v27 = vld [vmem:[%s5445_s2 + $0x10] sm:$0x1]  ;;  %v3631_v62 = vld [vmem:[#allocation2 + $0x1] ss:$0 sm:$0xff]  ;;  %s5461_s21 = smov 96   ;;  %s5459_s26 = smov 16  }
  0x3a   : > { %500 = vmatpush1.bf16.msra.mxu0 %v4262_v2  ;;  %s371_s11 = scalar_lea.vmem %s5443_s0, %s4198_s29  ;;  %v3630_v60 = vld [vmem:[#allocation2] ss:$0 sm:$0xff]  ;;  %s5457_s29 = smov 80  }
  0x3b   : > { %501 = vmatprep.subr.bf16.mxu0 %v4589_v0  ;;  %v4275_v6 = vld [vmem:[%s371_s11 + $0x4] ss:$8 sps:$4 sm:$0xff]   ;;  %v375_v14 = vld [vmem:[%s371_s11 + $0x10] sm:$0x11]  ;;  %v4273_v15 = vld [vmem:[%s371_s11] ss:$8 sps:$4 sm:$0xff]  }
  0x3c   : > { %3628 = vmatprep.mubr.msk.bf16.mxu0 %vm490_vm0, %v4275_v6  ;;  %v3615_v16 = vcombine.high %v375_v14, %v375_v14  ;;  %v3614_v17 = vcombine.low %v375_v14, %v375_v14  ;;  %s5465_s11 = smov 112   ;;  %s5478_s25 = smov 32  }
  0x3d   : > { %s5479_s27 = smov 96   ;;  %p5482_p9 = scmp.ne.s32.totalorder %s5469_s23, 0 }
  0x3e   : > { %502 = vmatpush1.bf16.msra.mxu0 %v4263_v3 }
  0x3f   : > { %503 = vmatprep.subr.bf16.mxu0 %v4589_v0 }
  0x42   : > { %504 = vmatpush1.bf16.msra.mxu0 %v4264_v4 }
  0x43   : > { %505 = vmatprep.subr.bf16.mxu0 %v4589_v0 }
  0x46   : > { %506 = vmatpush1.bf16.msra.mxu0 %v4265_v5 }
  0x47   : > { %507 = vmatprep.subr.bf16.mxu0 %v4589_v0 }
  0x4a   : > { %508 = vmatpush1.bf16.msra.mxu0 %v4266_v7 }
  0x4b   : > { %509 = vmatprep.subr.bf16.mxu0 %v4589_v0 }
  0x4e   : > { %510 = vmatpush1.bf16.msra.mxu0 %v4267_v8 }
  0x4f   : > { %511 = vmatprep.subr.bf16.mxu0 %v4589_v0 }
  0x52   : > { %512 = vmatpush1.bf16.msra.mxu0 %v4268_v9 }
  0x53   : > { %513 = vmatprep.subr.bf16.mxu0 %v4589_v0 }
  0x56   : > { %514 = vmatpush1.bf16.msra.mxu0 %v4269_v10 }
  0x57   : > { %515 = vmatprep.subr.bf16.mxu0 %v4589_v0 }
  0x5a   : > { %516 = vmatpush1.bf16.msra.mxu0 %v4270_v11 }
  0x5b   : > { %517 = vmatprep.subr.bf16.mxu0 %v4589_v0 }
  0x5e   : > { %518 = vmatpush1.bf16.msra.mxu0 %v4271_v12 }
  0x5f   : > { %519 = vmatprep.subr.bf16.mxu0 %v4589_v0 }
  0x62   : > { %520 = vmatpush1.bf16.msra.mxu0 %v4272_v13 }
  0x65   : > { %530 = vmatmul.mubr.bf16.vlgmr.msra.gmra.mrb[0].mxu0 %v4273_v15 }
  0x66   : > { %3629 = vmatprep.mubr.msk.bf16.mxu0 %vm490_vm0, %v3615_v16 }
  0x6d   : > { %538 = vmatmul.mubr.bf16.gmra.mrb[4].mxu0 %v3614_v17 }
 0x138   : > { %v531_v19 = vpop.f32.mrb[0].mxu0 }
 0x139   : > { %v532_v21 = vadd.f32 %v531_v19, %v400_v18  ;;  %v533_v22 = vpop.f32.mrb[1].mxu0 }
 0x13a   : > { %v534_v23 = vpop.f32.mrb[2].mxu0 }
 0x13b   : > { %v535_v24 = vadd.f32 %v534_v23, %v401_v20  ;;  %v536_v25 = vpop.f32.mrb[3].mxu0  ;;  %v547_v26 = vsel %vm490_vm0, %v532_v21, 0.0 }
 0x13c   : > { %548 = vadd.xlane.f32.xlu0 %v547_v26 }
 0x13d   : > { %v550_v28 = vsel %vm490_vm0, %v535_v24, 0.0 }
 0x140   : > { %v539_v29 = vpop.f32.mrb[4].mxu0  ;;  %551 = vadd.xlane.f32.xlu0 %v550_v28  ;;  %v4278_v28 = vld [vmem:[%s5447_s4 + $0x4] ss:$8 sps:$4 sm:$0xff]  }
 0x141   : > { %v540_v30 = vadd.f32 %v539_v29, %v402_v27  ;;  %v541_v31 = vpop.f32.mrb[5].mxu0  ;;  %v4280_v29 = vld [vmem:[%s5447_s4] ss:$8 sps:$4 sm:$0xff]   ;;  %725 = vmatprep.subr.bf16.mxu1 %v4278_v28 }
 0x142   : > { %v542_v32 = vpop.f32.mrb[6].mxu0  ;;  %726 = vmatpush1.bf16.msra.mxu1 %v4280_v29  ;;  %v4283_v31 = vld [vmem:[%s5447_s4 + $0x10] ss:$8 sps:$4 sm:$0xff]  }
 0x143   : > { %v554_v33 = vsel %vm553_vm1, %v540_v30, 0.0  ;;  %v543_v34 = vpop.f32.mrb[7].mxu0  ;;  %v4284_v32 = vld [vmem:[%s5447_s4 + $0x24] ss:$8 sps:$4 sm:$0xff]  }
 0x144   : > { %555 = vadd.xlane.f32.xlu1 %v554_v33  ;;  %v4286_v33 = vld [vmem:[%s5447_s4 + $0x20] ss:$8 sps:$4 sm:$0xff]   ;;  %v4287_v34 = vld [vmem:[%s5447_s4 + $0x34] ss:$8 sps:$4 sm:$0xff]  }
 0x1c9   : > { %v549_v35 = vpop.xlane.xlu0 %548 }
 0x1ca   : > { %v558_v36 = vmul.f32 0.015625, %v549_v35  ;;  %v4289_v35 = vld [vmem:[%s5447_s4 + $0x30] ss:$8 sps:$4 sm:$0xff]  }
 0x1cc   : > { %v561_v37 = vsub.f32 %v532_v21, %v558_v36 }
 0x1cd   : > { %v552_v38 = vpop.xlane.xlu0 %551 }
 0x1ce   : > { %v559_v39 = vmul.f32 0.015625, %v552_v38  ;;  %v564_v40 = vmul.f32 %v561_v37, %v561_v37 }
 0x1d0   : > { %v562_v41 = vsub.f32 %v535_v24, %v559_v39  ;;  %v567_v42 = vsel %vm490_vm0, %v564_v40, 0.0 }
 0x1d1   : > { %v556_v43 = vpop.xlane.xlu1 %555  ;;  %568 = vadd.xlane.f32.xlu1 %v567_v42 }
 0x1d2   : > { %v560_v44 = vmul.f32 0.015625, %v556_v43  ;;  %v565_v45 = vmul.f32 %v562_v41, %v562_v41 }
 0x1d4   : > { %v563_v46 = vsub.f32 %v540_v30, %v560_v44  ;;  %v570_v47 = vsel %vm490_vm0, %v565_v45, 0.0  ;;  %v4281_v30 = vld [vmem:[%s5447_s4 + $0x14] ss:$8 sps:$4 sm:$0xff]  }
 0x1d5   : > { %571 = vadd.xlane.f32.xlu0 %v570_v47  ;;  %727 = vmatprep.subr.bf16.mxu1 %v4281_v30  ;;  %v3632_v47 = vld [vmem:[#allocation2 + $0x4] ss:$0 sm:$0xff] }
 0x1d6   : > { %v566_v48 = vmul.f32 %v563_v46, %v563_v46  ;;  %728 = vmatpush1.bf16.msra.mxu1 %v4283_v31 }
 0x1d7   : > { %729 = vmatprep.subr.bf16.mxu1 %v4284_v32 }
 0x1d8   : > { %v573_v49 = vsel %vm553_vm1, %v566_v48, 0.0 }
 0x1d9   : > { %574 = vadd.xlane.f32.xlu1 %v573_v49 }
 0x1da   : > { %730 = vmatpush1.bf16.msra.mxu1 %v4286_v33 }
 0x1db   : > { %731 = vmatprep.subr.bf16.mxu1 %v4287_v34  ;;  %v4887_v34 = vsel %vm903_vm3, 65535, %v4589_v0 }
 0x1de   : > { %732 = vmatpush1.bf16.msra.mxu1 %v4289_v35 }
 0x25e   : > { %v569_v50 = vpop.xlane.xlu1 %568 }
 0x25f   : > { %v576_v51 = vmul.f32 0.015625, %v569_v50 }
 0x261   : > { %v579_v52 = vadd.f32 1e-05, %v576_v51  ;;  %v3633_v51 = vld [vmem:[#allocation2 + $0x5] ss:$0 sm:$0xff] }
 0x262   : > { %v572_v53 = vpop.xlane.xlu0 %571 }
 0x263   : > { %4338 = vrsqrt.f32 %v579_v52  ;;  %v577_v54 = vmul.f32 0.015625, %v572_v53 }
 0x265   : > { %v580_v55 = vadd.f32 1e-05, %v577_v54 }
 0x266   : > { %v575_v56 = vpop.xlane.xlu1 %574 }
 0x267   : > { %4340 = vrsqrt.f32 %v580_v55  ;;  %v578_v57 = vmul.f32 0.015625, %v575_v56 }
 0x269   : > { %v581_v58 = vadd.f32 1e-05, %v578_v57 }
 0x26b   : > { %4342 = vrsqrt.f32 %v581_v58 }
 0x26d   : > { %v4339_v59 = vpop.eup %4338 }
 0x26e   : > { %v585_v61 = vmul.f32 %v4339_v59, %v561_v37 }
 0x270   : > { %v592_v63 = vmul.f32 %v3630_v60, %v585_v61  ;;  %v669_v61 = vlaneseq }
 0x271   : > { %v4341_v1 = vpop.eup %4340 }
 0x272   : > { %v4809_v2 = vadd.f32 %v3631_v62, %v592_v63  ;;  %v586_v3 = vmul.f32 %v4341_v1, %v562_v41  ;;  %v667_v1 = vld [vmem:[%s5451_s8] ss:$2 sm:$0x3] }
 0x274   : > { %v604_v4 = vsel %vm490_vm0, %v4809_v2, 0.0  ;;  %v593_v5 = vmul.f32 %v3630_v60, %v586_v3 }
 0x275   : > { %v4343_v6 = vpop.eup %4342  ;;  %605 = vadd.xlane.f32.xlu0 %v604_v4 }
 0x276   : > { %v4813_v7 = vadd.f32 %v3631_v62, %v593_v5  ;;  %v587_v8 = vmul.f32 %v4343_v6, %v563_v46 }
 0x278   : > { %v607_v9 = vsel %vm490_vm0, %v4813_v7, 0.0  ;;  %v594_v10 = vmul.f32 %v3630_v60, %v587_v8 }
 0x279   : > { %608 = vadd.xlane.f32.xlu1 %v607_v9 }
 0x27a   : > { %v4817_v11 = vadd.f32 %v3631_v62, %v594_v10  ;;  %v4854_v62 = vshrl.u32 %v669_v61, 7 }
 0x27c   : > { %v610_v12 = vsel %vm553_vm1, %v4817_v11, 0.0  ;;  %v671_v63 = vsub.s32 0, %v4854_v62  ;;  %v675_v3 = vsub.s32 1, %v4854_v62 }
 0x27d   : > { %611 = vadd.xlane.f32.xlu0 %v610_v12 }
 0x27e   : > { %v672_v4 = vrot.slane %v667_v1, %v671_v63  ;;  %v676_v6 = vrot.slane %v667_v1, %v675_v3 }
 0x302   : > { %v606_v13 = vpop.xlane.xlu0 %605 }
 0x303   : > { %v613_v14 = vmul.f32 0.015625, %v606_v13 }
 0x305   : > { %v616_v15 = vsub.f32 %v4809_v2, %v613_v14 }
 0x306   : > { %v609_v16 = vpop.xlane.xlu1 %608 }
 0x307   : > { %v614_v17 = vmul.f32 0.015625, %v609_v16  ;;  %v619_v18 = vmul.f32 %v616_v15, %v616_v15 }
 0x309   : > { %v617_v19 = vsub.f32 %v4813_v7, %v614_v17  ;;  %v622_v20 = vsel %vm490_vm0, %v619_v18, 0.0 }
 0x30a   : > { %623 = vadd.xlane.f32.xlu1 %v622_v20  ;;  %v612_v21 = vpop.xlane.xlu0 %611 }
 0x30b   : > { %v615_v22 = vmul.f32 0.015625, %v612_v21  ;;  %v620_v23 = vmul.f32 %v617_v19, %v617_v19 }
 0x30d   : > { %v618_v24 = vsub.f32 %v4817_v11, %v615_v22  ;;  %v625_v25 = vsel %vm490_vm0, %v620_v23, 0.0 }
 0x30e   : > { %626 = vadd.xlane.f32.xlu0 %v625_v25 }
 0x30f   : > { %v621_v26 = vmul.f32 %v618_v24, %v618_v24 }
 0x311   : > { %v628_v27 = vsel %vm553_vm1, %v621_v26, 0.0 }
 0x312   : > { %629 = vadd.xlane.f32.xlu1 %v628_v27 }
 0x397   : > { %v624_v36 = vpop.xlane.xlu1 %623 }
 0x398   : > { %v631_v37 = vmul.f32 0.015625, %v624_v36 }
 0x39a   : > { %v634_v38 = vadd.f32 1e-05, %v631_v37 }
 0x39b   : > { %v627_v39 = vpop.xlane.xlu0 %626 }
 0x39c   : > { %4344 = vrsqrt.f32 %v634_v38  ;;  %v632_v40 = vmul.f32 0.015625, %v627_v39 }
 0x39e   : > { %v635_v41 = vadd.f32 1e-05, %v632_v40 }
 0x39f   : > { %v630_v42 = vpop.xlane.xlu1 %629 }
 0x3a0   : > { %4346 = vrsqrt.f32 %v635_v41  ;;  %v633_v43 = vmul.f32 0.015625, %v630_v42 }
 0x3a2   : > { %v636_v44 = vadd.f32 1e-05, %v633_v43 }
 0x3a4   : > { %4348 = vrsqrt.f32 %v636_v44 }
 0x3a6   : > { %v4345_v45 = vpop.eup %4344 }
 0x3a7   : > { %v640_v46 = vmul.f32 %v4345_v45, %v616_v15 }
 0x3a9   : > { %v647_v50 = vmul.f32 %v3632_v47, %v640_v46 }
 0x3aa   : > { %v4347_v48 = vpop.eup %4346 }
 0x3ab   : > { %v641_v49 = vmul.f32 %v4347_v48, %v617_v19  ;;  %v654_v54 = vadd.f32 %v3633_v51, %v647_v50 }
 0x3ad   : > { %v648_v52 = vmul.f32 %v3632_v47, %v641_v49 }
 0x3ae   : > { %v4349_v53 = vpop.eup %4348 }
 0x3af   : > { %v655_v55 = vadd.f32 %v3633_v51, %v648_v52  ;;  %v642_v56 = vmul.f32 %v4349_v53, %v618_v24 }
 0x3b1   : > { %v657_v57 = vpack.c.bf16 %v655_v55, %v654_v54  ;;  %v649_v58 = vmul.f32 %v3632_v47, %v642_v56 }
 0x3b3   : > { %3642 = vmatmul.mubr.msk.bf16.vlgmr.msra.gmra.mrb[0].mxu1 %vm490_vm0, %v657_v57  ;;  %v656_v59 = vadd.f32 %v3633_v51, %v649_v58 }
 0x3b4   : > { %767 = vmatprep.mubr.bf16.mxu1 %v4589_v0 }
 0x3b5   : > { %v658_v60 = vpack.c.bf16 %v656_v59, %v656_v59 }
 0x3bb   : > { %3643 = vmatmul.mubr.msk.bf16.gmra.mrb[4].mxu1 %vm490_vm0, %v658_v60 }
 0x486   : > { %v759_v5 = vpop.f32.mrb[0].mxu1 }
 0x487   : > { %v760_v8 = vadd.f32 %v759_v5, %v672_v4  ;;  %v761_v9 = vpop.f32.mrb[1].mxu1 }
 0x488   : > { %v763_v10 = vpop.f32.mrb[2].mxu1  ;;  %v762_v14 = vadd.f32 %v761_v9, %v676_v6 }
 0x489   : > { %v764_v12 = vadd.f32 %v763_v10, %v672_v4  ;;  %v765_v13 = vpop.f32.mrb[3].mxu1  ;;  %v776_v16 = vmul.f32 0.25, %v760_v8 }
 0x48a   : > { %v766_v15 = vadd.f32 %v765_v13, %v676_v6 }
 0x48b   : > { %v777_v17 = vmul.f32 0.25, %v764_v12  ;;  %v4865_v18 = vpack.c.bf16 %v764_v12, %v760_v8 }
 0x48c   : > { %v4867_v19 = vpack.c.bf16 %v766_v15, %v762_v14 }
 0x48d   : > { %v4869_v20 = vpack.c.bf16 %v777_v17, %v776_v16  ;;  %795 = vrot.lane.b32.xlu0 %v4865_v18, %s4590_s18 }
 0x48e   : > { %v769_v21 = vpop.f32.mrb[4].mxu1 }
 0x48f   : > { %v770_v22 = vadd.f32 %v769_v21, %v672_v4  ;;  %v771_v23 = vpop.f32.mrb[5].mxu1  ;;  %3934 = vmatprep.mubr.msk.bf16.mxu1 %vm799_vm2, %v4869_v20 }
 0x490   : > { %v773_v24 = vpop.f32.mrb[6].mxu1  ;;  %v772_v30 = vadd.f32 %v771_v23, %v676_v6 }
 0x491   : > { %v4875_v25 = vpack.c.bf16 %v770_v22, %v770_v22  ;;  %v774_v26 = vpop.f32.mrb[7].mxu1  ;;  %v778_v32 = vmul.f32 0.25, %v770_v22 }
 0x492   : > { %v4884_v33 = vpack.c.bf16 %v772_v30, %v772_v30 }
 0x493   : > { %797 = vrot.lane.b32.xlu1 %v4875_v25, %s4590_s18  ;;  %v4889_v35 = vpack.c.bf16 %v778_v32, %v778_v32 }
 0x494   : > { %v907_v36 = vand.u32 %v4887_v34, %v4884_v33 }
 0x4ff   : > { %v796_v27 = vpop.permute.xlu0 %795 }
 0x500   : > { %4182 = vmatprep.subr.msk.bf16.mxu1 %vm799_vm2, %v796_v27  ;;  %v807_v28 = vsel %vm799_vm2, %v796_v27, 0 }
 0x501   : > { %3931 = vmatpush3.bf16.xpose.msra.mxu1 %v807_v28 }
 0x505   : > { %v798_v29 = vpop.permute.xlu1 %797 }
 0x506   : > { %4183 = vmatprep.subr.msk.bf16.mxu1 %vm799_vm2, %v798_v29  ;;  %v810_v31 = vsel %vm799_vm2, %v798_v29, 0 }
 0x509   : > { %3933 = vmatpush3.bf16.xpose.msra.mxu1 %v810_v31 }
 0x50a   : > { %3938 = vmatprep.subr.bf16.mxu1 %v4867_v19 }
 0x510   : > { %3935 = vmatmul.mubr.msk.bf16.vlgmr.msra.gmra.mrb[8].mxu1 %vm799_vm2, %v4889_v35 }
 0x511   : > { %3939 = vmatpush3.bf16.msra.mxu1 %v4867_v19 }
 0x512   : > { %3940 = vmatprep.subr.bf16.mxu1 %v907_v36 }
 0x515   : > { %3941 = vmatpush3.bf16.msra.mxu1 %v907_v36 }
 0x5e3   : > { %v3936_v37 = vpop.f32.mrb[8].mxu1 }
 0x5e4   : > { %v846_v38 = vpop.f32.mrb[9].mxu1  ;;  %v868_v43 = vsel %vm867_vm5, %v3936_v37, -inf }
 0x5e5   : > { %v3937_v39 = vpop.f32.mrb[10].mxu1  ;;  %v861_v40 = vsel %vm860_vm4, %v846_v38, -inf }
 0x5e6   : > { %862 = vmax.xlane.f32.xlu1 %v861_v40  ;;  %v849_v41 = vpop.f32.mrb[11].mxu1 }
 0x5e7   : > { %v864_v42 = vsel %vm860_vm4, %v849_v41, -inf }
 0x5e8   : > { %865 = vmax.xlane.f32.xlu0 %v864_v42 }
 0x5ec   : > { %869 = vmax.xlane.f32.xlu0 %v868_v43 }
 0x673   : > { %v863_v44 = vpop.xlane.xlu1 %862 }
 0x674   : > { %v871_v45 = vsub.f32 %v846_v38, %v863_v44 }
 0x675   : > { %v866_v46 = vpop.xlane.xlu0 %865 }
 0x676   : > { %v874_v47 = vmul.f32 1.442695, %v871_v45  ;;  %v872_v48 = vsub.f32 %v849_v41, %v866_v46 }
 0x678   : > { %4350 = vpow2.f32 %v874_v47  ;;  %v876_v49 = vmul.f32 1.442695, %v872_v48 }
 0x679   : > { %v870_v50 = vpop.xlane.xlu0 %869 }
 0x67a   : > { %4352 = vpow2.f32 %v876_v49  ;;  %v873_v51 = vsub.f32 %v3936_v37, %v870_v50 }
 0x67c   : > { %v878_v52 = vmul.f32 1.442695, %v873_v51 }
 0x67e   : > { %4354 = vpow2.f32 %v878_v52 }
 0x682   : > { %v4351_v53 = vpop.eup %4350 }
 0x683   : > { %v880_v54 = vsel %vm860_vm4, %v4351_v53, 0.0 }
 0x684   : > { %v4353_v55 = vpop.eup %4352  ;;  %881 = vadd.xlane.f32.xlu1 %v880_v54 }
 0x685   : > { %v883_v56 = vsel %vm860_vm4, %v4353_v55, 0.0 }
 0x686   : > { %884 = vadd.xlane.f32.xlu0 %v883_v56 }
 0x688   : > { %v4355_v57 = vpop.eup %4354 }
 0x689   : > { %v886_v58 = vsel %vm867_vm5, %v4355_v57, 0.0 }
 0x68a   : > { %887 = vadd.xlane.f32.xlu1 %v886_v58 }
 0x69b   : > { %967 = vrot.lane.b32.xlu1 %v4875_v25, %s5467_s28 }
 0x69c   : > { %965 = vrot.lane.b32.xlu0 %v4865_v18, %s5467_s28  ;;  %s365_s28 = sand.u32 1, %s4576_s14  }
 0x69f   : > { %961 = vrot.lane.b32.xlu1 %v4869_v20, %s5465_s11 }
 0x6a3   : > { %963 = vrot.lane.b32.xlu1 %v4889_v35, %s5465_s11 }
 0x711   : > { %v882_v59 = vpop.xlane.xlu1 %881 }
 0x712   : > { %4356 = vrcp.f32 %v882_v59 }
 0x713   : > { %v885_v60 = vpop.xlane.xlu0 %884 }
 0x714   : > { %4358 = vrcp.f32 %v885_v60 }
 0x717   : > { %v888_v61 = vpop.xlane.xlu1 %887  ;;  %v966_v1 = vpop.permute.xlu0 %965 }
 0x718   : > { %4360 = vrcp.f32 %v888_v61  ;;  %4184 = vmatprep.subr.msk.bf16.mxu1 %vm799_vm2, %v966_v1  ;;  %v976_v16 = vsel %vm799_vm2, %v966_v1, 0 }
 0x71b   : > { %v968_v9 = vpop.permute.xlu1 %967 }
 0x71c   : > { %v4357_v4 = vpop.eup %4356  ;;  %v979_v17 = vsel %vm799_vm2, %v968_v9, 0 }
 0x71d   : > { %v892_v6 = vmul.f32 %v4357_v4, %v4351_v53  ;;  %v4290_v53 = vld [vmem:[%s5448_s5 + $0x8] sm:$0xff]  }
 0x71e   : > { %v4359_v5 = vpop.eup %4358 }
 0x71f   : > { %v893_v8 = vmul.f32 %v4359_v5, %v4353_v55  ;;  %v962_v15 = vpop.permute.xlu1 %961 }
 0x721   : > { %v895_v10 = vpack.c.bf16 %v893_v8, %v892_v6 }
 0x722   : > { %v4361_v12 = vpop.eup %4360 }
 0x723   : > { %3942 = vmatprep.mubr.msk.bf16.mxu1 %vm860_vm4, %v895_v10  ;;  %v894_v13 = vmul.f32 %v4361_v12, %v4355_v57  ;;  %v964_v21 = vpop.permute.xlu1 %963 }
 0x725   : > { %v896_v14 = vpack.c.bf16 %v894_v13, %v894_v13 }
 0x727   : > { %3943 = vmatmul.mubr.msk.bf16.vlgmr.msra.gmra.mrb[12].mxu1 %vm860_vm4, %v896_v14 }
 0x728   : > { %3947 = vmatpush3.bf16.xpose.msra.mxu1 %v976_v16  ;;  %3950 = vmatprep.mubr.msk.bf16.mxu1 %vm799_vm2, %v962_v15 }
 0x729   : > { %4185 = vmatprep.subr.msk.bf16.mxu1 %vm799_vm2, %v968_v9 }
 0x730   : > { %3949 = vmatpush3.bf16.xpose.msra.mxu1 %v979_v17 }
 0x731   : > { %3962 = vmatprep.subr.bf16.mxu1 %v4290_v53 }
 0x737   : > { %3951 = vmatmul.mubr.msk.bf16.vlgmr.msra.gmra.mrb[16].mxu1 %vm799_vm2, %v964_v21 }
 0x738   : > { %3963 = vmatpush3.bf16.msra.mxu1 %v4290_v53 }
 0x7fa   : > { %v4918_v22 = vpop.f32.mrb[12].mxu1 }
 0x7fb   : > { %v4920_v23 = vpop.f32.mrb[13].mxu1  ;;  %v958_v8 = vpack.c.bf16 %v4918_v22, %v4918_v22 }
 0x7fc   : > { %v3945_v24 = vpop.f32.mrb[14].mxu1 }
 0x7fd   : > { %v4922_v26 = vpop.f32.mrb[15].mxu1 }
 0x7fe   : > { %v957_v27 = vpack.c.bf16 %v4922_v26, %v4920_v23 }
 0x80a   : > { %v3952_v28 = vpop.f32.mrb[16].mxu1 }
 0x80b   : > { %v1015_v29 = vpop.f32.mrb[17].mxu1  ;;  %v1035_v37 = vsel %vm867_vm5, %v3952_v28, -inf }
 0x80c   : > { %v3953_v30 = vpop.f32.mrb[18].mxu1  ;;  %v1029_v31 = vsel %vm860_vm4, %v1015_v29, -inf }
 0x80d   : > { %1030 = vmax.xlane.f32.xlu0 %v1029_v31  ;;  %v1018_v32 = vpop.f32.mrb[19].mxu1 }
 0x80e   : > { %v1032_v36 = vsel %vm860_vm4, %v1018_v32, -inf }
 0x80f   : > { %1033 = vmax.xlane.f32.xlu1 %v1032_v36 }
 0x811   : > { %1036 = vmax.xlane.f32.xlu0 %v1035_v37 }
 0x89a   : > { %v1031_v38 = vpop.xlane.xlu0 %1030 }
 0x89b   : > { %v1038_v39 = vsub.f32 %v1015_v29, %v1031_v38 }
 0x89c   : > { %v1034_v40 = vpop.xlane.xlu1 %1033 }
 0x89d   : > { %v1041_v41 = vmul.f32 1.442695, %v1038_v39  ;;  %v1039_v42 = vsub.f32 %v1018_v32, %v1034_v40 }
 0x89e   : > { %v1037_v43 = vpop.xlane.xlu0 %1036 }
 0x89f   : > { %4362 = vpow2.f32 %v1041_v41  ;;  %v1043_v44 = vmul.f32 1.442695, %v1039_v42  ;;  %v1040_v45 = vsub.f32 %v3952_v28, %v1037_v43 }
 0x8a1   : > { %4364 = vpow2.f32 %v1043_v44  ;;  %v1045_v46 = vmul.f32 1.442695, %v1040_v45 }
 0x8a3   : > { %4366 = vpow2.f32 %v1045_v46 }
 0x8a9   : > { %v4363_v47 = vpop.eup %4362 }
 0x8aa   : > { %v1047_v48 = vsel %vm860_vm4, %v4363_v47, 0.0 }
 0x8ab   : > { %v4365_v49 = vpop.eup %4364  ;;  %1048 = vadd.xlane.f32.xlu0 %v1047_v48 }
 0x8ac   : > { %v1050_v52 = vsel %vm860_vm4, %v4365_v49, 0.0 }
 0x8ad   : > { %v4367_v50 = vpop.eup %4366 }
 0x8ae   : > { %v1053_v51 = vsel %vm867_vm5, %v4367_v50, 0.0 }
 0x8af   : > { %1054 = vadd.xlane.f32.xlu1 %v1053_v51  ;;  %1051 = vadd.xlane.f32.xlu0 %v1050_v52 }
 0x8c0   : > { %1068 = vrot.lane.b32.xlu1 %v4884_v33, %s5465_s11 }
 0x8c4   : > { %1254 = vrot.lane.b32.xlu1 %v4865_v18, %s5463_s20 }
 0x8c5   : > { %1066 = vrot.lane.b32.xlu0 %v4867_v19, %s5465_s11  ;;  %s366_s11 = scalar_lea.vmem [#allocation5], %s365_s28 }
 0x8c8   : > { %1256 = vrot.lane.b32.xlu1 %v4875_v25, %s5463_s20  ;;  %s5480_s20 = smov 16  }
 0x8c9   : > { %1250 = vrot.lane.b32.xlu0 %v4869_v20, %s5461_s21 }
 0x8cc   : > { %1252 = vrot.lane.b32.xlu1 %v4889_v35, %s5461_s21 }
 0x8cd   : > { %1484 = vrot.lane.b32.xlu0 %v4865_v18, %s5459_s26 }
 0x8d0   : > { %1486 = vrot.lane.b32.xlu1 %v4875_v25, %s5459_s26  ;;  %s5476_s26 = smov 48  }
 0x8d1   : > { %1480 = vrot.lane.b32.xlu0 %v4869_v20, %s5457_s29  ;;  %v4291_v20 = vld [vmem:[%s5448_s5] sm:$0xff]  }
 0x8d4   : > { %1482 = vrot.lane.b32.xlu1 %v4889_v35, %s5457_s29 }
 0x938   : > { %v1049_v54 = vpop.xlane.xlu0 %1048 }
 0x939   : > { %4368 = vrcp.f32 %v1049_v54 }
 0x93c   : > { %v1052_v55 = vpop.xlane.xlu0 %1051  ;;  %v1055_v56 = vpop.xlane.xlu1 %1054 }
 0x93d   : > { %4370 = vrcp.f32 %v1052_v55 }
 0x93e   : > { %4372 = vrcp.f32 %v1055_v56 }
 0x940   : > { %v1067_v57 = vpop.permute.xlu0 %1066  ;;  %v1069_v58 = vpop.permute.xlu1 %1068 }
 0x941   : > { %v1078_v18 = vand.u32 %v1069_v58, %v4887_v34  ;;  %3954 = vmatprep.subr.bf16.mxu0 %v1067_v57 }
 0x942   : > { %3955 = vmatpush3.bf16.msra.mxu0 %v1067_v57 }
 0x943   : > { %3956 = vmatprep.subr.bf16.mxu0 %v1078_v18  ;;  %v4369_v59 = vpop.eup %4368 }
 0x944   : > { %v1255_v25 = vpop.permute.xlu1 %1254  ;;  %v1059_v61 = vmul.f32 %v4369_v59, %v4363_v47  ;;  %v1251_v16 = vpop.permute.xlu0 %1250 }
 0x945   : > { %4186 = vmatprep.subr.msk.bf16.mxu1 %vm799_vm2, %v1255_v25  ;;  %v1265_v17 = vsel %vm799_vm2, %v1255_v25, 0 }
 0x946   : > { %3957 = vmatpush3.bf16.msra.mxu0 %v1078_v18 }
 0x947   : > { %v4371_v35 = vpop.eup %4370  ;;  %3968 = vmatprep.subr.bf16.mxu0 %v4291_v20 }
 0x948   : > { %v4373_v60 = vpop.eup %4372  ;;  %v1060_v1 = vmul.f32 %v4371_v35, %v4365_v49  ;;  %v1257_v21 = vpop.permute.xlu1 %1256 }
 0x949   : > { %v1061_v4 = vmul.f32 %v4373_v60, %v4367_v50  ;;  %v1485_v28 = vpop.permute.xlu0 %1484 }
 0x94a   : > { %v1062_v5 = vpack.c.bf16 %v1060_v1, %v1059_v61  ;;  %v1495_v30 = vsel %vm799_vm2, %v1485_v28, 0 }
 0x94b   : > { %v1063_v6 = vpack.c.bf16 %v1061_v4, %v1061_v4 }
 0x94c   : > { %3958 = vmatprep.mubr.msk.bf16.mxu0 %vm860_vm4, %v1062_v5  ;;  %v1253_v29 = vpop.permute.xlu1 %1252 }
 0x94d   : > { %3959 = vmatmul.mubr.msk.bf16.vlgmr.msra.gmra.mrb[8].mxu0 %vm860_vm4, %v1063_v6  ;;  %v1481_v31 = vpop.permute.xlu0 %1480 }
 0x94e   : > { %3970 = vmatprep.mubr.msk.bf16.mxu0 %vm799_vm2, %v957_v27  ;;  %3969 = vmatpush3.bf16.msra.mxu0 %v4291_v20  ;;  %v1268_v27 = vsel %vm799_vm2, %v1257_v21, 0 }
 0x950   : > { %v1487_v32 = vpop.permute.xlu1 %1486 }
 0x951   : > { %v1498_v36 = vsel %vm799_vm2, %v1487_v32, 0 }
 0x954   : > { %v1483_v37 = vpop.permute.xlu1 %1482 }
 0x955   : > { %3971 = vmatmul.mubr.msk.bf16.vlgmr.msra.gmra.mrb[12].mxu0 %vm799_vm2, %v958_v8 }
 0xa20   : > { %v3960_v9 = vpop.f32.mrb[8].mxu0 }
 0xa21   : > { %v1114_v10 = vpop.f32.mrb[9].mxu0  ;;  %v1129_v15 = vpack.c.bf16 %v3960_v9, %v3960_v9 }
 0xa22   : > { %v3961_v12 = vpop.f32.mrb[10].mxu0 }
 0xa23   : > { %v1117_v13 = vpop.f32.mrb[11].mxu0 }
 0xa24   : > { %v1128_v14 = vpack.c.bf16 %v1117_v13, %v1114_v10 }
 0xa26   : > { %3964 = vmatprep.mubr.msk.bf16.mxu1 %vm799_vm2, %v1128_v14 }
 0xa27   : > { %3965 = vmatmul.mubr.msk.bf16.vlgmr.msra.gmra.mrb[20].mxu1 %vm799_vm2, %v1129_v15 }
 0xa28   : > { %3975 = vmatpush3.bf16.xpose.msra.mxu1 %v1265_v17  ;;  %v3972_v23 = vpop.f32.mrb[12].mxu0  ;;  %3978 = vmatprep.mubr.msk.bf16.mxu1 %vm799_vm2, %v1251_v16 }
 0xa29   : > { %4187 = vmatprep.subr.msk.bf16.mxu1 %vm799_vm2, %v1257_v21  ;;  %v1236_v22 = vpop.f32.mrb[13].mxu0 }
 0xa2a   : > { %v3973_v24 = vpop.f32.mrb[14].mxu0 }
 0xa2b   : > { %v1239_v26 = vpop.f32.mrb[15].mxu0 }
 0xa30   : > { %3977 = vmatpush3.bf16.xpose.msra.mxu1 %v1268_v27 }
 0xa31   : > { %4188 = vmatprep.subr.msk.bf16.mxu1 %vm799_vm2, %v1485_v28 }
 0xa37   : > { %3979 = vmatmul.mubr.msk.bf16.vlgmr.msra.gmra.mrb[24].mxu1 %vm799_vm2, %v1253_v29 }
 0xa38   : > { %3997 = vmatpush3.bf16.xpose.msra.mxu1 %v1495_v30  ;;  %4000 = vmatprep.mubr.msk.bf16.mxu1 %vm799_vm2, %v1481_v31 }
 0xa39   : > { %4189 = vmatprep.subr.msk.bf16.mxu1 %vm799_vm2, %v1487_v32 }
 0xa40   : > { %3999 = vmatpush3.bf16.xpose.msra.mxu1 %v1498_v36 }
 0xa47   : > { %4001 = vmatmul.mubr.msk.bf16.vlgmr.msra.gmra.mrb[28].mxu1 %vm799_vm2, %v1483_v37 }
 0xafa   : > { %v3966_v38 = vpop.f32.mrb[20].mxu1 }
 0xafb   : > { %v4982_v39 = vadd.f32 %v3972_v23, %v3966_v38  ;;  %v1176_v40 = vpop.f32.mrb[21].mxu1 }
 0xafc   : > { %v4984_v41 = vadd.f32 %v1236_v22, %v1176_v40  ;;  %v3967_v42 = vpop.f32.mrb[22].mxu1 }
 0xafd   : > { %v1179_v43 = vpop.f32.mrb[23].mxu1 }
 0xafe   : > { %v4986_v44 = vadd.f32 %v1239_v26, %v1179_v43 }
 0xb0a   : > { %v3980_v45 = vpop.f32.mrb[24].mxu1 }
 0xb0b   : > { %v1304_v46 = vpop.f32.mrb[25].mxu1  ;;  %v1324_v51 = vsel %vm867_vm5, %v3980_v45, -inf }
 0xb0c   : > { %v3981_v47 = vpop.f32.mrb[26].mxu1  ;;  %v1318_v48 = vsel %vm860_vm4, %v1304_v46, -inf }
 0xb0d   : > { %1319 = vmax.xlane.f32.xlu0 %v1318_v48  ;;  %v1307_v49 = vpop.f32.mrb[27].mxu1 }
 0xb0e   : > { %v1321_v50 = vsel %vm860_vm4, %v1307_v49, -inf }
 0xb0f   : > { %1322 = vmax.xlane.f32.xlu1 %v1321_v50 }
 0xb11   : > { %1325 = vmax.xlane.f32.xlu0 %v1324_v51 }
 0xb1a   : > { %v4991_v52 = vpop.f32.mrb[28].mxu1 }
 0xb1b   : > { %v4993_v53 = vpop.f32.mrb[29].mxu1  ;;  %v1554_v12 = vsel %vm867_vm5, %v4991_v52, -inf }
 0xb1c   : > { %v4003_v54 = vpop.f32.mrb[30].mxu1  ;;  %v1548_v9 = vsel %vm860_vm4, %v4993_v53, -inf }
 0xb1d   : > { %v1537_v55 = vpop.f32.mrb[31].mxu1 }
 0xb1e   : > { %v1551_v10 = vsel %vm860_vm4, %v1537_v55, -inf }
 0xb9a   : > { %v1320_v56 = vpop.xlane.xlu0 %1319 }
 0xb9b   : > { %v1327_v57 = vsub.f32 %v1304_v46, %v1320_v56 }
 0xb9c   : > { %v1323_v58 = vpop.xlane.xlu1 %1322 }
 0xb9d   : > { %v1330_v18 = vmul.f32 1.442695, %v1327_v57  ;;  %v1328_v20 = vsub.f32 %v1307_v49, %v1323_v58 }
 0xb9e   : > { %v1326_v25 = vpop.xlane.xlu0 %1325 }
 0xb9f   : > { %4374 = vpow2.f32 %v1330_v18  ;;  %v1332_v59 = vmul.f32 1.442695, %v1328_v20  ;;  %v1329_v35 = vsub.f32 %v3980_v45, %v1326_v25 }
 0xba1   : > { %4376 = vpow2.f32 %v1332_v59  ;;  %v1334_v60 = vmul.f32 1.442695, %v1329_v35 }
 0xba3   : > { %4378 = vpow2.f32 %v1334_v60 }
 0xba9   : > { %v4375_v61 = vpop.eup %4374 }
 0xbaa   : > { %v1336_v1 = vsel %vm860_vm4, %v4375_v61, 0.0 }
 0xbab   : > { %v4377_v4 = vpop.eup %4376  ;;  %1337 = vadd.xlane.f32.xlu0 %v1336_v1 }
 0xbac   : > { %v1339_v8 = vsel %vm860_vm4, %v4377_v4, 0.0 }
 0xbad   : > { %v4379_v5 = vpop.eup %4378 }
 0xbae   : > { %v1342_v6 = vsel %vm867_vm5, %v4379_v5, 0.0 }
 0xbaf   : > { %1343 = vadd.xlane.f32.xlu1 %v1342_v6  ;;  %1340 = vadd.xlane.f32.xlu0 %v1339_v8 }
 0xbc0   : > { %1355 = vrot.lane.b32.xlu1 %v4884_v33, %s5461_s21 }
 0xbc5   : > { %1353 = vrot.lane.b32.xlu0 %v4867_v19, %s5461_s21  ;;  %s5481_s21 = smov 80  }
 0xbe4   : > { %1549 = vmax.xlane.f32.xlu1 %v1548_v9  ;;  %1552 = vmax.xlane.f32.xlu0 %v1551_v10  ;;  %v4293_v9 = vld [vmem:[%s5448_s5 + $0x18] sm:$0xff]   ;;  %v3672_v10 = vld [vmem:[%s5451_s8 + $0x2] ss:$0 sm:$0xff] }
 0xbe8   : > { %1555 = vmax.xlane.f32.xlu0 %v1554_v12 }
 0xc38   : > { %v1338_v13 = vpop.xlane.xlu0 %1337 }
 0xc39   : > { %4380 = vrcp.f32 %v1338_v13 }
 0xc3c   : > { %v1341_v14 = vpop.xlane.xlu0 %1340  ;;  %v1344_v15 = vpop.xlane.xlu1 %1343 }
 0xc3d   : > { %4382 = vrcp.f32 %v1341_v14 }
 0xc3e   : > { %4384 = vrcp.f32 %v1344_v15 }
 0xc40   : > { %v1354_v16 = vpop.permute.xlu0 %1353  ;;  %v1356_v17 = vpop.permute.xlu1 %1355 }
 0xc41   : > { %v1365_v21 = vand.u32 %v1356_v17, %v4887_v34  ;;  %3982 = vmatprep.subr.bf16.mxu0 %v1354_v16 }
 0xc42   : > { %3983 = vmatpush3.bf16.msra.mxu0 %v1354_v16 }
 0xc43   : > { %3984 = vmatprep.subr.bf16.mxu0 %v1365_v21  ;;  %v4381_v23 = vpop.eup %4380 }
 0xc44   : > { %v1348_v26 = vmul.f32 %v4381_v23, %v4375_v61 }
 0xc46   : > { %3985 = vmatpush3.bf16.msra.mxu0 %v1365_v21 }
 0xc47   : > { %v4383_v22 = vpop.eup %4382 }
 0xc48   : > { %v4385_v24 = vpop.eup %4384  ;;  %v1349_v27 = vmul.f32 %v4383_v22, %v4377_v4 }
 0xc49   : > { %v1350_v28 = vmul.f32 %v4385_v24, %v4379_v5 }
 0xc4a   : > { %v1351_v29 = vpack.c.bf16 %v1349_v27, %v1348_v26 }
 0xc4b   : > { %v1352_v30 = vpack.c.bf16 %v1350_v28, %v1350_v28 }
 0xc4c   : > { %3986 = vmatprep.mubr.msk.bf16.mxu0 %vm860_vm4, %v1351_v29 }
 0xc4d   : > { %3987 = vmatmul.mubr.msk.bf16.vlgmr.msra.gmra.mrb[16].mxu0 %vm860_vm4, %v1352_v30 }
 0xc71   : > { %v1553_v31 = vpop.xlane.xlu0 %1552  ;;  %v1550_v32 = vpop.xlane.xlu1 %1549 }
 0xc72   : > { %v1558_v36 = vsub.f32 %v1537_v55, %v1553_v31  ;;  %v1557_v38 = vsub.f32 %v4993_v53, %v1550_v32 }
 0xc74   : > { %v1562_v37 = vmul.f32 1.442695, %v1558_v36  ;;  %v1560_v43 = vmul.f32 1.442695, %v1557_v38 }
 0xc75   : > { %v1556_v40 = vpop.xlane.xlu0 %1555 }
 0xc76   : > { %4386 = vpow2.f32 %v1562_v37  ;;  %v1559_v42 = vsub.f32 %v4991_v52, %v1556_v40  ;;  %v4292_v52 = vld [vmem:[%s5448_s5 + $0x10] sm:$0xff]  }
 0xc77   : > { %3990 = vmatprep.subr.bf16.mxu0 %v4292_v52 }
 0xc78   : > { %v1564_v45 = vmul.f32 1.442695, %v1559_v42  ;;  %3991 = vmatpush3.bf16.msra.mxu0 %v4292_v52 }
 0xc7a   : > { %4388 = vpow2.f32 %v1564_v45 }
 0xc7b   : > { %4390 = vpow2.f32 %v1560_v43 }
 0xc80   : > { %v4387_v46 = vpop.eup %4386 }
 0xc81   : > { %v1569_v47 = vsel %vm860_vm4, %v4387_v46, 0.0 }
 0xc82   : > { %1570 = vadd.xlane.f32.xlu0 %v1569_v47 }
 0xc84   : > { %v4389_v48 = vpop.eup %4388 }
 0xc85   : > { %v1572_v49 = vsel %vm867_vm5, %v4389_v48, 0.0  ;;  %v4391_v50 = vpop.eup %4390 }
 0xc86   : > { %1573 = vadd.xlane.f32.xlu1 %v1572_v49  ;;  %v1566_v51 = vsel %vm860_vm4, %v4391_v50, 0.0 }
 0xc8a   : > { %1567 = vadd.xlane.f32.xlu1 %v1566_v51 }
 0xc98   : > { %1583 = vrot.lane.b32.xlu0 %v4867_v19, %s5457_s29 }
 0xc9b   : > { %1585 = vrot.lane.b32.xlu1 %v4884_v33, %s5457_s29  ;;  %s5477_s29 = smov 112  }
 0xc9f   : > { %1719 = vrot.lane.b32.xlu1 %v3672_v10, %s4590_s18 }
 0xd0f   : > { %v1571_v53 = vpop.xlane.xlu0 %1570 }
 0xd10   : > { %4392 = vrcp.f32 %v1571_v53 }
 0xd13   : > { %v1584_v54 = vpop.permute.xlu0 %1583  ;;  %v1574_v55 = vpop.xlane.xlu1 %1573 }
 0xd14   : > { %4004 = vmatprep.subr.bf16.mxu0 %v1584_v54 }
 0xd17   : > { %v1568_v56 = vpop.xlane.xlu1 %1567 }
 0xd18   : > { %4394 = vrcp.f32 %v1568_v56 }
 0xd19   : > { %4396 = vrcp.f32 %v1574_v55 }
 0xd1a   : > { %v4393_v57 = vpop.eup %4392 }
 0xd1b   : > { %v1579_v60 = vmul.f32 %v4393_v57, %v4387_v46  ;;  %v1586_v19 = vpop.permute.xlu1 %1585 }
 0xd1c   : > { %v1595_v5 = vand.u32 %v1586_v19, %v4887_v34 }
 0xd1f   : > { %v1720_v36 = vpop.permute.xlu1 %1719 }
 0xd20   : > { %v3988_v58 = vpop.f32.mrb[16].mxu0 }
 0xd21   : > { %v1401_v18 = vpop.f32.mrb[17].mxu0  ;;  %v1416_v1 = vpack.c.bf16 %v3988_v58, %v3988_v58 }
 0xd22   : > { %v4395_v20 = vpop.eup %4394  ;;  %v3989_v25 = vpop.f32.mrb[18].mxu0 }
 0xd23   : > { %v1404_v59 = vpop.f32.mrb[19].mxu0  ;;  %v1578_v35 = vmul.f32 %v4395_v20, %v4391_v50  ;;  %v4397_v4 = vpop.eup %4396  ;;  %v4294_v25 = vld [vmem:[%s5449_s6] sm:$0xff]  }
 0xd24   : > { %v1415_v61 = vpack.c.bf16 %v1404_v59, %v1401_v18  ;;  %v1580_v6 = vmul.f32 %v4397_v4, %v4389_v48  ;;  %4018 = vmatprep.subr.bf16.mxu1 %v4294_v25  ;;  %v4295_v59 = vld [vmem:[%s5449_s6 + $0x8] sm:$0xff]  }
 0xd25   : > { %v1581_v33 = vpack.c.bf16 %v1579_v60, %v1578_v35  ;;  %4019 = vmatpush3.bf16.msra.mxu1 %v4294_v25  ;;  %v4296_v35 = vld [vmem:[%s5449_s6 + $0x10] sm:$0xff]   ;;  %v4297_v60 = vld [vmem:[%s5449_s6 + $0x18] sm:$0xff]  }
 0xd26   : > { %3992 = vmatprep.mubr.msk.bf16.mxu0 %vm799_vm2, %v1415_v61  ;;  %v1582_v8 = vpack.c.bf16 %v1580_v6, %v1580_v6  ;;  %4020 = vmatprep.subr.bf16.mxu1 %v4295_v59 }
 0xd27   : > { %3993 = vmatmul.mubr.msk.bf16.vlgmr.msra.gmra.mrb[20].mxu0 %vm799_vm2, %v1416_v1 }
 0xd28   : > { %4005 = vmatpush3.bf16.msra.mxu0 %v1584_v54  ;;  %4008 = vmatprep.mubr.msk.bf16.mxu0 %vm860_vm4, %v1581_v33 }
 0xd29   : > { %4006 = vmatprep.subr.bf16.mxu0 %v1595_v5  ;;  %4021 = vmatpush3.bf16.msra.mxu1 %v4295_v59 }
 0xd2a   : > { %4022 = vmatprep.subr.bf16.mxu1 %v4296_v35 }
 0xd2c   : > { %4007 = vmatpush3.bf16.msra.mxu0 %v1595_v5 }
 0xd2d   : > { %4012 = vmatprep.subr.bf16.mxu0 %v4293_v9  ;;  %4023 = vmatpush3.bf16.msra.mxu1 %v4296_v35 }
 0xd2e   : > { %4024 = vmatprep.subr.bf16.mxu1 %v4297_v60 }
 0xd2f   : > { %4009 = vmatmul.mubr.msk.bf16.vlgmr.msra.gmra.mrb[24].mxu0 %vm860_vm4, %v1582_v8 }
 0xd30   : > { %4013 = vmatpush3.bf16.msra.mxu0 %v4293_v9 }
 0xd31   : > { %4025 = vmatpush3.bf16.msra.mxu1 %v4297_v60 }
 0xdfa   : > { %v3994_v12 = vpop.f32.mrb[20].mxu0 }
 0xdfb   : > { %v1479_v13 = vadd.f32 %v3994_v12, %v4982_v39  ;;  %v1463_v14 = vpop.f32.mrb[21].mxu0  ;;  %v3673_v12 = vld [vmem:[#allocation2 + $0x6] ss:$0 sm:$0xff] }
 0xdfc   : > { %v1477_v15 = vadd.f32 %v1463_v14, %v4984_v41  ;;  %v3995_v16 = vpop.f32.mrb[22].mxu0 }
 0xdfd   : > { %v1466_v17 = vpop.f32.mrb[23].mxu0 }
 0xdfe   : > { %v1478_v21 = vadd.f32 %v1466_v17, %v4986_v44  ;;  %v3674_v17 = vld [vmem:[#allocation2 + $0x7] ss:$0 sm:$0xff] }
 0xe02   : > { %v4010_v23 = vpop.f32.mrb[24].mxu0 }
 0xe03   : > { %v1631_v22 = vpop.f32.mrb[25].mxu0  ;;  %v1646_v28 = vpack.c.bf16 %v4010_v23, %v4010_v23 }
 0xe04   : > { %v4011_v24 = vpop.f32.mrb[26].mxu0 }
 0xe05   : > { %v1634_v26 = vpop.f32.mrb[27].mxu0 }
 0xe06   : > { %v1645_v27 = vpack.c.bf16 %v1634_v26, %v1631_v22 }
 0xe08   : > { %4014 = vmatprep.mubr.msk.bf16.mxu0 %vm799_vm2, %v1645_v27 }
 0xe09   : > { %4015 = vmatmul.mubr.msk.bf16.vlgmr.msra.gmra.mrb[28].mxu0 %vm799_vm2, %v1646_v28 }
 0xedc   : > { %v4016_v29 = vpop.f32.mrb[28].mxu0 }
 0xedd   : > { %v1709_v30 = vadd.f32 %v4016_v29, %v1479_v13  ;;  %v1693_v39 = vpop.f32.mrb[29].mxu0 }
 0xede   : > { %v1707_v31 = vadd.f32 %v1693_v39, %v1477_v15  ;;  %v4017_v32 = vpop.f32.mrb[30].mxu0  ;;  %v4298_v39 = vld [vmem:[%s5450_s7] sm:$0xff]  }
 0xedf   : > { %v1696_v41 = vpop.f32.mrb[31].mxu0  ;;  %v1712_v38 = vadd.f32 %v1709_v30, %v4817_v11  ;;  %4030 = vmatprep.subr.bf16.mxu0 %v4298_v39  ;;  %v4300_v32 = vld [vmem:[%s5450_s7 + $0x10] sm:$0xff]  }
 0xee0   : > { %v1710_v37 = vadd.f32 %v1707_v31, %v4809_v2  ;;  %v1708_v44 = vadd.f32 %v1696_v41, %v1478_v21  ;;  %4031 = vmatpush3.bf16.msra.mxu0 %v4298_v39  ;;  %v4299_v31 = vld [vmem:[%s5450_s7 + $0x8] sm:$0xff]   ;;  %v4301_v41 = vld [vmem:[%s5450_s7 + $0x18] sm:$0xff]  }
 0xee1   : > { %v5048_v46 = vadd.f32 %v1720_v36, %v1712_v38  ;;  %4032 = vmatprep.subr.bf16.mxu0 %v4299_v31  ;;  %v4305_v38 = vld [vmem:[%s5450_s7 + $0x38] sm:$0xff]  }
 0xee2   : > { %v1711_v40 = vadd.f32 %v1708_v44, %v4813_v7  ;;  %v5042_v42 = vadd.f32 %v1720_v36, %v1710_v37  ;;  %v4303_v37 = vld [vmem:[%s5450_s7 + $0x28] sm:$0xff]   ;;  %v4304_v44 = vld [vmem:[%s5450_s7 + $0x30] sm:$0xff]  }
 0xee3   : > { %v1733_v2 = vsel %vm553_vm1, %v5048_v46, 0.0 }
 0xee4   : > { %v5044_v43 = vadd.f32 %v1720_v36, %v1711_v40  ;;  %v1727_v45 = vsel %vm490_vm0, %v5042_v42, 0.0  ;;  %4033 = vmatpush3.bf16.msra.mxu0 %v4299_v31  ;;  %v4302_v36 = vld [vmem:[%s5450_s7 + $0x20] sm:$0xff]  }
 0xee5   : > { %1728 = vadd.xlane.f32.xlu1 %v1727_v45  ;;  %4034 = vmatprep.subr.bf16.mxu0 %v4300_v32  ;;  %v3675_v40 = vld [vmem:[%s5451_s8 + $0x4] ss:$0 sm:$0xff] }
 0xee6   : > { %v1730_v47 = vsel %vm490_vm0, %v5044_v43, 0.0 }
 0xee7   : > { %1731 = vadd.xlane.f32.xlu0 %v1730_v47 }
 0xee8   : > { %4035 = vmatpush3.bf16.msra.mxu0 %v4300_v32 }
 0xee9   : > { %4036 = vmatprep.subr.bf16.mxu0 %v4301_v41 }
 0xeeb   : > { %1734 = vadd.xlane.f32.xlu0 %v1733_v2 }
 0xeec   : > { %4037 = vmatpush3.bf16.msra.mxu0 %v4301_v41 }
 0xeed   : > { %4038 = vmatprep.subr.bf16.mxu0 %v4302_v36 }
 0xef0   : > { %4039 = vmatpush3.bf16.msra.mxu0 %v4302_v36 }
 0xef1   : > { %4040 = vmatprep.subr.bf16.mxu0 %v4303_v37 }
 0xef4   : > { %4041 = vmatpush3.bf16.msra.mxu0 %v4303_v37 }
 0xef5   : > { %4042 = vmatprep.subr.bf16.mxu0 %v4304_v44 }
 0xef8   : > { %4043 = vmatpush3.bf16.msra.mxu0 %v4304_v44  ;;  %v4308_v44 = vld [vmem:[%s5447_s4 + $0x44] ss:$8 sps:$4 sm:$0xff]  }
 0xef9   : > { %4044 = vmatprep.subr.bf16.mxu0 %v4305_v38  ;;  %2144 = vmatprep.subr.bf16.mxu1 %v4308_v44 }
 0xefc   : > { %4045 = vmatpush3.bf16.msra.mxu0 %v4305_v38  ;;  %v4306_v38 = vld [vmem:[%s5447_s4 + $0x40] ss:$8 sps:$4 sm:$0xff]  }
 0xf72   : > { %v1729_v11 = vpop.xlane.xlu1 %1728 }
 0xf73   : > { %v1736_v7 = vmul.f32 0.015625, %v1729_v11 }
 0xf74   : > { %v1732_v48 = vpop.xlane.xlu0 %1731 }
 0xf75   : > { %v1739_v49 = vsub.f32 %v5042_v42, %v1736_v7  ;;  %v1737_v50 = vmul.f32 0.015625, %v1732_v48 }
 0xf77   : > { %v1740_v51 = vsub.f32 %v5044_v43, %v1737_v50  ;;  %v1742_v52 = vmul.f32 %v1739_v49, %v1739_v49 }
 0xf78   : > { %v1735_v53 = vpop.xlane.xlu0 %1734 }
 0xf79   : > { %v1738_v54 = vmul.f32 0.015625, %v1735_v53  ;;  %v1745_v55 = vsel %vm490_vm0, %v1742_v52, 0.0  ;;  %v1743_v56 = vmul.f32 %v1740_v51, %v1740_v51 }
 0xf7a   : > { %1746 = vadd.xlane.f32.xlu0 %v1745_v55 }
 0xf7b   : > { %v1741_v57 = vsub.f32 %v5048_v46, %v1738_v54  ;;  %v1748_v58 = vsel %vm490_vm0, %v1743_v56, 0.0 }
 0xf7c   : > { %1749 = vadd.xlane.f32.xlu1 %v1748_v58 }
 0xf7d   : > { %v1744_v18 = vmul.f32 %v1741_v57, %v1741_v57 }
 0xf7f   : > { %v1751_v20 = vsel %vm553_vm1, %v1744_v18, 0.0 }
 0xf80   : > { %1752 = vadd.xlane.f32.xlu0 %v1751_v20 }
0x1007   : > { %v1747_v19 = vpop.xlane.xlu0 %1746 }
0x1008   : > { %v1754_v61 = vmul.f32 0.015625, %v1747_v19 }
0x1009   : > { %v1750_v1 = vpop.xlane.xlu1 %1749 }
0x100a   : > { %v1757_v33 = vadd.f32 1e-05, %v1754_v61  ;;  %v1755_v4 = vmul.f32 0.015625, %v1750_v1 }
0x100c   : > { %4398 = vrsqrt.f32 %v1757_v33  ;;  %v1758_v5 = vadd.f32 1e-05, %v1755_v4 }
0x100d   : > { %v1753_v6 = vpop.xlane.xlu0 %1752 }
0x100e   : > { %4400 = vrsqrt.f32 %v1758_v5  ;;  %v1756_v8 = vmul.f32 0.015625, %v1753_v6  ;;  %v3685_v5 = vld [vmem:[%s5451_s8 + $0x6] ss:$0 sm:$0xff] }
0x1010   : > { %v1759_v9 = vadd.f32 1e-05, %v1756_v8 }
0x1012   : > { %4402 = vrsqrt.f32 %v1759_v9 }
0x1016   : > { %v4399_v10 = vpop.eup %4398 }
0x1017   : > { %v1763_v13 = vmul.f32 %v4399_v10, %v1739_v49 }
0x1018   : > { %v4401_v14 = vpop.eup %4400 }
0x1019   : > { %v1764_v15 = vmul.f32 %v4401_v14, %v1740_v51  ;;  %v1770_v16 = vmul.f32 %v3673_v12, %v1763_v13 }
0x101b   : > { %v1771_v21 = vmul.f32 %v3673_v12, %v1764_v15  ;;  %v1777_v24 = vadd.f32 %v3674_v17, %v1770_v16 }
0x101c   : > { %v4403_v23 = vpop.eup %4402 }
0x101d   : > { %v1765_v22 = vmul.f32 %v4403_v23, %v1741_v57  ;;  %v1778_v26 = vadd.f32 %v3674_v17, %v1771_v21 }
0x101f   : > { %v1780_v27 = vpack.c.bf16 %v1778_v26, %v1777_v24  ;;  %v1772_v28 = vmul.f32 %v3673_v12, %v1765_v22 }
0x1021   : > { %4026 = vmatprep.mubr.msk.bf16.mxu1 %vm490_vm0, %v1780_v27  ;;  %v1779_v29 = vadd.f32 %v3674_v17, %v1772_v28 }
0x1023   : > { %v1781_v30 = vpack.c.bf16 %v1779_v29, %v1779_v29 }
0x1025   : > { %4027 = vmatmul.mubr.msk.bf16.vlgmr.msra.gmra.mrb[32].mxu1 %vm490_vm0, %v1781_v30 }
0x1026   : > { %2176 = vmatprep.mubr.bf16.mxu1 %v4589_v0  ;;  %2145 = vmatpush1.bf16.msra.mxu1 %v4306_v38 }
0x10f8   : > { %v4028_v45 = vpop.f32.mrb[32].mxu1 }
0x10f9   : > { %v1868_v47 = vadd.f32 %v4028_v45, %v3675_v40  ;;  %v1859_v2 = vpop.f32.mrb[33].mxu1  ;;  %v4309_v45 = vld [vmem:[%s5447_s4 + $0x50] ss:$8 sps:$4 sm:$0xff]  }
0x10fa   : > { %v1860_v11 = vadd.f32 %v3675_v40, %v1859_v2  ;;  %v4029_v7 = vpop.f32.mrb[34].mxu1  ;;  %v4312_v2 = vld [vmem:[%s5447_s4 + $0x60] ss:$8 sps:$4 sm:$0xff]  }
0x10fb   : > { %v3684_v48 = vmul.f32 -1.702, %v1868_v47  ;;  %v1862_v49 = vpop.f32.mrb[35].mxu1  ;;  %v4317_v7 = vld [vmem:[%s5447_s4 + $0x74] ss:$8 sps:$4 sm:$0xff]  }
0x10fc   : > { %v3682_v50 = vmul.f32 -1.702, %v1860_v11  ;;  %v1863_v51 = vadd.f32 %v3675_v40, %v1862_v49  ;;  %v4311_v40 = vld [vmem:[%s5447_s4 + $0x54] ss:$8 sps:$4 sm:$0xff]  }
0x10fd   : > { %v1883_v52 = vmul.f32 1.442695, %v3684_v48  ;;  %2146 = vmatprep.subr.bf16.mxu1 %v4311_v40 }
0x10fe   : > { %v1879_v53 = vmul.f32 1.442695, %v3682_v50  ;;  %v3683_v54 = vmul.f32 -1.702, %v1863_v51  ;;  %2147 = vmatpush1.bf16.msra.mxu1 %v4309_v45 }
0x10ff   : > { %4404 = vpow2.f32 %v1883_v52 }
0x1100   : > { %4406 = vpow2.f32 %v1879_v53  ;;  %v1881_v55 = vmul.f32 1.442695, %v3683_v54 }
0x1102   : > { %4408 = vpow2.f32 %v1881_v55 }
0x1109   : > { %v4405_v56 = vpop.eup %4404 }
0x110a   : > { %v4407_v57 = vpop.eup %4406  ;;  %v1887_v58 = vadd.f32 1.0, %v4405_v56 }
0x110b   : > { %v1885_v18 = vadd.f32 1.0, %v4407_v57 }
0x110c   : > { %v4409_v20 = vpop.eup %4408  ;;  %4410 = vrcp.f32 %v1887_v58  ;;  %v3694_v58 = vld [vmem:[#allocation2 + $0x8] ss:$0 sm:$0xff] }
0x110d   : > { %4412 = vrcp.f32 %v1885_v18  ;;  %v1886_v25 = vadd.f32 1.0, %v4409_v20 }
0x110f   : > { %4414 = vrcp.f32 %v1886_v25 }
0x1116   : > { %v4411_v59 = vpop.eup %4410 }
0x1117   : > { %v4413_v35 = vpop.eup %4412  ;;  %v1896_v19 = vmul.f32 %v4411_v59, %v1868_v47  ;;  %v4314_v47 = vld [vmem:[%s5447_s4 + $0x64] ss:$8 sps:$4 sm:$0xff]  }
0x1118   : > { %v1894_v61 = vmul.f32 %v4413_v35, %v1860_v11  ;;  %2148 = vmatprep.subr.bf16.mxu1 %v4314_v47  ;;  %v4315_v11 = vld [vmem:[%s5447_s4 + $0x70] ss:$8 sps:$4 sm:$0xff]  }
0x1119   : > { %v4415_v60 = vpop.eup %4414  ;;  %v1898_v4 = vpack.c.bf16 %v1896_v19, %v1896_v19  ;;  %2149 = vmatpush1.bf16.msra.mxu1 %v4312_v2 }
0x111a   : > { %v1895_v1 = vmul.f32 %v4415_v60, %v1863_v51  ;;  %2150 = vmatprep.subr.bf16.mxu1 %v4317_v7  ;;  %v3695_v60 = vld [vmem:[#allocation2 + $0x9] ss:$0 sm:$0xff] }
0x111c   : > { %v1897_v33 = vpack.c.bf16 %v1895_v1, %v1894_v61 }
0x111d   : > { %2151 = vmatpush1.bf16.msra.mxu1 %v4315_v11 }
0x111e   : > { %4046 = vmatprep.mubr.bf16.mxu0 %v1897_v33 }
0x111f   : > { %4047 = vmatmul.mubr.bf16.vlgmr.msra.gmra.mrb[32].mxu0 %v1898_v4 }
0x11f2   : > { %v4048_v6 = vpop.f32.mrb[32].mxu0 }
0x11f3   : > { %v2002_v8 = vpop.f32.mrb[33].mxu0  ;;  %v2011_v9 = vadd.f32 %v4048_v6, %v3685_v5 }
0x11f4   : > { %v2003_v10 = vadd.f32 %v3685_v5, %v2002_v8  ;;  %v4049_v12 = vpop.f32.mrb[34].mxu0 }
0x11f5   : > { %v2005_v13 = vpop.f32.mrb[35].mxu0  ;;  %v5109_v16 = vadd.f32 %v2011_v9, %v5048_v46  ;;  %v3704_v9 = vld [vmem:[%s5451_s8 + $0x1] ss:$2 sm:$0x3] }
0x11f6   : > { %v5106_v14 = vadd.f32 %v2003_v10, %v5042_v42  ;;  %v2006_v15 = vadd.f32 %v3685_v5, %v2005_v13  ;;  %v2091_v10 = vrot.slane %v3704_v9, %v671_v63  ;;  %v2095_v13 = vrot.slane %v3704_v9, %v675_v3 }
0x11f7   : > { %v2027_v22 = vsel %vm553_vm1, %v5109_v16, 0.0 }
0x11f8   : > { %v5112_v17 = vadd.f32 %v2006_v15, %v5044_v43  ;;  %v2021_v21 = vsel %vm490_vm0, %v5106_v14, 0.0 }
0x11f9   : > { %2022 = vadd.xlane.f32.xlu1 %v2021_v21 }
0x11fa   : > { %v2024_v23 = vsel %vm490_vm0, %v5112_v17, 0.0 }
0x11fb   : > { %2025 = vadd.xlane.f32.xlu0 %v2024_v23 }
0x11fd   : > { %2028 = vadd.xlane.f32.xlu1 %v2027_v22 }
0x1286   : > { %v2023_v42 = vpop.xlane.xlu1 %2022 }
0x1287   : > { %v2030_v24 = vmul.f32 0.015625, %v2023_v42 }
0x1288   : > { %v2026_v26 = vpop.xlane.xlu0 %2025 }
0x1289   : > { %v2033_v46 = vsub.f32 %v5106_v14, %v2030_v24  ;;  %v2031_v27 = vmul.f32 0.015625, %v2026_v26 }
0x128a   : > { %v2029_v43 = vpop.xlane.xlu1 %2028 }
0x128b   : > { %v2034_v28 = vsub.f32 %v5112_v17, %v2031_v27  ;;  %v2032_v29 = vmul.f32 0.015625, %v2029_v43  ;;  %v2036_v30 = vmul.f32 %v2033_v46, %v2033_v46 }
0x128d   : > { %v2035_v39 = vsub.f32 %v5109_v16, %v2032_v29  ;;  %v2039_v31 = vsel %vm490_vm0, %v2036_v30, 0.0  ;;  %v2037_v32 = vmul.f32 %v2034_v28, %v2034_v28 }
0x128e   : > { %2040 = vadd.xlane.f32.xlu0 %v2039_v31 }
0x128f   : > { %v2042_v41 = vsel %vm490_vm0, %v2037_v32, 0.0  ;;  %v2038_v36 = vmul.f32 %v2035_v39, %v2035_v39 }
0x1290   : > { %2043 = vadd.xlane.f32.xlu1 %v2042_v41 }
0x1291   : > { %v2045_v37 = vsel %vm553_vm1, %v2038_v36, 0.0 }
0x1292   : > { %2046 = vadd.xlane.f32.xlu0 %v2045_v37 }
0x131b   : > { %v2041_v48 = vpop.xlane.xlu0 %2040 }
0x131c   : > { %v2048_v49 = vmul.f32 0.015625, %v2041_v48 }
0x131d   : > { %v2044_v50 = vpop.xlane.xlu1 %2043 }
0x131e   : > { %v2051_v51 = vadd.f32 1e-05, %v2048_v49  ;;  %v2049_v52 = vmul.f32 0.015625, %v2044_v50 }
0x131f   : > { %v2047_v53 = vpop.xlane.xlu0 %2046 }
0x1320   : > { %4416 = vrsqrt.f32 %v2051_v51  ;;  %v2052_v54 = vadd.f32 1e-05, %v2049_v52  ;;  %v2050_v55 = vmul.f32 0.015625, %v2047_v53 }
0x1322   : > { %4418 = vrsqrt.f32 %v2052_v54  ;;  %v2053_v56 = vadd.f32 1e-05, %v2050_v55 }
0x1324   : > { %4420 = vrsqrt.f32 %v2053_v56 }
0x132a   : > { %v4417_v57 = vpop.eup %4416 }
0x132b   : > { %v2057_v18 = vmul.f32 %v4417_v57, %v2033_v46 }
0x132c   : > { %v4419_v20 = vpop.eup %4418 }
0x132d   : > { %v2064_v25 = vmul.f32 %v3694_v58, %v2057_v18  ;;  %v2058_v59 = vmul.f32 %v4419_v20, %v2034_v28 }
0x132e   : > { %v4421_v35 = vpop.eup %4420 }
0x132f   : > { %v2065_v19 = vmul.f32 %v3694_v58, %v2058_v59  ;;  %v2059_v61 = vmul.f32 %v4421_v35, %v2035_v39  ;;  %v2071_v1 = vadd.f32 %v3695_v60, %v2064_v25 }
0x1331   : > { %v2072_v33 = vadd.f32 %v3695_v60, %v2065_v19  ;;  %v2066_v5 = vmul.f32 %v3694_v58, %v2059_v61 }
0x1333   : > { %v2074_v4 = vpack.c.bf16 %v2072_v33, %v2071_v1  ;;  %v2073_v6 = vadd.f32 %v3695_v60, %v2066_v5 }
0x1335   : > { %3713 = vmatmul.mubr.msk.bf16.vlgmr.msra.gmra.mrb[36].mxu1 %vm490_vm0, %v2074_v4  ;;  %v2075_v8 = vpack.c.bf16 %v2073_v6, %v2073_v6 }
0x1336   : > { %2186 = vmatprep.mubr.bf16.mxu1 %v4589_v0 }
0x133d   : > { %3714 = vmatmul.mubr.msk.bf16.gmra.mrb[40].mxu1 %vm490_vm0, %v2075_v8 }
0x1408   : > { %v2178_v12 = vpop.f32.mrb[36].mxu1 }
0x1409   : > { %v2179_v15 = vadd.f32 %v2178_v12, %v2091_v10  ;;  %v2180_v21 = vpop.f32.mrb[37].mxu1 }
0x140a   : > { %v2182_v23 = vpop.f32.mrb[38].mxu1  ;;  %v2181_v42 = vadd.f32 %v2180_v21, %v2095_v13 }
0x140b   : > { %v2183_v22 = vadd.f32 %v2182_v23, %v2091_v10  ;;  %v2184_v0 = vpop.f32.mrb[39].mxu1  ;;  %v2195_v26 = vmul.f32 0.25, %v2179_v15 }
0x140c   : > { %v2185_v24 = vadd.f32 %v2184_v0, %v2095_v13 }
0x140d   : > { %v2196_v46 = vmul.f32 0.25, %v2183_v22  ;;  %v5160_v27 = vpack.c.bf16 %v2183_v22, %v2179_v15 }
0x140e   : > { %v5162_v43 = vpack.c.bf16 %v2185_v24, %v2181_v42  ;;  %v4318_v24 = vld [vmem:[%s5448_s5 + $0x20] sm:$0xff]  }
0x140f   : > { %v5164_v28 = vpack.c.bf16 %v2196_v46, %v2195_v26  ;;  %2215 = vrot.lane.b32.xlu1 %v5160_v27, %s4590_s18 }
0x1410   : > { %v2188_v62 = vpop.f32.mrb[40].mxu1  ;;  %4058 = vmatprep.subr.bf16.mxu0 %v5162_v43 }
0x1411   : > { %v2189_v63 = vadd.f32 %v2188_v62, %v2091_v10  ;;  %v2190_v3 = vpop.f32.mrb[41].mxu1  ;;  %4054 = vmatprep.mubr.msk.bf16.mxu1 %vm799_vm2, %v5164_v28  ;;  %4059 = vmatpush3.bf16.msra.mxu0 %v5162_v43 }
0x1412   : > { %v2191_v29 = vadd.f32 %v2190_v3, %v2095_v13  ;;  %v2192_v30 = vpop.f32.mrb[42].mxu1 }
0x1413   : > { %v5172_v39 = vpack.c.bf16 %v2189_v63, %v2189_v63  ;;  %v2193_v31 = vpop.f32.mrb[43].mxu1  ;;  %v2197_v40 = vmul.f32 0.25, %v2189_v63 }
0x1414   : > { %v5174_v32 = vpack.c.bf16 %v2191_v29, %v2191_v29 }
0x1415   : > { %2217 = vrot.lane.b32.xlu0 %v5172_v39, %s4590_s18  ;;  %v5184_v45 = vpack.c.bf16 %v2197_v40, %v2197_v40 }
0x1416   : > { %v2321_v41 = vand.u32 %v5174_v32, %v4887_v34 }
0x1418   : > { %4060 = vmatprep.subr.bf16.mxu0 %v2321_v41 }
0x1419   : > { %4061 = vmatpush3.bf16.msra.mxu0 %v2321_v41 }
0x1481   : > { %v2216_v36 = vpop.permute.xlu1 %2215 }
0x1482   : > { %v2226_v37 = vsel %vm799_vm2, %v2216_v36, 0  ;;  %4190 = vmatprep.subr.msk.bf16.mxu1 %vm799_vm2, %v2216_v36 }
0x1483   : > { %4051 = vmatpush3.bf16.xpose.msra.mxu1 %v2226_v37 }
0x1487   : > { %v2218_v44 = vpop.permute.xlu0 %2217 }
0x1488   : > { %4191 = vmatprep.subr.msk.bf16.mxu1 %vm799_vm2, %v2218_v44  ;;  %v2229_v38 = vsel %vm799_vm2, %v2218_v44, 0 }
0x148b   : > { %4053 = vmatpush3.bf16.xpose.msra.mxu1 %v2229_v38 }
0x1492   : > { %4055 = vmatmul.mubr.msk.bf16.vlgmr.msra.gmra.mrb[44].mxu1 %vm799_vm2, %v5184_v45 }
0x1565   : > { %v4056_v47 = vpop.f32.mrb[44].mxu1 }
0x1566   : > { %v2265_v2 = vpop.f32.mrb[45].mxu1  ;;  %v2285_v50 = vsel %vm867_vm5, %v4056_v47, -inf }
0x1567   : > { %v4057_v11 = vpop.f32.mrb[46].mxu1  ;;  %v2279_v7 = vsel %vm860_vm4, %v2265_v2, -inf }
0x1568   : > { %2280 = vmax.xlane.f32.xlu1 %v2279_v7  ;;  %v2268_v48 = vpop.f32.mrb[47].mxu1 }
0x1569   : > { %v2282_v49 = vsel %vm860_vm4, %v2268_v48, -inf }
0x156a   : > { %2283 = vmax.xlane.f32.xlu0 %v2282_v49 }
0x156c   : > { %2286 = vmax.xlane.f32.xlu1 %v2285_v50 }
0x15f5   : > { %v2281_v51 = vpop.xlane.xlu1 %2280 }
0x15f6   : > { %v2288_v52 = vsub.f32 %v2265_v2, %v2281_v51 }
0x15f7   : > { %v2284_v53 = vpop.xlane.xlu0 %2283 }
0x15f8   : > { %v2291_v54 = vmul.f32 1.442695, %v2288_v52  ;;  %v2289_v55 = vsub.f32 %v2268_v48, %v2284_v53 }
0x15f9   : > { %v2287_v56 = vpop.xlane.xlu1 %2286 }
0x15fa   : > { %4422 = vpow2.f32 %v2291_v54  ;;  %v2293_v57 = vmul.f32 1.442695, %v2289_v55  ;;  %v2290_v58 = vsub.f32 %v4056_v47, %v2287_v56 }
0x15fc   : > { %4424 = vpow2.f32 %v2293_v57  ;;  %v2295_v18 = vmul.f32 1.442695, %v2290_v58 }
0x15fe   : > { %4426 = vpow2.f32 %v2295_v18 }
0x1604   : > { %v4423_v20 = vpop.eup %4422 }
0x1605   : > { %v2297_v25 = vsel %vm860_vm4, %v4423_v20, 0.0 }
0x1606   : > { %v4425_v59 = vpop.eup %4424  ;;  %2298 = vadd.xlane.f32.xlu0 %v2297_v25 }
0x1607   : > { %v2300_v35 = vsel %vm860_vm4, %v4425_v59, 0.0 }
0x1608   : > { %v4427_v60 = vpop.eup %4426  ;;  %2301 = vadd.xlane.f32.xlu1 %v2300_v35 }
0x1609   : > { %v2303_v19 = vsel %vm867_vm5, %v4427_v60, 0.0 }
0x160a   : > { %2304 = vadd.xlane.f32.xlu0 %v2303_v19  ;;  %v4319_v19 = vld [vmem:[%s5448_s5 + $0x28] sm:$0xff]  }
0x1619   : > { %2379 = vrot.lane.b32.xlu1 %v5160_v27, %s5476_s26 }
0x161d   : > { %2375 = vrot.lane.b32.xlu1 %v5164_v28, %s5477_s29 }
0x1620   : > { %2381 = vrot.lane.b32.xlu0 %v5172_v39, %s5476_s26  ;;  %s3538_s26 = sshll.u32 %s366_s11, 4  ;;  %s5398_s26 = int_to_ptr.vmem [resolvable:$true] %s3538_s26 }
0x1621   : > { %2377 = vrot.lane.b32.xlu1 %v5184_v45, %s5477_s29 }
0x1693   : > { %v2299_v61 = vpop.xlane.xlu0 %2298 }
0x1694   : > { %4428 = vrcp.f32 %v2299_v61 }
0x1695   : > { %v2302_v1 = vpop.xlane.xlu1 %2301 }
0x1696   : > { %4430 = vrcp.f32 %v2302_v1 }
0x1697   : > { %v2305_v33 = vpop.xlane.xlu0 %2304 }
0x1698   : > { %4432 = vrcp.f32 %v2305_v33 }
0x1699   : > { %v2380_v4 = vpop.permute.xlu1 %2379 }
0x169a   : > { %4192 = vmatprep.subr.msk.bf16.mxu0 %vm799_vm2, %v2380_v4  ;;  %v2390_v21 = vsel %vm799_vm2, %v2380_v4, 0 }
0x169b   : > { %v2382_v22 = vpop.permute.xlu0 %2381 }
0x169c   : > { %v2393_v0 = vsel %vm799_vm2, %v2382_v22, 0 }
0x169d   : > { %v2376_v23 = vpop.permute.xlu1 %2375 }
0x169e   : > { %v4429_v5 = vpop.eup %4428 }
0x169f   : > { %v2309_v8 = vmul.f32 %v4429_v5, %v4423_v20 }
0x16a0   : > { %v4431_v6 = vpop.eup %4430 }
0x16a1   : > { %v2310_v9 = vmul.f32 %v4431_v6, %v4425_v59  ;;  %v2378_v42 = vpop.permute.xlu1 %2377 }
0x16a2   : > { %v4433_v10 = vpop.eup %4432 }
0x16a3   : > { %v2311_v12 = vmul.f32 %v4433_v10, %v4427_v60  ;;  %v2312_v13 = vpack.c.bf16 %v2310_v9, %v2309_v8 }
0x16a5   : > { %4062 = vmatprep.mubr.msk.bf16.mxu0 %vm860_vm4, %v2312_v13  ;;  %v2313_v15 = vpack.c.bf16 %v2311_v12, %v2311_v12 }
0x16a7   : > { %4063 = vmatmul.mubr.msk.bf16.vlgmr.msra.gmra.mrb[36].mxu0 %vm860_vm4, %v2313_v15 }
0x16a8   : > { %4067 = vmatpush3.bf16.xpose.msra.mxu0 %v2390_v21  ;;  %4070 = vmatprep.mubr.msk.bf16.mxu0 %vm799_vm2, %v2376_v23 }
0x16a9   : > { %4193 = vmatprep.subr.msk.bf16.mxu0 %vm799_vm2, %v2382_v22 }
0x16b0   : > { %4069 = vmatpush3.bf16.xpose.msra.mxu0 %v2393_v0 }
0x16b1   : > { %4088 = vmatprep.subr.bf16.mxu0 %v4318_v24 }
0x16b7   : > { %4071 = vmatmul.mubr.msk.bf16.vlgmr.msra.gmra.mrb[40].mxu0 %vm799_vm2, %v2378_v42 }
0x16b8   : > { %4089 = vmatpush3.bf16.msra.mxu0 %v4318_v24 }
0x177a   : > { %v4064_v26 = vpop.f32.mrb[36].mxu0 }
0x177b   : > { %v2357_v46 = vpop.f32.mrb[37].mxu0  ;;  %v2372_v29 = vpack.c.bf16 %v4064_v26, %v4064_v26 }
0x177c   : > { %v4065_v62 = vpop.f32.mrb[38].mxu0 }
0x177d   : > { %v2360_v63 = vpop.f32.mrb[39].mxu0 }
0x177e   : > { %v2371_v3 = vpack.c.bf16 %v2360_v63, %v2357_v46 }
0x1780   : > { %4090 = vmatprep.mubr.msk.bf16.mxu0 %vm799_vm2, %v2371_v3 }
0x1781   : > { %4091 = vmatmul.mubr.msk.bf16.vlgmr.msra.gmra.mrb[44].mxu0 %vm799_vm2, %v2372_v29 }
0x178a   : > { %v4072_v30 = vpop.f32.mrb[40].mxu0 }
0x178b   : > { %v2429_v31 = vpop.f32.mrb[41].mxu0  ;;  %v2449_v38 = vsel %vm867_vm5, %v4072_v30, -inf }
0x178c   : > { %v4073_v41 = vpop.f32.mrb[42].mxu0  ;;  %v2443_v36 = vsel %vm860_vm4, %v2429_v31, -inf }
0x178d   : > { %2444 = vmax.xlane.f32.xlu1 %v2443_v36  ;;  %v2432_v37 = vpop.f32.mrb[43].mxu0 }
0x178e   : > { %v2446_v44 = vsel %vm860_vm4, %v2432_v37, -inf }
0x178f   : > { %2447 = vmax.xlane.f32.xlu0 %v2446_v44 }
0x1793   : > { %2450 = vmax.xlane.f32.xlu0 %v2449_v38 }
0x181a   : > { %v2445_v40 = vpop.xlane.xlu1 %2444 }
0x181b   : > { %v2452_v11 = vsub.f32 %v2429_v31, %v2445_v40 }
0x181c   : > { %v2448_v47 = vpop.xlane.xlu0 %2447 }
0x181d   : > { %v2453_v2 = vsub.f32 %v2432_v37, %v2448_v47  ;;  %v2455_v50 = vmul.f32 1.442695, %v2452_v11 }
0x181f   : > { %v2457_v7 = vmul.f32 1.442695, %v2453_v2 }
0x1820   : > { %v2451_v48 = vpop.xlane.xlu0 %2450 }
0x1821   : > { %4434 = vpow2.f32 %v2457_v7  ;;  %v2454_v49 = vsub.f32 %v4072_v30, %v2451_v48 }
0x1823   : > { %v2459_v51 = vmul.f32 1.442695, %v2454_v49 }
0x1825   : > { %4436 = vpow2.f32 %v2459_v51 }
0x1826   : > { %4438 = vpow2.f32 %v2455_v50 }
0x182b   : > { %v4435_v52 = vpop.eup %4434 }
0x182c   : > { %v2464_v53 = vsel %vm860_vm4, %v4435_v52, 0.0 }
0x182d   : > { %2465 = vadd.xlane.f32.xlu1 %v2464_v53 }
0x182f   : > { %v4437_v54 = vpop.eup %4436 }
0x1830   : > { %v2467_v55 = vsel %vm867_vm5, %v4437_v54, 0.0  ;;  %v4439_v56 = vpop.eup %4438 }
0x1831   : > { %2468 = vadd.xlane.f32.xlu0 %v2467_v55  ;;  %v2461_v57 = vsel %vm860_vm4, %v4439_v56, 0.0 }
0x1835   : > { %2462 = vadd.xlane.f32.xlu0 %v2461_v57 }
0x183e   : > { %2480 = vrot.lane.b32.xlu1 %v5162_v43, %s5477_s29 }
0x1842   : > { %2668 = vrot.lane.b32.xlu1 %v5160_v27, %s5478_s25 }
0x1846   : > { %2670 = vrot.lane.b32.xlu1 %v5172_v39, %s5478_s25 }
0x184a   : > { %2664 = vrot.lane.b32.xlu1 %v5164_v28, %s5479_s27 }
0x184b   : > { %2482 = vrot.lane.b32.xlu0 %v5174_v32, %s5477_s29  ;;  %s3802_s29 = sshll.u32 %s4676_s17, 4  ;;  %s4599_s17 = smov [#allocation5]  }
0x184c   : > { %s5403_s25 = scalar_lea.hbm %s5453_s10, %s3802_s29 }
0x184e   : > { %2898 = vrot.lane.b32.xlu1 %v5160_v27, %s5480_s20 }
0x184f   : > { %2666 = vrot.lane.b32.xlu0 %v5184_v45, %s5479_s27 }
0x1852   : > { %2894 = vrot.lane.b32.xlu1 %v5164_v28, %s5481_s21 }
0x1853   : > { %2900 = vrot.lane.b32.xlu0 %v5172_v39, %s5480_s20  ;;  %s4522_s20 = sshll.u32 %s4599_s17, 4  ;;  %s4523_s20 = int_to_ptr.vmem [resolvable:$false] %s4522_s20 }
0x1854   : > { %v5239_v58 = vpop.f32.mrb[44].mxu0  ;;  %p4525_p2 = scmp.lt.s32.totalorder %s5398_s26, %s4523_s20 }
0x1855   : > { %v5241_v18 = vpop.f32.mrb[45].mxu0 }
0x1856   : > { %v4093_v20 = vpop.f32.mrb[46].mxu0 }
0x1857   : > { %2896 = vrot.lane.b32.xlu0 %v5184_v45, %s5481_s21  ;;  %v5245_v25 = vpop.f32.mrb[47].mxu0 }
0x18ba   : > { %v2466_v27 = vpop.xlane.xlu1 %2465 }
0x18be   : > { %v2481_v59 = vpop.permute.xlu1 %2480  ;;  %v2469_v35 = vpop.xlane.xlu0 %2468 }
0x18bf   : > { %4074 = vmatprep.subr.bf16.mxu1 %v2481_v59  ;;  %4440 = vrcp.f32 %v2469_v35 }
0x18c0   : > { %4075 = vmatpush3.bf16.msra.mxu1 %v2481_v59  ;;  %4442 = vrcp.f32 %v2466_v27 }
0x18c2   : > { %v2463_v28 = vpop.xlane.xlu0 %2462  ;;  %v2669_v9 = vpop.permute.xlu1 %2668 }
0x18c3   : > { %4444 = vrcp.f32 %v2463_v28  ;;  %v2679_v0 = vsel %vm799_vm2, %v2669_v9, 0 }
0x18c6   : > { %v2483_v39 = vpop.permute.xlu0 %2482  ;;  %v2671_v12 = vpop.permute.xlu1 %2670 }
0x18c7   : > { %v2492_v60 = vand.u32 %v2483_v39, %v4887_v34  ;;  %v2682_v24 = vsel %vm799_vm2, %v2671_v12, 0 }
0x18c9   : > { %4076 = vmatprep.subr.bf16.mxu1 %v2492_v60  ;;  %v4441_v45 = vpop.eup %4440 }
0x18ca   : > { %4077 = vmatpush3.bf16.msra.mxu1 %v2492_v60  ;;  %v4443_v61 = vpop.eup %4442  ;;  %v2475_v33 = vmul.f32 %v4441_v45, %v4437_v54  ;;  %v2665_v42 = vpop.permute.xlu1 %2664 }
0x18cb   : > { %4082 = vmatprep.subr.bf16.mxu1 %v4319_v19  ;;  %v2474_v5 = vmul.f32 %v4443_v61, %v4435_v52  ;;  %v2667_v46 = vpop.permute.xlu0 %2666 }
0x18cc   : > { %v2477_v8 = vpack.c.bf16 %v2475_v33, %v2475_v33 }
0x18cd   : > { %v4445_v1 = vpop.eup %4444 }
0x18ce   : > { %v2473_v4 = vmul.f32 %v4445_v1, %v4439_v56  ;;  %v2899_v26 = vpop.permute.xlu1 %2898 }
0x18cf   : > { %v2909_v62 = vsel %vm799_vm2, %v2899_v26, 0  ;;  %v2901_v3 = vpop.permute.xlu0 %2900 }
0x18d0   : > { %v2476_v6 = vpack.c.bf16 %v2474_v5, %v2473_v4  ;;  %v2912_v29 = vsel %vm799_vm2, %v2901_v3, 0 }
0x18d2   : > { %4078 = vmatprep.mubr.msk.bf16.mxu1 %vm860_vm4, %v2476_v6  ;;  %v2895_v63 = vpop.permute.xlu1 %2894 }
0x18d3   : > { %4079 = vmatmul.mubr.msk.bf16.vlgmr.msra.gmra.mrb[48].mxu1 %vm860_vm4, %v2477_v8  ;;  %v2897_v30 = vpop.permute.xlu0 %2896 }
0x18d4   : > { %4083 = vmatpush3.bf16.msra.mxu1 %v4319_v19 }
0x18d5   : > { %4194 = vmatprep.subr.msk.bf16.mxu1 %vm799_vm2, %v2669_v9 }
0x19a6   : > { %v4080_v10 = vpop.f32.mrb[48].mxu1 }
0x19a7   : > { %v2528_v13 = vpop.f32.mrb[49].mxu1  ;;  %v2543_v22 = vpack.c.bf16 %v4080_v10, %v4080_v10 }
0x19a8   : > { %v4081_v15 = vpop.f32.mrb[50].mxu1 }
0x19a9   : > { %v2531_v21 = vpop.f32.mrb[51].mxu1 }
0x19aa   : > { %v2542_v23 = vpack.c.bf16 %v2531_v21, %v2528_v13 }
0x19ac   : > { %4084 = vmatprep.mubr.msk.bf16.mxu1 %vm799_vm2, %v2542_v23 }
0x19ad   : > { %4085 = vmatmul.mubr.msk.bf16.vlgmr.msra.gmra.mrb[52].mxu1 %vm799_vm2, %v2543_v22 }
0x19ae   : > { %4095 = vmatpush3.bf16.xpose.msra.mxu1 %v2679_v0  ;;  %4098 = vmatprep.mubr.msk.bf16.mxu1 %vm799_vm2, %v2665_v42 }
0x19af   : > { %4195 = vmatprep.subr.msk.bf16.mxu1 %vm799_vm2, %v2671_v12 }
0x19b6   : > { %4097 = vmatpush3.bf16.xpose.msra.mxu1 %v2682_v24 }
0x19b7   : > { %4196 = vmatprep.subr.msk.bf16.mxu1 %vm799_vm2, %v2899_v26 }
0x19bd   : > { %4099 = vmatmul.mubr.msk.bf16.vlgmr.msra.gmra.mrb[56].mxu1 %vm799_vm2, %v2667_v46 }
0x19be   : > { %4117 = vmatpush3.bf16.xpose.msra.mxu1 %v2909_v62  ;;  %4120 = vmatprep.mubr.msk.bf16.mxu1 %vm799_vm2, %v2895_v63 }
0x19bf   : > { %4197 = vmatprep.subr.msk.bf16.mxu1 %vm799_vm2, %v2901_v3 }
0x19c6   : > { %4119 = vmatpush3.bf16.xpose.msra.mxu1 %v2912_v29 }
0x19cd   : > { %4121 = vmatmul.mubr.msk.bf16.vlgmr.msra.gmra.mrb[60].mxu1 %vm799_vm2, %v2897_v30 }
0x1a80   : > { %v4086_v31 = vpop.f32.mrb[52].mxu1 }
0x1a81   : > { %v5268_v41 = vadd.f32 %v5239_v58, %v4086_v31  ;;  %v2590_v36 = vpop.f32.mrb[53].mxu1 }
0x1a82   : > { %v5271_v37 = vadd.f32 %v5241_v18, %v2590_v36  ;;  %v4087_v44 = vpop.f32.mrb[54].mxu1 }
0x1a83   : > { %v2593_v38 = vpop.f32.mrb[55].mxu1 }
0x1a84   : > { %v5274_v40 = vadd.f32 %v5245_v25, %v2593_v38 }
0x1a90   : > { %v4100_v47 = vpop.f32.mrb[56].mxu1 }
0x1a91   : > { %v2718_v2 = vpop.f32.mrb[57].mxu1  ;;  %v2738_v50 = vsel %vm867_vm5, %v4100_v47, -inf }
0x1a92   : > { %v4101_v11 = vpop.f32.mrb[58].mxu1  ;;  %v2732_v7 = vsel %vm860_vm4, %v2718_v2, -inf }
0x1a93   : > { %2733 = vmax.xlane.f32.xlu1 %v2732_v7  ;;  %v2721_v48 = vpop.f32.mrb[59].mxu1  ;;  %v4320_v7 = vld [vmem:[%s5448_s5 + $0x30] sm:$0xff]  }
0x1a94   : > { %v2735_v49 = vsel %vm860_vm4, %v2721_v48, -inf }
0x1a95   : > { %2736 = vmax.xlane.f32.xlu0 %v2735_v49 }
0x1a99   : > { %2739 = vmax.xlane.f32.xlu0 %v2738_v50 }
0x1aa0   : > { %v4122_v51 = vpop.f32.mrb[60].mxu1 }
0x1aa1   : > { %v2948_v52 = vpop.f32.mrb[61].mxu1  ;;  %v2968_v1 = vsel %vm867_vm5, %v4122_v51, -inf }
0x1aa2   : > { %v4123_v53 = vpop.f32.mrb[62].mxu1  ;;  %v2962_v61 = vsel %vm860_vm4, %v2948_v52, -inf }
0x1aa3   : > { %v5279_v54 = vpop.f32.mrb[63].mxu1 }
0x1aa4   : > { %v2965_v33 = vsel %vm860_vm4, %v5279_v54, -inf }
0x1b20   : > { %v2734_v55 = vpop.xlane.xlu1 %2733 }
0x1b21   : > { %v2741_v58 = vsub.f32 %v2718_v2, %v2734_v55 }
0x1b22   : > { %v2737_v56 = vpop.xlane.xlu0 %2736 }
0x1b23   : > { %v2742_v57 = vsub.f32 %v2721_v48, %v2737_v56  ;;  %v2744_v27 = vmul.f32 1.442695, %v2741_v58 }
0x1b25   : > { %v2746_v18 = vmul.f32 1.442695, %v2742_v57 }
0x1b26   : > { %v2740_v20 = vpop.xlane.xlu0 %2739 }
0x1b27   : > { %4446 = vpow2.f32 %v2746_v18  ;;  %v2743_v25 = vsub.f32 %v4100_v47, %v2740_v20 }
0x1b29   : > { %v2748_v59 = vmul.f32 1.442695, %v2743_v25 }
0x1b2b   : > { %4448 = vpow2.f32 %v2748_v59 }
0x1b2c   : > { %4450 = vpow2.f32 %v2744_v27 }
0x1b31   : > { %v4447_v35 = vpop.eup %4446 }
0x1b32   : > { %v2753_v28 = vsel %vm860_vm4, %v4447_v35, 0.0 }
0x1b33   : > { %2754 = vadd.xlane.f32.xlu1 %v2753_v28 }
0x1b35   : > { %v4449_v39 = vpop.eup %4448 }
0x1b36   : > { %v2756_v60 = vsel %vm867_vm5, %v4449_v39, 0.0  ;;  %v4451_v19 = vpop.eup %4450 }
0x1b37   : > { %2757 = vadd.xlane.f32.xlu0 %v2756_v60  ;;  %v2750_v45 = vsel %vm860_vm4, %v4451_v19, 0.0 }
0x1b3b   : > { %2751 = vadd.xlane.f32.xlu0 %v2750_v45 }
0x1b44   : > { %2767 = vrot.lane.b32.xlu1 %v5162_v43, %s5479_s27 }
0x1b51   : > { %2769 = vrot.lane.b32.xlu0 %v5174_v32, %s5479_s27  ;;  %s3526_s27 = scalar_lea.sflag [#allocation4], %s365_s28 }
0x1b68   : > { %2963 = vmax.xlane.f32.xlu1 %v2962_v61 }
0x1b6c   : > { %2969 = vmax.xlane.f32.xlu1 %v2968_v1 }
0x1b70   : > { %2966 = vmax.xlane.f32.xlu0 %v2965_v33 }
0x1bc0   : > { %v2755_v4 = vpop.xlane.xlu1 %2754 }
0x1bc4   : > { %v2768_v5 = vpop.permute.xlu1 %2767  ;;  %v2758_v6 = vpop.xlane.xlu0 %2757 }
0x1bc5   : > { %4102 = vmatprep.subr.bf16.mxu0 %v2768_v5  ;;  %4452 = vrcp.f32 %v2758_v6 }
0x1bc6   : > { %4103 = vmatpush3.bf16.msra.mxu0 %v2768_v5  ;;  %4454 = vrcp.f32 %v2755_v4 }
0x1bc8   : > { %v2752_v8 = vpop.xlane.xlu0 %2751 }
0x1bc9   : > { %4456 = vrcp.f32 %v2752_v8 }
0x1bcc   : > { %v2770_v9 = vpop.permute.xlu0 %2769 }
0x1bcd   : > { %v2779_v10 = vand.u32 %v2770_v9, %v4887_v34 }
0x1bcf   : > { %4104 = vmatprep.subr.bf16.mxu0 %v2779_v10  ;;  %v4453_v12 = vpop.eup %4452 }
0x1bd0   : > { %4105 = vmatpush3.bf16.msra.mxu0 %v2779_v10  ;;  %v4455_v13 = vpop.eup %4454  ;;  %v2764_v21 = vmul.f32 %v4453_v12, %v4449_v39  ;;  %v4321_v39 = vld [vmem:[%s5448_s5 + $0x38] sm:$0xff]  }
0x1bd1   : > { %v2763_v22 = vmul.f32 %v4455_v13, %v4447_v35  ;;  %4110 = vmatprep.subr.bf16.mxu0 %v4320_v7 }
0x1bd2   : > { %v2766_v42 = vpack.c.bf16 %v2764_v21, %v2764_v21 }
0x1bd3   : > { %v4457_v15 = vpop.eup %4456 }
0x1bd4   : > { %v2762_v23 = vmul.f32 %v4457_v15, %v4451_v19 }
0x1bd6   : > { %v2765_v0 = vpack.c.bf16 %v2763_v22, %v2762_v23 }
0x1bd8   : > { %4106 = vmatprep.mubr.msk.bf16.mxu0 %vm860_vm4, %v2765_v0 }
0x1bd9   : > { %4107 = vmatmul.mubr.msk.bf16.vlgmr.msra.gmra.mrb[48].mxu0 %vm860_vm4, %v2766_v42 }
0x1bda   : > { %4111 = vmatpush3.bf16.msra.mxu0 %v4320_v7 }
0x1bf5   : > { %v2964_v24 = vpop.xlane.xlu1 %2963 }
0x1bf6   : > { %v2971_v26 = vsub.f32 %v2948_v52, %v2964_v24 }
0x1bf8   : > { %v2974_v63 = vmul.f32 1.442695, %v2971_v26 }
0x1bf9   : > { %v2970_v46 = vpop.xlane.xlu1 %2969 }
0x1bfa   : > { %v2973_v62 = vsub.f32 %v4122_v51, %v2970_v46 }
0x1bfc   : > { %v2978_v3 = vmul.f32 1.442695, %v2973_v62 }
0x1bfd   : > { %v2967_v29 = vpop.xlane.xlu0 %2966 }
0x1bfe   : > { %4458 = vpow2.f32 %v2978_v3  ;;  %v2972_v30 = vsub.f32 %v5279_v54, %v2967_v29 }
0x1bff   : > { %4460 = vpow2.f32 %v2974_v63 }
0x1c00   : > { %v2976_v31 = vmul.f32 1.442695, %v2972_v30 }
0x1c02   : > { %4462 = vpow2.f32 %v2976_v31 }
0x1c08   : > { %v4459_v36 = vpop.eup %4458 }
0x1c09   : > { %v2986_v44 = vsel %vm867_vm5, %v4459_v36, 0.0  ;;  %v4461_v38 = vpop.eup %4460 }
0x1c0a   : > { %2987 = vadd.xlane.f32.xlu0 %v2986_v44  ;;  %v2980_v2 = vsel %vm860_vm4, %v4461_v38, 0.0 }
0x1c0c   : > { %v4463_v47 = vpop.eup %4462 }
0x1c0d   : > { %v2983_v11 = vsel %vm860_vm4, %v4463_v47, 0.0 }
0x1c0e   : > { %2981 = vadd.xlane.f32.xlu0 %v2980_v2  ;;  %2984 = vadd.xlane.f32.xlu1 %v2983_v11 }
0x1c1f   : > { %2997 = vrot.lane.b32.xlu1 %v5162_v43, %s5481_s21 }
0x1c24   : > { %2999 = vrot.lane.b32.xlu0 %v5174_v32, %s5481_s21  ;;  %s4524_s21 = scalar_lea.vmem %s4523_s20, 32 }
0x1c97   : > { %v2988_v48 = vpop.xlane.xlu0 %2987 }
0x1c9b   : > { %v2985_v49 = vpop.xlane.xlu1 %2984  ;;  %v2982_v50 = vpop.xlane.xlu0 %2981 }
0x1c9c   : > { %4464 = vrcp.f32 %v2985_v49 }
0x1c9d   : > { %4466 = vrcp.f32 %v2982_v50 }
0x1c9e   : > { %4468 = vrcp.f32 %v2988_v48 }
0x1c9f   : > { %v2998_v51 = vpop.permute.xlu1 %2997  ;;  %v3000_v18 = vpop.permute.xlu0 %2999 }
0x1ca0   : > { %4124 = vmatprep.subr.bf16.mxu0 %v2998_v51  ;;  %v3009_v59 = vand.u32 %v3000_v18, %v4887_v34  ;;  %v3751_v34 = vld [vmem:[%s5451_s8 + $0x3] ss:$0 sm:$0xff] }
0x1ca1   : > { %3133 = vrot.lane.b32.xlu1 %v3751_v34, %s4590_s18  ;;  %s4518_s18 = scalar_lea.vmem %s5398_s26, 16 }
0x1ca2   : > { %p4519_p6 = scmp.ne.s32.totalorder %s5398_s26, %s4518_s18  ;;  %p4526_p3 = scmp.lt.s32.totalorder %s4524_s21, %s4518_s18 }
0x1ca4   : > { %p4520_p10 = pnand %p4519_p6, %p5482_p9  ;;  %p4527_p4 = por %p4526_p3, %p4525_p2 }
0x1ca6   : > { %v4465_v52 = vpop.eup %4464  ;;  %p4521_p12 = pneg %p4520_p10 }
0x1ca7   : > { %v4467_v53 = vpop.eup %4466  ;;  %v2993_v43 = vmul.f32 %v4465_v52, %v4463_v47  ;;  %v4323_v52 = vld [vmem:[%s5449_s6 + $0x28] sm:$0xff]  }
0x1ca8   : > { %v2992_v57 = vmul.f32 %v4467_v53, %v4461_v38  ;;  %v4469_v32 = vpop.eup %4468  ;;  %v4324_v53 = vld [vmem:[%s5449_s6 + $0x30] sm:$0xff]   ;;  %p4528_p7 = pnand %p4527_p4, %p4521_p12 }
0x1ca9   : > { %v2994_v35 = vmul.f32 %v4469_v32, %v4459_v36 }
0x1caa   : > { %v2995_v27 = vpack.c.bf16 %v2993_v43, %v2992_v57 }
0x1cab   : > { %v2996_v28 = vpack.c.bf16 %v2994_v35, %v2994_v35 }
0x1cac   : > { %v4108_v54 = vpop.f32.mrb[48].mxu0 }
0x1cad   : > { %v2815_v55 = vpop.f32.mrb[49].mxu0  ;;  %v2830_v25 = vpack.c.bf16 %v4108_v54, %v4108_v54  ;;  %v4325_v54 = vld [vmem:[%s5449_s6 + $0x38] sm:$0xff]  }
0x1cae   : > { %v4109_v56 = vpop.f32.mrb[50].mxu0 }
0x1caf   : > { %v2818_v58 = vpop.f32.mrb[51].mxu0 }
0x1cb0   : > { %v2829_v20 = vpack.c.bf16 %v2818_v58, %v2815_v55 }
0x1cb2   : > { %4112 = vmatprep.mubr.msk.bf16.mxu0 %vm799_vm2, %v2829_v20 }
0x1cb3   : > { %4113 = vmatmul.mubr.msk.bf16.vlgmr.msra.gmra.mrb[52].mxu0 %vm799_vm2, %v2830_v25 }
0x1cb4   : > { %4125 = vmatpush3.bf16.msra.mxu0 %v2998_v51  ;;  %4128 = vmatprep.mubr.msk.bf16.mxu0 %vm860_vm4, %v2995_v27  ;;  %v4322_v51 = vld [vmem:[%s5449_s6 + $0x20] sm:$0xff]  }
0x1cb5   : > { %4126 = vmatprep.subr.bf16.mxu0 %v3009_v59  ;;  %4138 = vmatprep.subr.bf16.mxu1 %v4322_v51 }
0x1cb6   : > { %4139 = vmatpush3.bf16.msra.mxu1 %v4322_v51 }
0x1cb7   : > { %4140 = vmatprep.subr.bf16.mxu1 %v4323_v52 }
0x1cb8   : > { %4127 = vmatpush3.bf16.msra.mxu0 %v3009_v59  ;;  %v3752_v59 = vld [vmem:[#allocation2 + $0xa] ss:$0 sm:$0xff] }
0x1cb9   : > { %4132 = vmatprep.subr.bf16.mxu0 %v4321_v39 }
0x1cba   : > { %4141 = vmatpush3.bf16.msra.mxu1 %v4323_v52 }
0x1cbb   : > { %4129 = vmatmul.mubr.msk.bf16.vlgmr.msra.gmra.mrb[56].mxu0 %vm860_vm4, %v2996_v28  ;;  %4142 = vmatprep.subr.bf16.mxu1 %v4324_v53 }
0x1cbc   : > { %4133 = vmatpush3.bf16.msra.mxu0 %v4321_v39 }
0x1cbe   : > { %4143 = vmatpush3.bf16.msra.mxu1 %v4324_v53  ;;  %v3788_v53 = vld [vmem:[%s5451_s8 + $0x7] ss:$0 sm:$0xff] }
0x1cbf   : > { %4144 = vmatprep.subr.bf16.mxu1 %v4325_v54 }
0x1cc2   : > { %4145 = vmatpush3.bf16.msra.mxu1 %v4325_v54 }
0x1d13   : > { %v3134_v22 = vpop.permute.xlu1 %3133 }
0x1d86   : > { %v4114_v60 = vpop.f32.mrb[52].mxu0 }
0x1d87   : > { %v2893_v19 = vadd.f32 %v4114_v60, %v5268_v41  ;;  %v2877_v45 = vpop.f32.mrb[53].mxu0  ;;  %v3753_v60 = vld [vmem:[#allocation2 + $0xb] ss:$0 sm:$0xff] }
0x1d88   : > { %v2891_v61 = vadd.f32 %v2877_v45, %v5271_v37  ;;  %v4115_v1 = vpop.f32.mrb[54].mxu0 }
0x1d89   : > { %v2880_v33 = vpop.f32.mrb[55].mxu0 }
0x1d8a   : > { %v2892_v4 = vadd.f32 %v2880_v33, %v5274_v40 }
0x1d8e   : > { %v4130_v5 = vpop.f32.mrb[56].mxu0 }
0x1d8f   : > { %v3045_v6 = vpop.f32.mrb[57].mxu0  ;;  %v3060_v12 = vpack.c.bf16 %v4130_v5, %v4130_v5 }
0x1d90   : > { %v4131_v8 = vpop.f32.mrb[58].mxu0 }
0x1d91   : > { %v3048_v9 = vpop.f32.mrb[59].mxu0 }
0x1d92   : > { %v3059_v10 = vpack.c.bf16 %v3048_v9, %v3045_v6  ;;  %v4326_v9 = vld [vmem:[%s5450_s7 + $0x40] sm:$0xff]  }
0x1d93   : > { %4150 = vmatprep.subr.bf16.mxu0 %v4326_v9 }
0x1d94   : > { %4134 = vmatprep.mubr.msk.bf16.mxu0 %vm799_vm2, %v3059_v10  ;;  %v4327_v10 = vld [vmem:[%s5450_s7 + $0x48] sm:$0xff]  }
0x1d95   : > { %4135 = vmatmul.mubr.msk.bf16.vlgmr.msra.gmra.mrb[60].mxu0 %vm799_vm2, %v3060_v12  ;;  %v4328_v12 = vld [vmem:[%s5450_s7 + $0x50] sm:$0xff]  }
0x1d96   : > { %4151 = vmatpush3.bf16.msra.mxu0 %v4326_v9 }
0x1d97   : > { %4152 = vmatprep.subr.bf16.mxu0 %v4327_v10 }
0x1d9a   : > { %4153 = vmatpush3.bf16.msra.mxu0 %v4327_v10 }
0x1d9b   : > { %4154 = vmatprep.subr.bf16.mxu0 %v4328_v12 }
0x1d9e   : > { %4155 = vmatpush3.bf16.msra.mxu0 %v4328_v12 }
0x1e68   : > { %v4136_v13 = vpop.f32.mrb[60].mxu0 }
0x1e69   : > { %v3123_v15 = vadd.f32 %v4136_v13, %v2893_v19  ;;  %v3107_v41 = vpop.f32.mrb[61].mxu0  ;;  %v4329_v13 = vld [vmem:[%s5450_s7 + $0x58] sm:$0xff]  }
0x1e6a   : > { %v3121_v21 = vadd.f32 %v3107_v41, %v2891_v61  ;;  %v4137_v23 = vpop.f32.mrb[62].mxu0  ;;  %4156 = vmatprep.subr.bf16.mxu0 %v4329_v13  ;;  %v4331_v41 = vld [vmem:[%s5450_s7 + $0x68] sm:$0xff]  }
0x1e6b   : > { %v3110_v37 = vpop.f32.mrb[63].mxu0  ;;  %v3126_v42 = vadd.f32 %v3123_v15, %v5109_v16  ;;  %4157 = vmatpush3.bf16.msra.mxu0 %v4329_v13  ;;  %v4330_v15 = vld [vmem:[%s5450_s7 + $0x60] sm:$0xff]   ;;  %v4333_v23 = vld [vmem:[%s5450_s7 + $0x78] sm:$0xff]  }
0x1e6c   : > { %v3124_v0 = vadd.f32 %v3121_v21, %v5106_v14  ;;  %v3122_v40 = vadd.f32 %v3110_v37, %v2892_v4  ;;  %4158 = vmatprep.subr.bf16.mxu0 %v4330_v15  ;;  %v4332_v21 = vld [vmem:[%s5450_s7 + $0x70] sm:$0xff]   ;;  %v3762_v37 = vld [vmem:[%s5451_s8 + $0x5] ss:$0 sm:$0xff] }
0x1e6d   : > { %v3138_v63 = vadd.f32 %v3134_v22, %v3126_v42 }
0x1e6e   : > { %v3125_v24 = vadd.f32 %v3122_v40, %v5112_v17  ;;  %v5326_v26 = vadd.f32 %v3134_v22, %v3124_v0 }
0x1e6f   : > { %v3147_v29 = vsel %vm553_vm1, %v3138_v63, 0.0  ;;  %4159 = vmatpush3.bf16.msra.mxu0 %v4330_v15 }
0x1e70   : > { %v3137_v46 = vadd.f32 %v3134_v22, %v3125_v24  ;;  %v3141_v62 = vsel %vm490_vm0, %v5326_v26, 0.0  ;;  %4160 = vmatprep.subr.bf16.mxu0 %v4331_v41 }
0x1e71   : > { %3142 = vadd.xlane.f32.xlu1 %v3141_v62 }
0x1e72   : > { %v3144_v3 = vsel %vm490_vm0, %v3137_v46, 0.0 }
0x1e73   : > { %3145 = vadd.xlane.f32.xlu0 %v3144_v3  ;;  %4161 = vmatpush3.bf16.msra.mxu0 %v4331_v41 }
0x1e74   : > { %4162 = vmatprep.subr.bf16.mxu0 %v4332_v21 }
0x1e77   : > { %3148 = vadd.xlane.f32.xlu0 %v3147_v29  ;;  %4163 = vmatpush3.bf16.msra.mxu0 %v4332_v21 }
0x1e78   : > { %4164 = vmatprep.subr.bf16.mxu0 %v4333_v23 }
0x1e7b   : > { %4165 = vmatpush3.bf16.msra.mxu0 %v4333_v23 }
0x1efe   : > { %v3143_v14 = vpop.xlane.xlu1 %3142 }
0x1eff   : > { %v3150_v30 = vmul.f32 0.015625, %v3143_v14 }
0x1f00   : > { %v3146_v31 = vpop.xlane.xlu0 %3145 }
0x1f01   : > { %v3153_v16 = vsub.f32 %v5326_v26, %v3150_v30  ;;  %v3151_v17 = vmul.f32 0.015625, %v3146_v31 }
0x1f03   : > { %v3154_v36 = vsub.f32 %v3137_v46, %v3151_v17  ;;  %v3156_v44 = vmul.f32 %v3153_v16, %v3153_v16 }
0x1f04   : > { %v3149_v38 = vpop.xlane.xlu0 %3148 }
0x1f05   : > { %v3152_v47 = vmul.f32 0.015625, %v3149_v38  ;;  %v3159_v2 = vsel %vm490_vm0, %v3156_v44, 0.0  ;;  %v3157_v11 = vmul.f32 %v3154_v36, %v3154_v36 }
0x1f06   : > { %3160 = vadd.xlane.f32.xlu1 %v3159_v2 }
0x1f07   : > { %v3155_v7 = vsub.f32 %v3138_v63, %v3152_v47  ;;  %v3162_v48 = vsel %vm490_vm0, %v3157_v11, 0.0 }
0x1f08   : > { %3163 = vadd.xlane.f32.xlu0 %v3162_v48 }
0x1f09   : > { %v3158_v49 = vmul.f32 %v3155_v7, %v3155_v7 }
0x1f0b   : > { %v3165_v50 = vsel %vm553_vm1, %v3158_v49, 0.0 }
0x1f0c   : > { %3166 = vadd.xlane.f32.xlu1 %v3165_v50 }
0x1f93   : > { %v3161_v55 = vpop.xlane.xlu1 %3160 }
0x1f94   : > { %v3168_v56 = vmul.f32 0.015625, %v3161_v55 }
0x1f95   : > { %v3164_v57 = vpop.xlane.xlu0 %3163 }
0x1f96   : > { %v3171_v43 = vadd.f32 1e-05, %v3168_v56  ;;  %v3169_v58 = vmul.f32 0.015625, %v3164_v57 }
0x1f98   : > { %4470 = vrsqrt.f32 %v3171_v43  ;;  %v3172_v18 = vadd.f32 1e-05, %v3169_v58 }
0x1f99   : > { %v3167_v20 = vpop.xlane.xlu1 %3166 }
0x1f9a   : > { %4472 = vrsqrt.f32 %v3172_v18  ;;  %v3170_v25 = vmul.f32 0.015625, %v3167_v20 }
0x1f9c   : > { %v3173_v32 = vadd.f32 1e-05, %v3170_v25 }
0x1f9e   : > { %4474 = vrsqrt.f32 %v3173_v32 }
0x1fa2   : > { %v4471_v27 = vpop.eup %4470 }
0x1fa3   : > { %v3177_v35 = vmul.f32 %v4471_v27, %v3153_v16 }
0x1fa4   : > { %v4473_v28 = vpop.eup %4472 }
0x1fa5   : > { %v3178_v39 = vmul.f32 %v4473_v28, %v3154_v36  ;;  %v3184_v34 = vmul.f32 %v3752_v59, %v3177_v35  ;;  %v4334_v35 = vld [vmem:[%s5452_s9] sm:$0xff]   ;;  %v4597_v28 = vmov 0.0  }
0x1fa6   : > { %4170 = vmatprep.subr.bf16.mxu1 %v4597_v28 }
0x1fa7   : > { %v3185_v19 = vmul.f32 %v3752_v59, %v3178_v39  ;;  %v3191_v1 = vadd.f32 %v3753_v60, %v3184_v34  ;;  %v4336_v39 = vld [vmem:[%s5452_s9 + $0x10] sm:$0xff]   ;;  %v4337_v34 = vld [vmem:[%s5452_s9 + $0x18] sm:$0xff]  }
0x1fa8   : > { %v4475_v45 = vpop.eup %4474 }
0x1fa9   : > { %v3179_v61 = vmul.f32 %v4475_v45, %v3155_v7  ;;  %v3192_v33 = vadd.f32 %v3753_v60, %v3185_v19 }
0x1fab   : > { %v3194_v4 = vpack.c.bf16 %v3192_v33, %v3191_v1  ;;  %v3186_v5 = vmul.f32 %v3752_v59, %v3179_v61  ;;  %v3431_v1 = vld [vmem:[#allocation2 + $0x2] sm:$0x1] }
0x1fad   : > { %4146 = vmatprep.mubr.msk.bf16.mxu1 %vm490_vm0, %v3194_v4  ;;  %v3193_v6 = vadd.f32 %v3753_v60, %v3186_v5  ;;  %v3432_v4 = vld [vmem:[#allocation2 + $0x3] sm:$0x1] }
0x1faf   : > { %v3195_v8 = vpack.c.bf16 %v3193_v6, %v3193_v6 }
0x1fb1   : > { %4147 = vmatmul.mubr.msk.bf16.vlgmr.msra.gmra.mrb[64].mxu1 %vm490_vm0, %v3195_v8 }
0x1fb2   : > { %4171 = vmatpush3.bf16.msra.mxu1 %v4334_v35  ;;  %4178 = vmatprep.mubr.msk.bf16.mxu1 %vm4598_vm6, %v4597_v28 }
0x1fb3   : > { %4172 = vmatprep.subr.bf16.mxu1 %v4597_v28 }
0x2084   : > { %v4148_v22 = vpop.f32.mrb[64].mxu1 }
0x2085   : > { %v3283_v0 = vadd.f32 %v4148_v22, %v3762_v37  ;;  %v3274_v40 = vpop.f32.mrb[65].mxu1 }
0x2086   : > { %v3275_v42 = vadd.f32 %v3762_v37, %v3274_v40  ;;  %v4149_v24 = vpop.f32.mrb[66].mxu1 }
0x2087   : > { %v3771_v46 = vmul.f32 -1.702, %v3283_v0  ;;  %v3277_v62 = vpop.f32.mrb[67].mxu1 }
0x2088   : > { %v3769_v63 = vmul.f32 -1.702, %v3275_v42  ;;  %v3278_v3 = vadd.f32 %v3762_v37, %v3277_v62 }
0x2089   : > { %v3298_v29 = vmul.f32 1.442695, %v3771_v46 }
0x208a   : > { %v3294_v14 = vmul.f32 1.442695, %v3769_v63  ;;  %v3770_v30 = vmul.f32 -1.702, %v3278_v3 }
0x208b   : > { %4476 = vpow2.f32 %v3298_v29 }
0x208c   : > { %4478 = vpow2.f32 %v3294_v14  ;;  %v3296_v31 = vmul.f32 1.442695, %v3770_v30 }
0x208e   : > { %4480 = vpow2.f32 %v3296_v31 }
0x2095   : > { %v4477_v16 = vpop.eup %4476 }
0x2096   : > { %v4479_v17 = vpop.eup %4478  ;;  %v3302_v36 = vadd.f32 1.0, %v4477_v16 }
0x2097   : > { %v3300_v44 = vadd.f32 1.0, %v4479_v17 }
0x2098   : > { %v4481_v38 = vpop.eup %4480  ;;  %4482 = vrcp.f32 %v3302_v36 }
0x2099   : > { %4484 = vrcp.f32 %v3300_v44  ;;  %v3301_v47 = vadd.f32 1.0, %v4481_v38 }
0x209b   : > { %4486 = vrcp.f32 %v3301_v47 }
0x20a2   : > { %v4483_v2 = vpop.eup %4482 }
0x20a3   : > { %v4485_v11 = vpop.eup %4484  ;;  %v3311_v48 = vmul.f32 %v4483_v2, %v3283_v0 }
0x20a4   : > { %v3309_v49 = vmul.f32 %v4485_v11, %v3275_v42 }
0x20a5   : > { %v4487_v7 = vpop.eup %4486  ;;  %v3313_v52 = vpack.c.bf16 %v3311_v48, %v3311_v48 }
0x20a6   : > { %v3310_v50 = vmul.f32 %v4487_v7, %v3278_v3 }
0x20a8   : > { %v3312_v51 = vpack.c.bf16 %v3310_v50, %v3309_v49 }
0x20aa   : > { %4166 = vmatprep.mubr.bf16.mxu0 %v3312_v51 }
0x20ab   : > { %4167 = vmatmul.mubr.bf16.vlgmr.msra.gmra.mrb[64].mxu0 %v3313_v52 }
0x217e   : > { %v4168_v54 = vpop.f32.mrb[64].mxu0 }
0x217f   : > { %v3418_v55 = vpop.f32.mrb[65].mxu0 }
0x2180   : > { %v3419_v56 = vadd.f32 %v3788_v53, %v3418_v55  ;;  %v4169_v57 = vpop.f32.mrb[66].mxu0 }
0x2181   : > { %v3421_v43 = vpop.f32.mrb[67].mxu0 }
0x2182   : > { %v3430_v58 = vadd.f32 %v3419_v56, %v5326_v26  ;;  %v4335_v26 = vld [vmem:[%s5452_s9 + $0x8] sm:$0xff]  }
0x2183   : > { %4173 = vmatpush3.bf16.msra.mxu1 %v4335_v26 }
0x2184   : > { %v3433_v18 = vsel %vm553_vm1, %v3430_v58, 0.0  ;;  %4174 = vmatprep.subr.bf16.mxu1 %v4597_v28 }
0x2185   : > { %3434 = vadd.xlane.f32.xlu0 %v3433_v18 }
0x2187   : > { %4175 = vmatpush3.bf16.msra.mxu1 %v4336_v39 }
0x2188   : > { %4176 = vmatprep.subr.bf16.mxu1 %v4597_v28 }
0x218b   : > { %4177 = vmatpush3.bf16.msra.mxu1 %v4337_v34 }
0x2212   : > { %v3435_v20 = vpop.xlane.xlu0 %3434 }
0x2213   : > { %v3436_v25 = vmul.f32 0.015625, %v3435_v20 }
0x2215   : > { %v3437_v32 = vsub.f32 %v3430_v58, %v3436_v25 }
0x2217   : > { %v3438_v27 = vmul.f32 %v3437_v32, %v3437_v32 }
0x2219   : > { %v3439_v59 = vsel %vm553_vm1, %v3438_v27, 0.0 }
0x221a   : > { %3440 = vadd.xlane.f32.xlu1 %v3439_v59 }
0x22a7   : > { %v3441_v60 = vpop.xlane.xlu1 %3440 }
0x22a8   : > { %v3442_v19 = vmul.f32 0.015625, %v3441_v60 }
0x22aa   : > { %v3443_v45 = vadd.f32 1e-05, %v3442_v19 }
0x22ac   : > { %4488 = vrsqrt.f32 %v3443_v45 }
0x22b6   : > { %v4489_v61 = vpop.eup %4488 }
0x22b7   : > { %v3445_v33 = vmul.f32 %v4489_v61, %v3437_v32 }
0x22b9   : > { %v3446_v5 = vmul.f32 %v3445_v33, %v3431_v1 }
0x22bb   : > { %v3447_v6 = vadd.f32 %v3446_v5, %v3432_v4 }
0x22bd   : > { %v3448_v8 = vpack.c.bf16 %v3447_v6, %v3447_v6 }
0x22bf   : > { %4179 = vmatmul.mubr.msk.bf16.vlgmr.msra.gmra.mrb[68].mxu1 %vm490_vm0, %v3448_v8 }
0x2392   : > { %v3518_v9 = vpop.f32.mrb[68].mxu1 }
0x2393   : > { %3524 = vst [vmem:[%s366_s11] sm:$0x1] %v3518_v9  ;;  %v4180_v10 = vpop.f32.mrb[69].mxu1 }
0x2394   : > { %v3521_v12 = vpop.f32.mrb[70].mxu1 }
0x2395   : > { %4531 = shalt.err (!%p4528_p7)
}
0x2396   : > { %s4532_s28 = scalar_lea.hbm %s5403_s25, 16  ;;  %s4536_s30 = scalar_lea.hbm %s5453_s10, 32 }
0x2397   : > { %p4533_p8 = scmp.ne.s32.totalorder %s5403_s25, %s4532_s28  ;;  %p4537_p1 = scmp.lt.u32.totalorder %s5403_s25, %s5453_s10 }
0x2398   : > { %p4538_p0 = scmp.lt.u32.totalorder %s4536_s30, %s4532_s28  ;;  %p4540_p6 = scmp.lt.u32.totalorder %s4532_s28, %s5403_s25 }
0x2399   : > { %p4534_p11 = pnand %p4533_p8, %p5482_p9 }
0x239a   : > { %p4539_p5 = por %p4538_p0, %p4537_p1 }
0x239b   : > { %p4535_p13 = pneg %p4534_p11 }
0x239c   : > { %p4541_p10 = por %p4540_p6, %p4539_p5 }
0x239e   : > { %p4542_p12 = pnand %p4541_p10, %p4535_p13 }
0x23a0   : > { %4545 = shalt.err (!%p4542_p12)
}
0x23a1   : > { %4203 = dma.vmem_to_hbm [thread:$0]  (%p5482_p9), %s5398_s26, 16, %s5403_s25, %s3526_s27   ;;  %v4181_v13 = vpop.f32.mrb[71].mxu1 }
0x23a2 PF: > { %p4215_p2 = scmp.ge.s32.totalorder %s4584_s16, 2  ;;  %s3550_s18 = sand.u32 1, %s4572_s13  }
0x23a3   : > { %p5483_p3 = scmp.ne.s32.totalorder %s5470_s24, 0  ;;  %s3551_s20 = scalar_lea.sflag [#allocation4], %s3550_s18 }
0x23a5   : > { %p4210_p4 = pnand %p4215_p2, %p5483_p3 }
0x23a7   : > { %4567 = dma.done.wait (!%p4210_p4), %s3551_s20, 16  }
0x23a8   : > { %4569 = vsyncadd (!%p4210_p4), %s3551_s20, 4294967280  ;;  %p21_p7 = scmp.ge.s32.totalorder %s4680_s19, 4   ;;  %s5484_s13 = smov %s4576_s14 }
0x23a9   : > { %s5485_s14 = smov %s4580_s15  ;;  %s5486_s15 = smov %s4691_s22 }
0x23aa   : > { %s5487_s16 = smov %s4680_s19  ;;  %23 = sbr.rel (!%p21_p7) target bundleno = 4 (0x4), region = 105 }
0x23b1   :  { %3555 = vsyncpa [#allocation3], 1 }
0x23b2   :  { %3557 = vsyncpa [#allocation3 + $0x1], 1 }
0x23b3   :  { %3558 = vsyncpa [#allocation4], 1 }
0x23b4   :  { %3560 = vsyncpa [#allocation4 + $0x1], 1 }

</bundles_post_ra>
